<compile_context>
chip_gen: v7x
topology: tpu7x:2x2x1
jax: 0.10.0
libtpu: 0.0.40
codegen_flags: <defaults>
</compile_context>

<pallas_src>
import functools

import jax
import jax.numpy as jnp
from jax.experimental import pallas as pl
from jax.experimental.pallas import tpu as pltpu

LANES = 128


def _cascade_kernel(n_layers, row_offsets, out_dim,
                    x_ref, w_ref, b_ref, out_ref, acts_ref):
    """Fused cascade forward over one batch tile.

    acts_ref: (bt, 128*n_layers) VMEM scratch in the MXU dtype.  Lane slot 0
    holds the (host lane-padded) input x; lane slot j (j>=1) holds hidden
    activation j-1 zero-padded to 128 lanes.  Layer i is one deep-K matmul of
    acts[:, :128*(i+1)] against the row-packed weight slab for that layer;
    weight rows corresponding to padded lanes are zero, so padding never
    contributes to the result.
    """
    # Slot 0 <- input tile (already lane-padded to 128 and cast on the host).
    acts_ref[:, 0:LANES] = x_ref[...]

    for i in range(n_layers):
        k = LANES * (i + 1)
        ro = row_offsets[i]
        w_i = w_ref[pl.ds(ro, k), :]                       # (k, 128), static offset
        y = jnp.dot(acts_ref[:, 0:k], w_i,
                    preferred_element_type=jnp.float32)    # one MXU pass / layer
        y = y + b_ref[pl.ds(i, 1), :]                      # f32 bias add
        if i < n_layers - 1:
            # f32 tanh keeps the kernel v5e-safe (no bf16 EUP there); padded
            # lanes stay exactly 0 (zero W cols + zero bias -> tanh(0)=0).
            y = jnp.tanh(y)
            acts_ref[:, k:k + LANES] = y.astype(acts_ref.dtype)
        else:
            out_ref[...] = y[:, 0:out_dim].astype(out_ref.dtype)


def _pack_cascade_params(weights, biases, mxu_dtype):
    """Fuse + row-pack all layer parameters for the kernel layout above.

    Returns:
      w_all: (sum_i 128*(i+1), 128) array in mxu_dtype.  For layer i (base row
             offset r_i), segment j lives at rows [r_i + 128*j,
             r_i + 128*j + width_j) / cols [0, out_i); everything else is 0.
      b_all: (n_layers, 128) f32, each row zero-padded past out_i.
      row_offsets: python list of per-layer base row offsets (static).
    """
    n = len(weights)
    f0 = weights[0].shape[0]
    outs = [w.shape[1] for w in weights]
    widths = [f0] + outs[:-1]        # widths of [x, a_0, ..., a_{n-2}]

    row_offsets, total_rows = [], 0
    for i in range(n):
        row_offsets.append(total_rows)
        total_rows += LANES * (i + 1)

    w_all = jnp.zeros((total_rows, LANES), jnp.float32)
    b_all = jnp.zeros((n, LANES), jnp.float32)
    for i, (w, b) in enumerate(zip(weights, biases)):
        out_i = w.shape[1]
        base = row_offsets[i]
        src = 0
        for j in range(i + 1):
            dst = base + LANES * j
            w_all = w_all.at[dst:dst + widths[j], 0:out_i].set(
                w[src:src + widths[j], :])
            src += widths[j]
        b_all = b_all.at[i, 0:out_i].set(b.reshape(-1))
    return w_all.astype(mxu_dtype), b_all, row_offsets


def cascade_net_pallas(x, weights, biases, *, batch_tile=None,
                       mxu_dtype=jnp.bfloat16):
    """x: (B, 64) float32; weights[i]: (in_i, out_i); biases[i]: (1, out_i)."""
    B, f0 = x.shape
    out_dim = weights[-1].shape[1]
    n_layers = len(weights)
    if batch_tile is None:
        batch_tile = B                      # grid=1: best on single-TC v5e/v6e
    batch_tile = min(batch_tile, B)
    assert batch_tile % 8 == 0, "batch_tile must be a multiple of 8 sublanes"
    assert B % batch_tile == 0, "B must be divisible by batch_tile"

    w_all, b_all, row_offsets = _pack_cascade_params(weights, biases, mxu_dtype)
    # Host-side lane pad (64 -> 128) + dtype cast of x (fused by XLA).
    x_p = jnp.pad(x, ((0, 0), (0, LANES - f0))).astype(mxu_dtype)

    kernel = functools.partial(_cascade_kernel, n_layers, tuple(row_offsets),
                               out_dim)
    return pl.pallas_call(
        kernel,
        out_shape=jax.ShapeDtypeStruct((B, out_dim), x.dtype),
        grid=(B // batch_tile,),
        in_specs=[
            pl.BlockSpec((batch_tile, LANES), lambda i: (i, 0)),
            # Fused parameters: full-array blocks, constant index_map
            # (resident across all grid steps, no per-step re-DMA).
            pl.BlockSpec(w_all.shape, lambda i: (0, 0)),
            pl.BlockSpec(b_all.shape, lambda i: (0, 0)),
        ],
        out_specs=pl.BlockSpec((batch_tile, out_dim), lambda i: (i, 0)),
        scratch_shapes=[pltpu.VMEM((batch_tile, LANES * n_layers), mxu_dtype)],
        compiler_params=pltpu.CompilerParams(
            dimension_semantics=("parallel",)),
    )(x_p, w_all, b_all)


def make_cascade_params(hidden_sizes, key):
    """Deterministic parameter init (PyTorch Linear-style uniform)."""
    sizes = [64] + list(hidden_sizes)
    sizes = sizes + list(reversed(sizes))
    weights, biases = [], []
    for i in range(len(sizes) - 1):
        fan_in = sum(sizes[: i + 1])
        fan_out = sizes[i + 1]
        key, kw, kb = jax.random.split(key, 3)
        bound = 1.0 / jnp.sqrt(jnp.float32(fan_in))
        w = jax.random.uniform(kw, (fan_in, fan_out), jnp.float32, -bound, bound)
        b = jax.random.uniform(kb, (1, fan_out), jnp.float32, -bound, bound)
        weights.append(w)
        biases.append(b)
    return weights, biases


def cascade_net_ref(x, weights, biases):
    """Plain-JAX (f32) reference of the PyTorch forward."""
    prev = [x]
    n = len(weights)
    for i in range(n):
        inp = jnp.concatenate(prev, axis=1)
        y = inp @ weights[i] + biases[i]
        if i < n - 1:
            y = jnp.tanh(y)
        prev.append(y)
    return y


if __name__ == "__main__":
    hidden_sizes = [32, 16]          # -> layer dims [64, 32, 16, 16, 32, 64]
    batch = 512
    batch_tile = 256                 # grid=2: feeds both v7x TCs; near-free on v5e/v6e

    key = jax.random.PRNGKey(0)
    key, kx = jax.random.split(key)
    x = jax.random.normal(kx, (batch, 64), jnp.float32)
    weights, biases = make_cascade_params(hidden_sizes, key)

    ref = cascade_net_ref(x, weights, biases)

    # Exact-path check (f32 MXU inputs) — verifies packed layout, per-layer row
    # offsets and the multi-block index_map (B > batch_tile).
    out_f32 = cascade_net_pallas(x, weights, biases, batch_tile=batch_tile,
                                 mxu_dtype=jnp.float32)
    out_f32 = jax.block_until_ready(out_f32)
    assert out_f32.shape == (batch, 64)
    assert jnp.allclose(out_f32, ref, atol=1e-4, rtol=1e-4)

    # Default fast path: bf16 params/activations, f32 accumulate.
    out = cascade_net_pallas(x, weights, biases, batch_tile=batch_tile)
    out = jax.block_until_ready(out)
    assert out.shape == (batch, 64)
    assert jnp.allclose(out, ref, atol=5e-2, rtol=5e-2)

    print("KERNEL_OK")
</pallas_src>

<mosaic_0001>
module attributes {stable_mosaic.version = 11 : i64} {
  func.func @_cascade_kernel(%arg0: i32, %arg1: memref<256x128xf32, #tpu.memory_space<vmem>>, %arg2: memref<1920x128xf32, #tpu.memory_space<vmem>>, %arg3: memref<5x128xf32, #tpu.memory_space<vmem>>, %arg4: memref<256x64xf32, #tpu.memory_space<vmem>>, %arg5: memref<256x640xf32, #tpu.memory_space<vmem>>) attributes {dimension_semantics = [#tpu.dimension_semantics<parallel>], iteration_bounds = array<i64: 2>, scalar_prefetch = 0 : i64, scratch_operands = 1 : i64, tpu.core_type = #tpu.core_type<tc>, window_params = [{transform_indices = @transform_0, window_bounds = array<i64: 256, 128>}, {pipeline_mode = #tpu.pipeline_mode<synchronous>, transform_indices = @transform_1, window_bounds = array<i64: 1920, 128>}, {pipeline_mode = #tpu.pipeline_mode<synchronous>, transform_indices = @transform_2, window_bounds = array<i64: 5, 128>}, {transform_indices = @transform_3, window_bounds = array<i64: 256, 64>}]} {
    %c0 = arith.constant 0 : index
    %c0_0 = arith.constant 0 : index
    %0 = vector.load %arg1[%c0, %c0_0] : memref<256x128xf32, #tpu.memory_space<vmem>>, vector<256x128xf32>
    %c0_1 = arith.constant 0 : index
    %c0_2 = arith.constant 0 : index
    %1 = vector.load %arg5[%c0_1, %c0_2] : memref<256x640xf32, #tpu.memory_space<vmem>>, vector<256x128xf32>
    tpu.vector_store %arg5[%c0_1, %c0_2], %0 {strides = array<i32>} : memref<256x640xf32, #tpu.memory_space<vmem>>, vector<256x128xf32>,
    %c0_3 = arith.constant 0 : index
    %c0_4 = arith.constant 0 : index
    %2 = vector.load %arg2[%c0_3, %c0_4] : memref<1920x128xf32, #tpu.memory_space<vmem>>, vector<128x128xf32>
    %c0_5 = arith.constant 0 : index
    %c0_6 = arith.constant 0 : index
    %3 = vector.load %arg5[%c0_5, %c0_6] : memref<256x640xf32, #tpu.memory_space<vmem>>, vector<256x128xf32>
    %cst = arith.constant dense<0.000000e+00> : vector<256x128xf32>
    %4 = tpu.matmul %3, %2, %cst {dimension_numbers = #tpu.dot_dimension_numbers<[1], [0], [0], [1], [0, 0, 1, 1], [], []>} : vector<256x128xf32>, vector<128x128xf32>, vector<256x128xf32> -> vector<256x128xf32>
    %c0_7 = arith.constant 0 : index
    %c0_8 = arith.constant 0 : index
    %5 = vector.load %arg3[%c0_7, %c0_8] : memref<5x128xf32, #tpu.memory_space<vmem>>, vector<1x128xf32>
    %6 = vector.broadcast %5 : vector<1x128xf32> to vector<256x128xf32>
    %7 = arith.addf %4, %6 : vector<256x128xf32>
    %8 = math.tanh %7 : vector<256x128xf32>
    %c0_9 = arith.constant 0 : index
    %c128 = arith.constant 128 : index
    %9 = vector.load %arg5[%c0_9, %c128] : memref<256x640xf32, #tpu.memory_space<vmem>>, vector<256x128xf32>
    tpu.vector_store %arg5[%c0_9, %c128], %8 {strides = array<i32>} : memref<256x640xf32, #tpu.memory_space<vmem>>, vector<256x128xf32>,
    %c128_10 = arith.constant 128 : index
    %c0_11 = arith.constant 0 : index
    %10 = vector.load %arg2[%c128_10, %c0_11] : memref<1920x128xf32, #tpu.memory_space<vmem>>, vector<256x128xf32>
    %c0_12 = arith.constant 0 : index
    %c0_13 = arith.constant 0 : index
    %11 = vector.load %arg5[%c0_12, %c0_13] : memref<256x640xf32, #tpu.memory_space<vmem>>, vector<256x256xf32>
    %cst_14 = arith.constant dense<0.000000e+00> : vector<256x128xf32>
    %12 = tpu.matmul %11, %10, %cst_14 {dimension_numbers = #tpu.dot_dimension_numbers<[1], [0], [0], [1], [0, 0, 1, 1], [], []>} : vector<256x256xf32>, vector<256x128xf32>, vector<256x128xf32> -> vector<256x128xf32>
    %c1 = arith.constant 1 : index
    %c0_15 = arith.constant 0 : index
    %13 = vector.load %arg3[%c1, %c0_15] : memref<5x128xf32, #tpu.memory_space<vmem>>, vector<1x128xf32>
    %14 = vector.broadcast %13 : vector<1x128xf32> to vector<256x128xf32>
    %15 = arith.addf %12, %14 : vector<256x128xf32>
    %16 = math.tanh %15 : vector<256x128xf32>
    %c0_16 = arith.constant 0 : index
    %c256 = arith.constant 256 : index
    %17 = vector.load %arg5[%c0_16, %c256] : memref<256x640xf32, #tpu.memory_space<vmem>>, vector<256x128xf32>
    tpu.vector_store %arg5[%c0_16, %c256], %16 {strides = array<i32>} : memref<256x640xf32, #tpu.memory_space<vmem>>, vector<256x128xf32>,
    %c384 = arith.constant 384 : index
    %c0_17 = arith.constant 0 : index
    %18 = vector.load %arg2[%c384, %c0_17] : memref<1920x128xf32, #tpu.memory_space<vmem>>, vector<384x128xf32>
    %c0_18 = arith.constant 0 : index
    %c0_19 = arith.constant 0 : index
    %19 = vector.load %arg5[%c0_18, %c0_19] : memref<256x640xf32, #tpu.memory_space<vmem>>, vector<256x384xf32>
    %cst_20 = arith.constant dense<0.000000e+00> : vector<256x128xf32>
    %20 = tpu.matmul %19, %18, %cst_20 {dimension_numbers = #tpu.dot_dimension_numbers<[1], [0], [0], [1], [0, 0, 1, 1], [], []>} : vector<256x384xf32>, vector<384x128xf32>, vector<256x128xf32> -> vector<256x128xf32>
    %c2 = arith.constant 2 : index
    %c0_21 = arith.constant 0 : index
    %21 = vector.load %arg3[%c2, %c0_21] : memref<5x128xf32, #tpu.memory_space<vmem>>, vector<1x128xf32>
    %22 = vector.broadcast %21 : vector<1x128xf32> to vector<256x128xf32>
    %23 = arith.addf %20, %22 : vector<256x128xf32>
    %24 = math.tanh %23 : vector<256x128xf32>
    %c0_22 = arith.constant 0 : index
    %c384_23 = arith.constant 384 : index
    %25 = vector.load %arg5[%c0_22, %c384_23] : memref<256x640xf32, #tpu.memory_space<vmem>>, vector<256x128xf32>
    tpu.vector_store %arg5[%c0_22, %c384_23], %24 {strides = array<i32>} : memref<256x640xf32, #tpu.memory_space<vmem>>, vector<256x128xf32>,
    %c768 = arith.constant 768 : index
    %c0_24 = arith.constant 0 : index
    %26 = vector.load %arg2[%c768, %c0_24] : memref<1920x128xf32, #tpu.memory_space<vmem>>, vector<512x128xf32>
    %c0_25 = arith.constant 0 : index
    %c0_26 = arith.constant 0 : index
    %27 = vector.load %arg5[%c0_25, %c0_26] : memref<256x640xf32, #tpu.memory_space<vmem>>, vector<256x512xf32>
    %cst_27 = arith.constant dense<0.000000e+00> : vector<256x128xf32>
    %28 = tpu.matmul %27, %26, %cst_27 {dimension_numbers = #tpu.dot_dimension_numbers<[1], [0], [0], [1], [0, 0, 1, 1], [], []>} : vector<256x512xf32>, vector<512x128xf32>, vector<256x128xf32> -> vector<256x128xf32>
    %c3 = arith.constant 3 : index
    %c0_28 = arith.constant 0 : index
    %29 = vector.load %arg3[%c3, %c0_28] : memref<5x128xf32, #tpu.memory_space<vmem>>, vector<1x128xf32>
    %30 = vector.broadcast %29 : vector<1x128xf32> to vector<256x128xf32>
    %31 = arith.addf %28, %30 : vector<256x128xf32>
    %32 = math.tanh %31 : vector<256x128xf32>
    %c0_29 = arith.constant 0 : index
    %c512 = arith.constant 512 : index
    %33 = vector.load %arg5[%c0_29, %c512] : memref<256x640xf32, #tpu.memory_space<vmem>>, vector<256x128xf32>
    tpu.vector_store %arg5[%c0_29, %c512], %32 {strides = array<i32>} : memref<256x640xf32, #tpu.memory_space<vmem>>, vector<256x128xf32>,
    %c1280 = arith.constant 1280 : index
    %c0_30 = arith.constant 0 : index
    %34 = vector.load %arg2[%c1280, %c0_30] : memref<1920x128xf32, #tpu.memory_space<vmem>>, vector<640x128xf32>
    %c0_31 = arith.constant 0 : index
    %c0_32 = arith.constant 0 : index
    %35 = vector.load %arg5[%c0_31, %c0_32] : memref<256x640xf32, #tpu.memory_space<vmem>>, vector<256x640xf32>
    %cst_33 = arith.constant dense<0.000000e+00> : vector<256x128xf32>
    %36 = tpu.matmul %35, %34, %cst_33 {dimension_numbers = #tpu.dot_dimension_numbers<[1], [0], [0], [1], [0, 0, 1, 1], [], []>} : vector<256x640xf32>, vector<640x128xf32>, vector<256x128xf32> -> vector<256x128xf32>
    %c4 = arith.constant 4 : index
    %c0_34 = arith.constant 0 : index
    %37 = vector.load %arg3[%c4, %c0_34] : memref<5x128xf32, #tpu.memory_space<vmem>>, vector<1x128xf32>
    %38 = vector.broadcast %37 : vector<1x128xf32> to vector<256x128xf32>
    %39 = arith.addf %36, %38 : vector<256x128xf32>
    %40 = vector.extract_strided_slice %39 {offsets = [0, 0], sizes = [256, 64], strides = [1, 1]} : vector<256x128xf32> to vector<256x64xf32>
    %c0_35 = arith.constant 0 : index
    %c0_36 = arith.constant 0 : index
    %41 = vector.load %arg4[%c0_35, %c0_36] : memref<256x64xf32, #tpu.memory_space<vmem>>, vector<256x64xf32>
    tpu.vector_store %arg4[%c0_35, %c0_36], %40 {strides = array<i32>} : memref<256x64xf32, #tpu.memory_space<vmem>>, vector<256x64xf32>,
    return
  }
  func.func @transform_0(%arg0: i32) -> (i32, i32) {
    %c0_i32 = arith.constant 0 : i32
    %c0_i32_0 = arith.constant 0 : i32
    return %arg0, %c0_i32 : i32, i32
  }
  func.func @transform_1(%arg0: i32) -> (i32, i32) {
    %c0_i32 = arith.constant 0 : i32
    %c0_i32_0 = arith.constant 0 : i32
    %c0_i32_1 = arith.constant 0 : i32
    return %c0_i32, %c0_i32_0 : i32, i32
  }
  func.func @transform_2(%arg0: i32) -> (i32, i32) {
    %c0_i32 = arith.constant 0 : i32
    %c0_i32_0 = arith.constant 0 : i32
    %c0_i32_1 = arith.constant 0 : i32
    return %c0_i32, %c0_i32_0 : i32, i32
  }
  func.func @transform_3(%arg0: i32) -> (i32, i32) {
    %c0_i32 = arith.constant 0 : i32
    %c0_i32_0 = arith.constant 0 : i32
    return %arg0, %c0_i32 : i32, i32
  }
}

</mosaic_0001>

<bundles_post_ra>
// kernel: tpu_custom_call.1
= control target key start
LH: loop header
LB: loop body
LE: loop exit
PB: predicated region body
PF: predicated region fallthrough
CT: control target
= control target key end

     0   :  { %8 = vsyncpa [#allocation4], 0  ;;  %s6440_s0 = inlined_call_operand.hbm [shape: f32[512,128], index: 0, kind: input, shape index: {}]   ;;  %s6441_s1 = inlined_call_operand.hbm [shape: f32[1920,128], index: 1, kind: input, shape index: {}]   ;;  %s6442_s2 = inlined_call_operand.hbm [shape: f32[5,128], index: 2, kind: input, shape index: {}]   ;;  %s6443_s3 = inlined_call_operand.vmem [shape: f32[512,64], index: 3, kind: output, shape index: {}]  }
   0x1   :  { %10 = vsyncpa [#allocation4 + $0x1], 0 }
   0x2   :  { %11 = vsyncpa [#allocation6], 0  ;;  %s4944_s12 = smov 0   ;;  %s4946_s13 = smov 0  }
   0x3   :  { %s4948_s14 = smov 0   ;;  %s4950_s15 = smov 0  }
   0x4 LB: > { %s3429_s16 = sadd.s32 4294967295, %s4916_s15   ;;  %p37_p0 = scmp.ne.s32.totalorder %s4908_s13, %s4904_s12  ;;  %s4916_s15 = sphi %s4950_s15, %s6611_s15   ;;  %s4912_s14 = sphi %s4948_s14, %s6610_s14   ;;  %s4908_s13 = sphi %s4946_s13, %s6609_s13   ;;  %s4904_s12 = sphi %s4944_s12, %s6608_s12  }
   0x5   : > { %p4966_p1 = scmp.eq.s32.totalorder %s3429_s16, 0  ;;  %p3431_p2 = scmp.ge.s32.totalorder %s4916_s15, 1 }
   0x6   : > { %p116_p3 = scmp.lt.s32.totalorder %s4916_s15, 3  ;;  %s4918_s20 = smov [#allocation5]  }
   0x7   : > { %s6515_s17 = scalar_select %p4966_p1, 1, 0 }
   0x8   : > { %p4974_p4 = por %p4966_p1, %p37_p0  ;;  %p4978_p5 = pnand %p3431_p2, %p116_p3 }
   0x9   : > { %s128_s21 = sshll.u32 %s4918_s20, 4  ;;  %s4919_s23 = smov [#allocation7]   ;;  %s129_s21 = int_to_ptr.vmem [resolvable:$true] %s128_s21 }
   0xa   : > { %s6516_s18 = scalar_select %p4974_p4, 1, 0 }
   0xb   : > { %s6517_s19 = scalar_select %p4978_p5, 1, 0 }
   0xc   : > { %p4438_p6 = pneg %p4978_p5  ;;  %s142_s24 = sshll.u32 %s4919_s23, 4  ;;  %s4990_s24 = int_to_ptr.vmem [resolvable:$true] %s142_s24 }
   0xd   : > { %s4792_s27 = scalar_lea.hbm %s6441_s1, 30720 }
   0xe   : > { %p4986_p7 = pnand %p4438_p6, %p4966_p1  ;;  %p4793_p8 = scmp.ne.s32.totalorder %s6441_s1, %s4792_s27 }
   0xf   : > { %p4799_p12 = scmp.lt.u32.totalorder %s4792_s27, %s6441_s1 }
  0x10   : > { %p4794_p9 = pneg %p4986_p7 }
  0x12   : > { %p4795_p10 = pnand %p4794_p9, %p4793_p8 }
  0x14   : > { %p4796_p11 = pneg %p4795_p10 }
  0x16   : > { %p4801_p13 = pnand %p4799_p12, %p4796_p11 }
  0x18   : > { %4804 = shalt.err (!%p4801_p13)
}
  0x19   : > { %s4805_s5 = scalar_lea.vmem %s129_s21, 30720  ;;  %p4813_p6 = scmp.lt.s32.totalorder %s129_s21, %s129_s21 }
  0x1a   : > { %p4806_p0 = scmp.ne.s32.totalorder %s129_s21, %s4805_s5  ;;  %p4814_p1 = scmp.lt.s32.totalorder %s4805_s5, %s4805_s5 }
  0x1c   : > { %p4808_p2 = pnand %p4806_p0, %p4794_p9  ;;  %p4815_p4 = por %p4814_p1, %p4813_p6 }
  0x1e   : > { %p4809_p3 = pneg %p4808_p2 }
  0x20   : > { %p4816_p5 = pnand %p4815_p4, %p4809_p3 }
  0x22   : > { %4819 = shalt.err (!%p4816_p5)
}
  0x23   : > { %s4920_s6 = smov 128   ;;  %s4921_s7 = smov 8  }
  0x24   : > { %4441 = dma.hbm_to_vmem [thread:$0]  (!%p4986_p7), %s6441_s1, 30720, %s129_s21, [#allocation6], %s4920_s6, %s4920_s6, %s4921_s7  }
  0x25   : > { %s4820_s12 = scalar_lea.hbm %s6442_s2, 128 }
  0x26   : > { %p4821_p1 = scmp.ne.s32.totalorder %s6442_s2, %s4820_s12  ;;  %p4827_p8 = scmp.lt.u32.totalorder %s4820_s12, %s6442_s2 }
  0x28   : > { %p4823_p4 = pnand %p4821_p1, %p4794_p9 }
  0x2a   : > { %p4824_p5 = pneg %p4823_p4 }
  0x2c   : > { %p4829_p10 = pnand %p4827_p8, %p4824_p5 }
  0x2e   : > { %4832 = shalt.err (!%p4829_p10)
}
  0x2f   : > { %s4833_s21 = scalar_lea.vmem %s4990_s24, 128  ;;  %p4841_p0 = scmp.lt.s32.totalorder %s4990_s24, %s4990_s24 }
  0x30   : > { %p4834_p11 = scmp.ne.s32.totalorder %s4990_s24, %s4833_s21  ;;  %p4842_p2 = scmp.lt.s32.totalorder %s4833_s21, %s4833_s21 }
  0x32   : > { %p4836_p12 = pnand %p4834_p11, %p4794_p9  ;;  %p4843_p3 = por %p4842_p2, %p4841_p0 }
  0x34   : > { %p4837_p13 = pneg %p4836_p12 }
  0x36   : > { %p4844_p6 = pnand %p4843_p3, %p4837_p13 }
  0x38   : > { %4847 = shalt.err (!%p4844_p6)
}
  0x39   : > { %4444 = dma.hbm_to_vmem [thread:$0]  (!%p4986_p7), %s6442_s2, 128, %s4990_s24, [#allocation6]  }
  0x3a   : > { %s5043_s29 = sadd.s32 1, %s4916_s15   ;;  %s24_s30 = sadd.s32 1, %s4912_s14 }
  0x3b   : > { %s21_s22 = ssub.s32 %s4916_s15, %s5043_s29  ;;  %p31_p9 = scmp.ne.s32.totalorder %s4912_s14, %s4908_s13 }
  0x3c   : > { %p22_p1 = scmp.eq.s32.totalorder %s21_s22, 0  ;;  %p32_p4 = scmp.eq.s32.totalorder %s4916_s15, 0 }
  0x3d   : > { %p4451_p5 = scmp.lt.s32.totalorder %s4916_s15, 2  ;;  %s153_s4 = sand.u32 1, %s4912_s14  }
  0x3e   : > { %s5054_s5 = scalar_select %p22_p1, %s4912_s14, %s24_s30  }
  0x3f   : > { %p33_p8 = por %p32_p4, %p31_p9  ;;  %s3435_s8 = sshll.u32 %s153_s4, 8 }
  0x40   : > { %s3451_s9 = sshll.u32 %s4916_s15, 12  ;;  %s157_s24 = scalar_lea.vmem [#allocation3], %s3435_s8 }
  0x41   : > { %s5060_s12 = scalar_lea.hbm %s6440_s0, %s3451_s9  ;;  %s164_s20 = sshll.u32 %s157_s24, 4  ;;  %s5066_s20 = int_to_ptr.vmem [resolvable:$true] %s164_s20 }
  0x42   : > { %p5062_p7 = pnand %p4451_p5, %p33_p8  ;;  %s5068_s25 = scalar_lea.sflag [#allocation4], %s153_s4 }
  0x43   : > { %s4848_s26 = scalar_lea.hbm %s5060_s12, 4096  ;;  %s4853_s28 = scalar_lea.hbm %s6440_s0, 8192 }
  0x44   : > { %p4849_p10 = scmp.ne.s32.totalorder %s5060_s12, %s4848_s26  ;;  %p4850_p11 = pneg %p5062_p7 }
  0x45   : > { %p4854_p0 = scmp.lt.u32.totalorder %s5060_s12, %s6440_s0  ;;  %p4855_p2 = scmp.lt.u32.totalorder %s4853_s28, %s4848_s26 }
  0x46   : > { %p4851_p12 = pnand %p4850_p11, %p4849_p10  ;;  %p4857_p6 = scmp.lt.u32.totalorder %s4848_s26, %s5060_s12 }
  0x47   : > { %p4856_p3 = por %p4855_p2, %p4854_p0 }
  0x48   : > { %p4852_p13 = pneg %p4851_p12 }
  0x49   : > { %p4858_p9 = por %p4857_p6, %p4856_p3 }
  0x4b   : > { %p4859_p1 = pnand %p4858_p9, %p4852_p13 }
  0x4d   : > { %4862 = shalt.err (!%p4859_p1)
}
  0x4e   : > { %s4863_s4 = scalar_lea.vmem %s5066_s20, 4096  ;;  %s4922_s8 = smov [#allocation3]  }
  0x4f   : > { %p4864_p4 = scmp.ne.s32.totalorder %s5066_s20, %s4863_s4  ;;  %s4868_s9 = sshll.u32 %s4922_s8, 4  ;;  %s4869_s9 = int_to_ptr.vmem [resolvable:$false] %s4868_s9 }
  0x50   : > { %s4870_s10 = scalar_lea.vmem %s4869_s9, 8192  ;;  %p4871_p10 = scmp.lt.s32.totalorder %s5066_s20, %s4869_s9 }
  0x51   : > { %p4866_p5 = pnand %p4864_p4, %p4850_p11  ;;  %p4872_p12 = scmp.lt.s32.totalorder %s4870_s10, %s4863_s4 }
  0x53   : > { %p4867_p8 = pneg %p4866_p5  ;;  %p4873_p0 = por %p4872_p12, %p4871_p10 }
  0x55   : > { %p4874_p2 = pnand %p4873_p0, %p4867_p8 }
  0x57   : > { %4877 = shalt.err (!%p4874_p2)
}
  0x58   : > { %4448 = dma.hbm_to_vmem [thread:$0]  (!%p5062_p7), %s5060_s12, 4096, %s5066_s20, %s5068_s25, %s4920_s6, %s4920_s6, %s4921_s7  }
  0x59   : > { %p6520_p11 = scmp.ne.s32.totalorder %s6517_s19, 0 }
  0x5b   : > { %176 = sbr.rel (%p6520_p11) target bundleno = 1388 (0x56c), region = 32 }
  0x62   : > { %s178_s11 = sand.u32 1, %s4908_s13   ;;  %p6521_p13 = scmp.ne.s32.totalorder %s6516_s18, 0 }
  0x63   : > { %s3439_s24 = sshll.u32 %s178_s11, 8  ;;  %s179_s26 = scalar_lea.sflag [#allocation4], %s178_s11 }
  0x64   : > { %s5102_s21 = scalar_lea.vmem [#allocation3], %s3439_s24 }
  0x65   : > { %4895 = dma.done.wait (%p6521_p13), %s179_s26, 4096  }
  0x66   : > { %4897 = vsyncadd (%p6521_p13), %s179_s26, 4294963200  ;;  %p6522_p3 = scmp.ne.s32.totalorder %s6515_s17, 0 }
  0x68   : > { %4899 = dma.done.wait (%p6522_p3), [#allocation6], 30848  }
  0x69   : > { %4901 = vsyncadd (%p6522_p3), [#allocation6], 4294936448  ;;  %v6473_v0 = vmov 0.0|0.0   ;;  %v284_v1 = vld [vmem:[#allocation5] sm:$0xff]  ;;  %v285_v2 = vld [vmem:[#allocation5 + $0x8] sm:$0xff]  ;;  %s3442_s17 = sshll.u32 %s3429_s16, 5 }
  0x6a   : > { %3868 = vmatprep.subr.bf16.mxu1 %v6473_v0  ;;  %v286_v3 = vld [vmem:[#allocation5 + $0x10] sm:$0xff]  ;;  %v3836_v4 = vpack.c.bf16 %v285_v2, %v284_v1  ;;  %v287_v5 = vld [vmem:[#allocation5 + $0x18] sm:$0xff]  ;;  %v288_v7 = vld [vmem:[#allocation5 + $0x20] sm:$0xff]  ;;  %p215_p7 = scmp.lt.s32.totalorder %s3442_s17, 63  ;;  %vm3310_vm0 = vcmask 523264  }
  0x6b   : > { %v3840_v6 = vpack.c.bf16 %v287_v5, %v286_v3  ;;  %v289_v8 = vld [vmem:[#allocation5 + $0x28] sm:$0xff]  ;;  %v5114_v10 = vld [vmem:[%s5102_s21] sm:$0xff]  ;;  %v290_v11 = vld [vmem:[#allocation5 + $0x30] sm:$0xff] }
  0x6c   : > { %3837 = vmatprep.subr.bf16.mxu0 %v3836_v4  ;;  %v3844_v9 = vpack.c.bf16 %v289_v8, %v288_v7  ;;  %v291_v12 = vld [vmem:[#allocation5 + $0x38] sm:$0xff]  ;;  %3628 = vmatprep.mubr.f32.mxu0 %v5114_v10  ;;  %v292_v14 = vld [vmem:[#allocation5 + $0x40] sm:$0xff]  ;;  %v293_v15 = vld [vmem:[#allocation5 + $0x48] sm:$0xff]  ;;  %s6613_s17 = smov (!%p215_p7, %s3442_s17), 63 }
  0x6d   : > { %3839 = vmatpush3.bf16.msra.mxu0 %v3836_v4  ;;  %v3848_v13 = vpack.c.bf16 %v291_v12, %v290_v11  ;;  %v3852_v16 = vpack.c.bf16 %v293_v15, %v292_v14  ;;  %v294_v17 = vld [vmem:[#allocation5 + $0x50] sm:$0xff]  ;;  %v295_v18 = vld [vmem:[#allocation5 + $0x58] sm:$0xff]  ;;  %v626_v19 = vld [vmem:[#allocation5 + $0x80] sm:$0xff]  ;;  %s3443_s18 = sshll.u32 %s6613_s17, 3 }
  0x6e   : > { %3841 = vmatprep.subr.bf16.mxu0 %v3840_v6  ;;  %v627_v20 = vld [vmem:[#allocation5 + $0x88] sm:$0xff]  ;;  %v3856_v21 = vpack.c.bf16 %v295_v18, %v294_v17  ;;  %v628_v23 = vld [vmem:[#allocation5 + $0x90] sm:$0xff]  ;;  %v629_v24 = vld [vmem:[#allocation5 + $0x98] sm:$0xff]  ;;  %s6301_s7 = scalar_lea.vmem %s6443_s3, %s3443_s18 }
  0x6f   : > { %v3869_v22 = vpack.c.bf16 %v627_v20, %v626_v19  ;;  %v296_v25 = vld [vmem:[#allocation5 + $0x60] sm:$0xff]  ;;  %v297_v26 = vld [vmem:[#allocation5 + $0x68] sm:$0xff]  ;;  %v3872_v27 = vpack.c.bf16 %v629_v24, %v628_v23  ;;  %v298_v31 = vld [vmem:[#allocation5 + $0x70] sm:$0xff] }
  0x70   : > { %v630_v28 = vld [vmem:[#allocation5 + $0xa0] sm:$0xff]  ;;  %v631_v29 = vld [vmem:[#allocation5 + $0xa8] sm:$0xff]  ;;  %v3860_v30 = vpack.c.bf16 %v297_v26, %v296_v25  ;;  %v299_v32 = vld [vmem:[#allocation5 + $0x78] sm:$0xff] }
  0x71   : > { %3843 = vmatpush3.bf16.msra.mxu0 %v3840_v6  ;;  %3870 = vmatpush1.bf16.msra.mxu1 %v3869_v22  ;;  %v3875_v33 = vpack.c.bf16 %v631_v29, %v630_v28  ;;  %v632_v34 = vld [vmem:[#allocation5 + $0xb0] sm:$0xff]  ;;  %v633_v35 = vld [vmem:[#allocation5 + $0xb8] sm:$0xff]  ;;  %v3864_v36 = vpack.c.bf16 %v299_v32, %v298_v31  ;;  %v634_v38 = vld [vmem:[#allocation5 + $0xc0] sm:$0xff] }
  0x72   : > { %3845 = vmatprep.subr.bf16.mxu0 %v3844_v9  ;;  %3871 = vmatprep.subr.bf16.mxu1 %v6473_v0  ;;  %v3878_v37 = vpack.c.bf16 %v633_v35, %v632_v34  ;;  %v635_v39 = vld [vmem:[#allocation5 + $0xc8] sm:$0xff]  ;;  %v1016_v40 = vld [vmem:[#allocation5 + $0x180] sm:$0xff]  ;;  %v636_v45 = vld [vmem:[#allocation5 + $0xd0] sm:$0xff] }
  0x73   : > { %v1017_v41 = vld [vmem:[#allocation5 + $0x188] sm:$0xff]  ;;  %v3881_v42 = vpack.c.bf16 %v635_v39, %v634_v38  ;;  %v637_v46 = vld [vmem:[#allocation5 + $0xd8] sm:$0xff]  ;;  %v5125_v47 = vld [vmem:[%s5102_s21 + $0x10] sm:$0xff] }
  0x74   : > { %v5121_v43 = vld [vmem:[%s5102_s21 + $0x8] sm:$0xff]  ;;  %v3917_v44 = vpack.c.bf16 %v1017_v41, %v1016_v40  ;;  %v1018_v48 = vld [vmem:[#allocation5 + $0x190] sm:$0xff]  ;;  %v1019_v49 = vld [vmem:[#allocation5 + $0x198] sm:$0xff]  ;;  %v3884_v50 = vpack.c.bf16 %v637_v46, %v636_v45 }
  0x75   : > { %3847 = vmatpush3.bf16.msra.mxu0 %v3844_v9  ;;  %3873 = vmatpush1.bf16.msra.mxu1 %v3872_v27  ;;  %v5131_v51 = vld [vmem:[%s5102_s21 + $0x18] sm:$0xff]  ;;  %v3920_v52 = vpack.c.bf16 %v1019_v49, %v1018_v48  ;;  %v638_v53 = vld [vmem:[#allocation5 + $0xe0] sm:$0xff]  ;;  %v639_v54 = vld [vmem:[#allocation5 + $0xe8] sm:$0xff] }
  0x76   : > { %3849 = vmatprep.subr.bf16.mxu0 %v3848_v13  ;;  %3874 = vmatprep.subr.bf16.mxu1 %v6473_v0  ;;  %v5134_v55 = vld [vmem:[%s5102_s21 + $0x20] sm:$0xff]  ;;  %v1021_v57 = vld [vmem:[#allocation5 + $0x1a8] sm:$0xff]  ;;  %v3887_v58 = vpack.c.bf16 %v639_v54, %v638_v53  ;;  %v640_v61 = vld [vmem:[#allocation5 + $0xf0] sm:$0xff] }
  0x77   : > { %v1020_v56 = vld [vmem:[#allocation5 + $0x1a0] sm:$0xff]  ;;  %v5141_v59 = vld [vmem:[%s5102_s21 + $0x28] sm:$0xff]  ;;  %v641_v62 = vld [vmem:[#allocation5 + $0xf8] sm:$0xff] }
  0x78   : > { %v3923_v60 = vpack.c.bf16 %v1021_v57, %v1020_v56  ;;  %v5144_v63 = vld [vmem:[%s5102_s21 + $0x30] sm:$0xff]  ;;  %v1023_v2 = vld [vmem:[#allocation5 + $0x1b8] sm:$0xff]  ;;  %v3890_v3 = vpack.c.bf16 %v641_v62, %v640_v61  ;;  %v642_v6 = vld [vmem:[#allocation5 + $0x100] sm:$0xff] }
  0x79   : > { %3851 = vmatpush3.bf16.msra.mxu0 %v3848_v13  ;;  %3876 = vmatpush1.bf16.msra.mxu1 %v3875_v33  ;;  %v1022_v1 = vld [vmem:[#allocation5 + $0x1b0] sm:$0xff]  ;;  %v5151_v4 = vld [vmem:[%s5102_s21 + $0x38] sm:$0xff]  ;;  %v643_v7 = vld [vmem:[#allocation5 + $0x108] sm:$0xff] }
  0x7a   : > { %3853 = vmatprep.subr.bf16.mxu0 %v3852_v16  ;;  %3877 = vmatprep.subr.bf16.mxu1 %v6473_v0  ;;  %v3926_v5 = vpack.c.bf16 %v1023_v2, %v1022_v1  ;;  %v5154_v8 = vld [vmem:[%s5102_s21 + $0x40] sm:$0xff]  ;;  %v1025_v11 = vld [vmem:[#allocation5 + $0x1c8] sm:$0xff]  ;;  %v3893_v12 = vpack.c.bf16 %v643_v7, %v642_v6  ;;  %v644_v15 = vld [vmem:[#allocation5 + $0x110] sm:$0xff] }
  0x7b   : > { %v1024_v9 = vld [vmem:[#allocation5 + $0x1c0] sm:$0xff]  ;;  %v5161_v13 = vld [vmem:[%s5102_s21 + $0x48] sm:$0xff]  ;;  %v5164_v17 = vld [vmem:[%s5102_s21 + $0x50] sm:$0xff] }
  0x7c   : > { %v3929_v14 = vpack.c.bf16 %v1025_v11, %v1024_v9  ;;  %v1026_v18 = vld [vmem:[#allocation5 + $0x1d0] sm:$0xff]  ;;  %v1027_v19 = vld [vmem:[#allocation5 + $0x1d8] sm:$0xff]  ;;  %v646_v23 = vld [vmem:[#allocation5 + $0x120] sm:$0xff] }
  0x7d   : > { %3855 = vmatpush3.bf16.msra.mxu0 %v3852_v16  ;;  %3879 = vmatpush1.bf16.msra.mxu1 %v3878_v37  ;;  %v645_v16 = vld [vmem:[#allocation5 + $0x118] sm:$0xff]  ;;  %v3932_v22 = vpack.c.bf16 %v1027_v19, %v1026_v18  ;;  %v647_v24 = vld [vmem:[#allocation5 + $0x128] sm:$0xff]  ;;  %v5174_v25 = vld [vmem:[%s5102_s21 + $0x60] sm:$0xff] }
  0x7e   : > { %3857 = vmatprep.subr.bf16.mxu0 %v3856_v21  ;;  %3880 = vmatprep.subr.bf16.mxu1 %v6473_v0  ;;  %v3896_v20 = vpack.c.bf16 %v645_v16, %v644_v15  ;;  %v1028_v26 = vld [vmem:[#allocation5 + $0x1e0] sm:$0xff]  ;;  %v1029_v27 = vld [vmem:[#allocation5 + $0x1e8] sm:$0xff]  ;;  %v3899_v28 = vpack.c.bf16 %v647_v24, %v646_v23  ;;  %v648_v31 = vld [vmem:[#allocation5 + $0x130] sm:$0xff] }
  0x7f   : > { %v5181_v29 = vld [vmem:[%s5102_s21 + $0x68] sm:$0xff]  ;;  %v649_v32 = vld [vmem:[#allocation5 + $0x138] sm:$0xff]  ;;  %v5184_v33 = vld [vmem:[%s5102_s21 + $0x70] sm:$0xff] }
  0x80   : > { %v1030_v34 = vld [vmem:[#allocation5 + $0x1f0] sm:$0xff]  ;;  %v1031_v35 = vld [vmem:[#allocation5 + $0x1f8] sm:$0xff]  ;;  %v5194_v39 = vld [vmem:[%s5102_s21 + $0x80] sm:$0xff] }
  0x81   : > { %3859 = vmatpush3.bf16.msra.mxu0 %v3856_v21  ;;  %3882 = vmatpush1.bf16.msra.mxu1 %v3881_v42  ;;  %v5171_v21 = vld [vmem:[%s5102_s21 + $0x58] sm:$0xff]  ;;  %v3938_v38 = vpack.c.bf16 %v1031_v35, %v1030_v34  ;;  %v1032_v40 = vld [vmem:[#allocation5 + $0x200] sm:$0xff]  ;;  %v1033_v41 = vld [vmem:[#allocation5 + $0x208] sm:$0xff] }
  0x82   : > { %3861 = vmatprep.subr.bf16.mxu0 %v3860_v30  ;;  %3883 = vmatprep.subr.bf16.mxu1 %v6473_v0  ;;  %v5191_v37 = vld [vmem:[%s5102_s21 + $0x78] sm:$0xff]  ;;  %v5201_v42 = vld [vmem:[%s5102_s21 + $0x88] sm:$0xff]  ;;  %v5204_v45 = vld [vmem:[%s5102_s21 + $0x90] sm:$0xff] }
  0x83   : > { %v1034_v46 = vld [vmem:[#allocation5 + $0x210] sm:$0xff]  ;;  %v1035_v48 = vld [vmem:[#allocation5 + $0x218] sm:$0xff]  ;;  %v1036_v53 = vld [vmem:[#allocation5 + $0x220] sm:$0xff] }
  0x84   : > { %v5211_v49 = vld [vmem:[%s5102_s21 + $0x98] sm:$0xff]  ;;  %v1037_v54 = vld [vmem:[#allocation5 + $0x228] sm:$0xff]  ;;  %v5232_v2 = vld [vmem:[%s5102_s21 + $0xc0] sm:$0xff] }
  0x85   : > { %3863 = vmatpush3.bf16.msra.mxu0 %v3860_v30  ;;  %3885 = vmatpush1.bf16.msra.mxu1 %v3884_v50  ;;  %v3935_v30 = vpack.c.bf16 %v1029_v27, %v1028_v26  ;;  %v3944_v50 = vpack.c.bf16 %v1035_v48, %v1034_v46  ;;  %v5220_v56 = vld [vmem:[%s5102_s21 + $0xa8] sm:$0xff]  ;;  %v3947_v57 = vpack.c.bf16 %v1037_v54, %v1036_v53  ;;  %v1039_v61 = vld [vmem:[#allocation5 + $0x238] sm:$0xff]  ;;  %v5250_v7 = vld [vmem:[%s5102_s21 + $0xe0] sm:$0xff] }
  0x86   : > { %3865 = vmatprep.subr.bf16.mxu0 %v3864_v36  ;;  %3886 = vmatprep.subr.bf16.mxu1 %v6473_v0  ;;  %v5229_v62 = vld [vmem:[%s5102_s21 + $0xb8] sm:$0xff]  ;;  %v5255_v9 = vld [vmem:[%s5102_s21 + $0xe8] sm:$0xff]  ;;  %v5258_v11 = vld [vmem:[%s5102_s21 + $0xf0] sm:$0xff] }
  0x87   : > { %v5247_v6 = vld [vmem:[%s5102_s21 + $0xd8] sm:$0xff]  ;;  %v651_v15 = vld [vmem:[#allocation5 + $0x148] sm:$0xff]  ;;  %v1040_v16 = vld [vmem:[#allocation5 + $0x240] sm:$0xff] }
  0x88   : > { %v1041_v19 = vld [vmem:[#allocation5 + $0x248] sm:$0xff]  ;;  %v653_v23 = vld [vmem:[#allocation5 + $0x158] sm:$0xff]  ;;  %v1042_v24 = vld [vmem:[#allocation5 + $0x250] sm:$0xff] }
  0x89   : > { %3867 = vmatpush3.bf16.msra.mxu0 %v3864_v36  ;;  %3888 = vmatpush1.bf16.msra.mxu1 %v3887_v58  ;;  %v3902_v36 = vpack.c.bf16 %v649_v32, %v648_v31  ;;  %v5223_v58 = vld [vmem:[%s5102_s21 + $0xb0] sm:$0xff]  ;;  %v1043_v27 = vld [vmem:[#allocation5 + $0x258] sm:$0xff]  ;;  %v655_v31 = vld [vmem:[#allocation5 + $0x168] sm:$0xff] }
  0x8a   : > { %3916 = vmatprep.subr.bf16.mxu0 %v6473_v0  ;;  %3889 = vmatprep.subr.bf16.mxu1 %v6473_v0  ;;  %v1044_v32 = vld [vmem:[#allocation5 + $0x260] sm:$0xff]  ;;  %v1045_v35 = vld [vmem:[#allocation5 + $0x268] sm:$0xff]  ;;  %v1047_v46 = vld [vmem:[#allocation5 + $0x278] sm:$0xff] }
  0x8b   : > { %v1049_v53 = vld [vmem:[#allocation5 + $0x288] sm:$0xff] }
  0x8c   : > { %3629 = vmatmul.mubr.f32.vlgmr.msra.gmra.mrb[0].mxu0 %v5121_v43 }
  0x8d   : > { %3631 = vmatprep.mubr.f32.mxu0 %v5125_v47  ;;  %3918 = vmatpush1.bf16.msra.mxu0 %v3917_v44  ;;  %v3941_v44 = vpack.c.bf16 %v1033_v41, %v1032_v40  ;;  %v657_v40 = vld [vmem:[#allocation5 + $0x178] sm:$0xff]  ;;  %v1046_v41 = vld [vmem:[#allocation5 + $0x270] sm:$0xff] }
  0x8e   : > { %3919 = vmatprep.subr.bf16.mxu0 %v6473_v0  ;;  %3891 = vmatpush1.bf16.msra.mxu1 %v3890_v3  ;;  %v5238_v3 = vld [vmem:[%s5102_s21 + $0xc8] sm:$0xff]  ;;  %v3962_v48 = vpack.c.bf16 %v1047_v46, %v1046_v41  ;;  %v1052_v46 = vld [vmem:[#allocation5 + $0x2a0] sm:$0xff] }
  0x8f   : > { %3892 = vmatprep.subr.bf16.mxu1 %v6473_v0 }
  0x90   : > { %3632 = vmatmul.mubr.f32.gmra.mrb[2].mxu0 %v5131_v51 }
  0x91   : > { %3634 = vmatprep.mubr.f32.mxu0 %v5134_v55  ;;  %3921 = vmatpush1.bf16.msra.mxu0 %v3920_v52  ;;  %v5214_v52 = vld [vmem:[%s5102_s21 + $0xa0] sm:$0xff] }
  0x92   : > { %3922 = vmatprep.subr.bf16.mxu0 %v6473_v0  ;;  %3894 = vmatpush1.bf16.msra.mxu1 %v3893_v12  ;;  %v5263_v12 = vld [vmem:[%s5102_s21 + $0xf8] sm:$0xff] }
  0x93   : > { %3895 = vmatprep.subr.bf16.mxu1 %v6473_v0 }
  0x94   : > { %3635 = vmatmul.mubr.f32.gmra.mrb[4].mxu0 %v5141_v59 }
  0x95   : > { %3637 = vmatprep.mubr.f32.mxu0 %v5144_v63  ;;  %3924 = vmatpush1.bf16.msra.mxu0 %v3923_v60  ;;  %v1038_v60 = vld [vmem:[#allocation5 + $0x230] sm:$0xff] }
  0x96   : > { %3925 = vmatprep.subr.bf16.mxu0 %v6473_v0  ;;  %3897 = vmatpush1.bf16.msra.mxu1 %v3896_v20  ;;  %v3950_v1 = vpack.c.bf16 %v1039_v61, %v1038_v60  ;;  %v3953_v20 = vpack.c.bf16 %v1041_v19, %v1040_v16 }
  0x97   : > { %3898 = vmatprep.subr.bf16.mxu1 %v6473_v0 }
  0x98   : > { %3638 = vmatmul.mubr.f32.gmra.mrb[6].mxu0 %v5151_v4 }
  0x99   : > { %3640 = vmatprep.mubr.f32.mxu0 %v5154_v8  ;;  %3927 = vmatpush1.bf16.msra.mxu0 %v3926_v5  ;;  %v5241_v5 = vld [vmem:[%s5102_s21 + $0xd0] sm:$0xff] }
  0x9a   : > { %3928 = vmatprep.subr.bf16.mxu0 %v6473_v0  ;;  %3900 = vmatpush1.bf16.msra.mxu1 %v3899_v28  ;;  %v3956_v28 = vpack.c.bf16 %v1043_v27, %v1042_v24  ;;  %v1680_v24 = vld [vmem:[#allocation5 + $0x308] sm:$0xff] }
  0x9b   : > { %3901 = vmatprep.subr.bf16.mxu1 %v6473_v0 }
  0x9c   : > { %3641 = vmatmul.mubr.f32.gmra.mrb[8].mxu0 %v5161_v13 }
  0x9d   : > { %3643 = vmatprep.mubr.f32.mxu0 %v5164_v17  ;;  %3930 = vmatpush1.bf16.msra.mxu0 %v3929_v14  ;;  %v650_v14 = vld [vmem:[#allocation5 + $0x140] sm:$0xff] }
  0x9e   : > { %3931 = vmatprep.subr.bf16.mxu0 %v6473_v0  ;;  %3903 = vmatpush1.bf16.msra.mxu1 %v3902_v36  ;;  %v3905_v18 = vpack.c.bf16 %v651_v15, %v650_v14  ;;  %v3959_v36 = vpack.c.bf16 %v1045_v35, %v1044_v32  ;;  %v1681_v35 = vld [vmem:[#allocation5 + $0x310] sm:$0xff] }
  0x9f   : > { %3904 = vmatprep.subr.bf16.mxu1 %v6473_v0 }
  0xa0   : > { %3644 = vmatmul.mubr.f32.gmra.mrb[10].mxu0 %v5171_v21 }
  0xa1   : > { %3646 = vmatprep.mubr.f32.mxu0 %v5174_v25  ;;  %3933 = vmatpush1.bf16.msra.mxu0 %v3932_v22  ;;  %v652_v22 = vld [vmem:[#allocation5 + $0x150] sm:$0xff] }
  0xa2   : > { %3934 = vmatprep.subr.bf16.mxu0 %v6473_v0  ;;  %3906 = vmatpush1.bf16.msra.mxu1 %v3905_v18  ;;  %v3908_v26 = vpack.c.bf16 %v653_v23, %v652_v22  ;;  %v1679_v23 = vld [vmem:[#allocation5 + $0x300] sm:$0xff] }
  0xa3   : > { %3907 = vmatprep.subr.bf16.mxu1 %v6473_v0 }
  0xa4   : > { %3647 = vmatmul.mubr.f32.gmra.mrb[12].mxu0 %v5181_v29 }
  0xa5   : > { %3649 = vmatprep.mubr.f32.mxu0 %v5184_v33  ;;  %3936 = vmatpush1.bf16.msra.mxu0 %v3935_v30  ;;  %v654_v30 = vld [vmem:[#allocation5 + $0x160] sm:$0xff] }
  0xa6   : > { %3937 = vmatprep.subr.bf16.mxu0 %v6473_v0  ;;  %3909 = vmatpush1.bf16.msra.mxu1 %v3908_v26  ;;  %v3911_v34 = vpack.c.bf16 %v655_v31, %v654_v30  ;;  %v1051_v30 = vld [vmem:[#allocation5 + $0x298] sm:$0xff] }
  0xa7   : > { %3910 = vmatprep.subr.bf16.mxu1 %v6473_v0 }
  0xa8   : > { %3650 = vmatmul.mubr.f32.gmra.mrb[14].mxu0 %v5191_v37 }
  0xa9   : > { %3652 = vmatprep.mubr.f32.mxu0 %v5194_v39  ;;  %3939 = vmatpush1.bf16.msra.mxu0 %v3938_v38  ;;  %v656_v38 = vld [vmem:[#allocation5 + $0x170] sm:$0xff] }
  0xaa   : > { %3940 = vmatprep.subr.bf16.mxu0 %v6473_v0  ;;  %3912 = vmatpush1.bf16.msra.mxu1 %v3911_v34  ;;  %v3997_v34 = vpack.c.bf16 %v1680_v24, %v1679_v23 }
  0xab   : > { %3913 = vmatprep.subr.bf16.mxu1 %v6473_v0 }
  0xac   : > { %3653 = vmatmul.mubr.f32.gmra.mrb[16].mxu0 %v5201_v42 }
  0xad   : > { %3655 = vmatprep.mubr.f32.mxu0 %v5204_v45  ;;  %3942 = vmatpush1.bf16.msra.mxu0 %v3941_v44  ;;  %v3914_v44 = vpack.c.bf16 %v657_v40, %v656_v38 }
  0xae   : > { %3943 = vmatprep.subr.bf16.mxu0 %v6473_v0 }
  0xaf   : > { %3915 = vmatpush1.bf16.msra.mxu1 %v3914_v44 }
  0xb0   : > { %3656 = vmatmul.mubr.f32.gmra.mrb[18].mxu0 %v5211_v49 }
  0xb1   : > { %3658 = vmatprep.mubr.f32.mxu0 %v5214_v52  ;;  %3945 = vmatpush1.bf16.msra.mxu0 %v3944_v50  ;;  %v1048_v50 = vld [vmem:[#allocation5 + $0x280] sm:$0xff] }
  0xb2   : > { %3946 = vmatprep.subr.bf16.mxu0 %v6473_v0  ;;  %v3964_v54 = vpack.c.bf16 %v1049_v53, %v1048_v50 }
  0xb4   : > { %3659 = vmatmul.mubr.f32.gmra.mrb[20].mxu0 %v5220_v56  ;;  %3965 = vmatprep.subr.bf16.mxu1 %v3964_v54 }
  0xb5   : > { %3661 = vmatprep.mubr.f32.mxu0 %v5223_v58  ;;  %3948 = vmatpush1.bf16.msra.mxu0 %v3947_v57  ;;  %v5273_v57 = vld [vmem:[#allocation7] ss:$0 sm:$0xff] }
  0xb6   : > { %3949 = vmatprep.subr.bf16.mxu0 %v6473_v0 }
  0xb8   : > { %3662 = vmatmul.mubr.f32.gmra.mrb[22].mxu0 %v5229_v62 }
  0xb9   : > { %3664 = vmatprep.mubr.f32.mxu0 %v5232_v2  ;;  %3951 = vmatpush1.bf16.msra.mxu0 %v3950_v1 }
  0xba   : > { %3952 = vmatprep.subr.bf16.mxu0 %v6473_v0 }
  0xbc   : > { %3665 = vmatmul.mubr.f32.gmra.mrb[24].mxu0 %v5238_v3 }
  0xbd   : > { %3667 = vmatprep.mubr.f32.mxu0 %v5241_v5  ;;  %3954 = vmatpush1.bf16.msra.mxu0 %v3953_v20 }
  0xbe   : > { %3955 = vmatprep.subr.bf16.mxu0 %v6473_v0 }
  0xc0   : > { %3668 = vmatmul.mubr.f32.gmra.mrb[26].mxu0 %v5247_v6 }
  0xc1   : > { %3670 = vmatprep.mubr.f32.mxu0 %v5250_v7  ;;  %3957 = vmatpush1.bf16.msra.mxu0 %v3956_v28  ;;  %v1050_v28 = vld [vmem:[#allocation5 + $0x290] sm:$0xff] }
  0xc2   : > { %3958 = vmatprep.subr.bf16.mxu0 %v6473_v0  ;;  %v3968_v38 = vpack.c.bf16 %v1051_v30, %v1050_v28  ;;  %v1687_v28 = vld [vmem:[#allocation5 + $0x340] sm:$0xff]  ;;  %v1688_v30 = vld [vmem:[#allocation5 + $0x348] sm:$0xff] }
  0xc4   : > { %3671 = vmatmul.mubr.f32.gmra.mrb[28].mxu0 %v5255_v9 }
  0xc5   : > { %3673 = vmatprep.mubr.f32.mxu0 %v5258_v11  ;;  %3960 = vmatpush1.bf16.msra.mxu0 %v3959_v36  ;;  %v1682_v36 = vld [vmem:[#allocation5 + $0x318] sm:$0xff] }
  0xc6   : > { %3961 = vmatprep.subr.bf16.mxu0 %v6473_v0 }
  0xc8   : > { %3674 = vmatmul.mubr.f32.gmra.mrb[30].mxu0 %v5263_v12 }
  0xc9   : > { %3963 = vmatpush1.bf16.msra.mxu0 %v3962_v48  ;;  %v1053_v48 = vld [vmem:[#allocation5 + $0x2a8] sm:$0xff] }
  0xca   : > { %3996 = vmatprep.subr.bf16.mxu0 %v6473_v0 }
 0x15f   : > { %v3630_v60 = vpop.f32.mrb[0].mxu0 }
 0x160   : > { %v403_v61 = vpop.f32.mrb[1].mxu0  ;;  %v409_v1 = vadd.f32 %v3630_v60, %v5273_v57  ;;  %v4000_v60 = vpack.c.bf16 %v1682_v36, %v1681_v35  ;;  %v1689_v35 = vld [vmem:[#allocation5 + $0x350] sm:$0xff]  ;;  %v1690_v36 = vld [vmem:[#allocation5 + $0x358] sm:$0xff] }
 0x161   : > { %v404_v14 = vadd.f32 %v5273_v57, %v403_v61  ;;  %v1683_v61 = vld [vmem:[#allocation5 + $0x320] sm:$0xff] }
 0x163   : > { %4491 = vtanh.f32 %v404_v14  ;;  %v3633_v15 = vpop.f32.mrb[2].mxu0 }
 0x164   : > { %v413_v16 = vpop.f32.mrb[3].mxu0  ;;  %4493 = vtanh.f32 %v409_v1  ;;  %v419_v22 = vadd.f32 %v3633_v15, %v5273_v57  ;;  %v3972_v1 = vpack.c.bf16 %v1053_v48, %v1052_v46  ;;  %v1054_v48 = vld [vmem:[#allocation5 + $0x2b0] sm:$0xff] }
 0x165   : > { %v414_v18 = vadd.f32 %v5273_v57, %v413_v16 }
 0x167   : > { %4495 = vtanh.f32 %v414_v18  ;;  %v3636_v19 = vpop.f32.mrb[4].mxu0  ;;  %v1685_v18 = vld [vmem:[#allocation5 + $0x330] sm:$0xff] }
 0x168   : > { %v423_v20 = vpop.f32.mrb[5].mxu0  ;;  %4497 = vtanh.f32 %v419_v22  ;;  %v429_v53 = vadd.f32 %v3636_v19, %v5273_v57  ;;  %v1686_v19 = vld [vmem:[#allocation5 + $0x338] sm:$0xff] }
 0x169   : > { %v424_v26 = vadd.f32 %v5273_v57, %v423_v20 }
 0x16b   : > { %v3639_v27 = vpop.f32.mrb[6].mxu0  ;;  %4499 = vtanh.f32 %v424_v26  ;;  %v4006_v26 = vpack.c.bf16 %v1686_v19, %v1685_v18 }
 0x16c   : > { %v433_v31 = vpop.f32.mrb[7].mxu0  ;;  %4501 = vtanh.f32 %v429_v53  ;;  %v439_v24 = vadd.f32 %v3639_v27, %v5273_v57  ;;  %v1055_v53 = vld [vmem:[#allocation5 + $0x2b8] sm:$0xff] }
 0x16d   : > { %v5280_v32 = vpop.eup %4491  ;;  %v434_v14 = vadd.f32 %v5273_v57, %v433_v31 }
 0x16e   : > { %791 = vmatprep.mubr.f32.mxu1 %v5280_v32  ;;  %1229 = vmatprep.mubr.f32.mxu0 %v5280_v32  ;;  %v5284_v40 = vpop.eup %4493 }
 0x16f   : > { %792 = vmatmul.mubr.f32.vlgmr.msra.gmra.mrb[0].mxu1 %v5114_v10  ;;  %1230 = vmatmul.mubr.f32.vlgmr.msra.gmra.mrb[32].mxu0 %v5114_v10  ;;  %v5288_v41 = vpop.f32.mrb[8].mxu0  ;;  %v1684_v10 = vld [vmem:[#allocation5 + $0x328] sm:$0xff]  ;;  %4503 = vtanh.f32 %v434_v14 }
 0x170   : > { %796 = vmatprep.mubr.f32.mxu1 %v5284_v40  ;;  %1234 = vmatprep.mubr.f32.mxu0 %v5284_v40  ;;  %v443_v44 = vpop.f32.mrb[9].mxu0  ;;  %4505 = vtanh.f32 %v439_v24  ;;  %v1692_v14 = vld [vmem:[#allocation5 + $0x368] sm:$0xff] }
 0x171   : > { %v5292_v50 = vpop.eup %4495  ;;  %3998 = vmatpush1.bf16.msra.mxu0 %v3997_v34  ;;  %3967 = vmatpush3.bf16.msra.mxu1 %v3964_v54  ;;  %v4003_v54 = vpack.c.bf16 %v1684_v10, %v1683_v61  ;;  %v4009_v34 = vpack.c.bf16 %v1688_v30, %v1687_v28  ;;  %v449_v61 = vadd.f32 %v5288_v41, %v5273_v57 }
 0x172   : > { %3999 = vmatprep.subr.bf16.mxu0 %v6473_v0  ;;  %3969 = vmatprep.subr.bf16.mxu1 %v3968_v38  ;;  %v5304_v20 = vpop.eup %4497  ;;  %v4012_v10 = vpack.c.bf16 %v1690_v36, %v1689_v35 }
 0x173   : > { %797 = vmatmul.mubr.f32.gmra.mrb[2].mxu1 %v5121_v43  ;;  %1235 = vmatmul.mubr.f32.gmra.mrb[34].mxu0 %v5121_v43  ;;  %v5299_v15 = vpop.f32.mrb[10].mxu0 }
 0x174   : > { %801 = vmatprep.mubr.f32.mxu1 %v5292_v50  ;;  %1239 = vmatprep.mubr.f32.mxu0 %v5292_v50  ;;  %v453_v16 = vpop.f32.mrb[11].mxu0  ;;  %v459_v36 = vadd.f32 %v5299_v15, %v5273_v57 }
 0x175   : > { %4001 = vmatpush1.bf16.msra.mxu0 %v4000_v60  ;;  %3971 = vmatpush3.bf16.msra.mxu1 %v3968_v38  ;;  %v5314_v23 = vpop.eup %4499 }
 0x176   : > { %4002 = vmatprep.subr.bf16.mxu0 %v6473_v0  ;;  %3973 = vmatprep.subr.bf16.mxu1 %v3972_v1  ;;  %v5328_v38 = vpop.eup %4501 }
 0x177   : > { %802 = vmatmul.mubr.f32.gmra.mrb[4].mxu1 %v5125_v47  ;;  %1240 = vmatmul.mubr.f32.gmra.mrb[36].mxu0 %v5125_v47  ;;  %v5308_v43 = vpop.f32.mrb[12].mxu0  ;;  %v444_v47 = vadd.f32 %v5273_v57, %v443_v44 }
 0x178   : > { %806 = vmatprep.mubr.f32.mxu1 %v5304_v20  ;;  %1244 = vmatprep.mubr.f32.mxu0 %v5304_v20  ;;  %v5312_v22 = vpop.f32.mrb[13].mxu0 }
 0x179   : > { %4004 = vmatpush1.bf16.msra.mxu0 %v4003_v54  ;;  %3975 = vmatpush3.bf16.msra.mxu1 %v3972_v1  ;;  %4507 = vtanh.f32 %v444_v47  ;;  %v5339_v60 = vpop.eup %4503  ;;  %v1691_v1 = vld [vmem:[#allocation5 + $0x360] sm:$0xff]  ;;  %v454_v54 = vadd.f32 %v5273_v57, %v453_v16  ;;  %v1694_v16 = vld [vmem:[#allocation5 + $0x378] sm:$0xff] }
 0x17a   : > { %4005 = vmatprep.subr.bf16.mxu0 %v6473_v0  ;;  %4509 = vtanh.f32 %v449_v61  ;;  %v5356_v28 = vpop.eup %4505  ;;  %v464_v61 = vadd.f32 %v5273_v57, %v5312_v22 }
 0x17b   : > { %807 = vmatmul.mubr.f32.gmra.mrb[6].mxu1 %v5131_v51  ;;  %1245 = vmatmul.mubr.f32.gmra.mrb[38].mxu0 %v5131_v51  ;;  %v5321_v31 = vpop.f32.mrb[14].mxu0  ;;  %4511 = vtanh.f32 %v454_v54  ;;  %v1698_v54 = vld [vmem:[#allocation5 + $0x398] sm:$0xff] }
 0x17c   : > { %811 = vmatprep.mubr.f32.mxu1 %v5314_v23  ;;  %1249 = vmatprep.mubr.f32.mxu0 %v5314_v23  ;;  %v5325_v27 = vpop.f32.mrb[15].mxu0  ;;  %4513 = vtanh.f32 %v459_v36 }
 0x17d   : > { %4007 = vmatpush1.bf16.msra.mxu0 %v4006_v26  ;;  %v4015_v26 = vpack.c.bf16 %v1692_v14, %v1691_v1  ;;  %4515 = vtanh.f32 %v464_v61  ;;  %v474_v61 = vadd.f32 %v5273_v57, %v5325_v27  ;;  %v1702_v27 = vld [vmem:[#allocation5 + $0x3b8] sm:$0xff] }
 0x17e   : > { %4008 = vmatprep.subr.bf16.mxu0 %v6473_v0 }
 0x17f   : > { %812 = vmatmul.mubr.f32.gmra.mrb[8].mxu1 %v5134_v55  ;;  %1250 = vmatmul.mubr.f32.gmra.mrb[40].mxu0 %v5134_v55  ;;  %v3654_v51 = vpop.f32.mrb[16].mxu0  ;;  %v3976_v55 = vpack.c.bf16 %v1055_v53, %v1054_v48  ;;  %v1696_v53 = vld [vmem:[#allocation5 + $0x388] sm:$0xff] }
 0x180   : > { %816 = vmatprep.mubr.f32.mxu1 %v5328_v38  ;;  %1254 = vmatprep.mubr.f32.mxu0 %v5328_v38  ;;  %v5335_v44 = vadd.f32 %v3654_v51, %v5273_v57  ;;  %v5337_v46 = vpop.f32.mrb[17].mxu0 }
 0x181   : > { %4010 = vmatpush1.bf16.msra.mxu0 %v4009_v34  ;;  %3977 = vmatprep.subr.bf16.mxu1 %v3976_v55 }
 0x182   : > { %4011 = vmatprep.subr.bf16.mxu0 %v6473_v0  ;;  %3979 = vmatpush3.bf16.msra.mxu1 %v3976_v55 }
 0x183   : > { %817 = vmatmul.mubr.f32.gmra.mrb[10].mxu1 %v5141_v59  ;;  %1255 = vmatmul.mubr.f32.gmra.mrb[42].mxu0 %v5141_v59  ;;  %v3657_v18 = vpop.f32.mrb[18].mxu0  ;;  %v1693_v59 = vld [vmem:[#allocation5 + $0x370] sm:$0xff]  ;;  %v5365_v35 = vpop.eup %4507 }
 0x184   : > { %821 = vmatprep.mubr.f32.mxu1 %v5339_v60  ;;  %1259 = vmatprep.mubr.f32.mxu0 %v5339_v60  ;;  %v5350_v41 = vadd.f32 %v3657_v18, %v5273_v57  ;;  %v493_v19 = vpop.f32.mrb[19].mxu0  ;;  %v4018_v48 = vpack.c.bf16 %v1694_v16, %v1693_v59  ;;  %v5386_v22 = vpop.eup %4509  ;;  %v1056_v59 = vld [vmem:[#allocation5 + $0x2c0] sm:$0xff]  ;;  %v1057_v16 = vld [vmem:[#allocation5 + $0x2c8] sm:$0xff] }
 0x185   : > { %v5353_v24 = vadd.f32 %v5273_v57, %v493_v19  ;;  %4013 = vmatpush1.bf16.msra.mxu0 %v4012_v10 }
 0x186   : > { %4014 = vmatprep.subr.bf16.mxu0 %v6473_v0 }
 0x187   : > { %822 = vmatmul.mubr.f32.gmra.mrb[12].mxu1 %v5144_v63  ;;  %1260 = vmatmul.mubr.f32.gmra.mrb[44].mxu0 %v5144_v63  ;;  %v3660_v30 = vpop.f32.mrb[20].mxu0  ;;  %v1695_v63 = vld [vmem:[#allocation5 + $0x380] sm:$0xff] }
 0x188   : > { %826 = vmatprep.mubr.f32.mxu1 %v5356_v28  ;;  %1264 = vmatprep.mubr.f32.mxu0 %v5356_v28  ;;  %v5363_v47 = vadd.f32 %v3660_v30, %v5273_v57  ;;  %v503_v34 = vpop.f32.mrb[21].mxu0  ;;  %v4021_v14 = vpack.c.bf16 %v1696_v53, %v1695_v63  ;;  %v5395_v30 = vpop.eup %4511  ;;  %v1699_v63 = vld [vmem:[#allocation5 + $0x3a0] sm:$0xff]  ;;  %v1700_v53 = vld [vmem:[#allocation5 + $0x3a8] sm:$0xff] }
 0x189   : > { %v5370_v51 = vadd.f32 %v5273_v57, %v503_v34  ;;  %4016 = vmatpush1.bf16.msra.mxu0 %v4015_v26  ;;  %v469_v34 = vadd.f32 %v5308_v43, %v5273_v57 }
 0x18a   : > { %4017 = vmatprep.subr.bf16.mxu0 %v6473_v0 }
 0x18b   : > { %827 = vmatmul.mubr.f32.gmra.mrb[14].mxu1 %v5151_v4  ;;  %1265 = vmatmul.mubr.f32.gmra.mrb[46].mxu0 %v5151_v4  ;;  %v3663_v10 = vpop.f32.mrb[22].mxu0  ;;  %v1697_v4 = vld [vmem:[#allocation5 + $0x390] sm:$0xff]  ;;  %4517 = vtanh.f32 %v469_v34  ;;  %v479_v34 = vadd.f32 %v5321_v31, %v5273_v57 }
 0x18c   : > { %831 = vmatprep.mubr.f32.mxu1 %v5365_v35  ;;  %1269 = vmatprep.mubr.f32.mxu0 %v5365_v35  ;;  %v5380_v15 = vadd.f32 %v3663_v10, %v5273_v57  ;;  %v513_v55 = vpop.f32.mrb[23].mxu0  ;;  %4519 = vtanh.f32 %v474_v61 }
 0x18d   : > { %v5383_v1 = vadd.f32 %v5273_v57, %v513_v55  ;;  %4019 = vmatpush1.bf16.msra.mxu0 %v4018_v48  ;;  %v3980_v48 = vpack.c.bf16 %v1057_v16, %v1056_v59  ;;  %4521 = vtanh.f32 %v479_v34 }
 0x18e   : > { %4020 = vmatprep.subr.bf16.mxu0 %v6473_v0 }
 0x18f   : > { %832 = vmatmul.mubr.f32.gmra.mrb[16].mxu1 %v5154_v8  ;;  %1270 = vmatmul.mubr.f32.gmra.mrb[48].mxu0 %v5154_v8  ;;  %v3666_v18 = vpop.f32.mrb[24].mxu0  ;;  %v4024_v8 = vpack.c.bf16 %v1698_v54, %v1697_v4  ;;  %v4027_v4 = vpack.c.bf16 %v1700_v53, %v1699_v63  ;;  %v5416_v54 = vpop.eup %4513  ;;  %v1704_v63 = vld [vmem:[#allocation5 + $0x3c8] sm:$0xff]  ;;  %v484_v53 = vadd.f32 %v5273_v57, %v5337_v46 }
 0x190   : > { %836 = vmatprep.mubr.f32.mxu1 %v5386_v22  ;;  %1274 = vmatprep.mubr.f32.mxu0 %v5386_v22  ;;  %v5393_v19 = vadd.f32 %v3666_v18, %v5273_v57  ;;  %v523_v26 = vpop.f32.mrb[25].mxu0  ;;  %v5425_v16 = vpop.eup %4515 }
 0x191   : > { %v5400_v36 = vadd.f32 %v5273_v57, %v523_v26  ;;  %4022 = vmatpush1.bf16.msra.mxu0 %v4021_v14  ;;  %3981 = vmatprep.subr.bf16.mxu1 %v3980_v48  ;;  %4523 = vtanh.f32 %v484_v53  ;;  %v1710_v53 = vld [vmem:[#allocation5 + $0x3f8] sm:$0xff] }
 0x192   : > { %4023 = vmatprep.subr.bf16.mxu0 %v6473_v0  ;;  %3983 = vmatpush3.bf16.msra.mxu1 %v3980_v48  ;;  %4525 = vtanh.f32 %v5335_v44 }
 0x193   : > { %837 = vmatmul.mubr.f32.gmra.mrb[18].mxu1 %v5161_v13  ;;  %1275 = vmatmul.mubr.f32.gmra.mrb[50].mxu0 %v5161_v13  ;;  %v3669_v10 = vpop.f32.mrb[26].mxu0  ;;  %v1701_v13 = vld [vmem:[#allocation5 + $0x3b0] sm:$0xff]  ;;  %4527 = vtanh.f32 %v5353_v24  ;;  %v1060_v24 = vld [vmem:[#allocation5 + $0x2e0] sm:$0xff] }
 0x194   : > { %841 = vmatprep.mubr.f32.mxu1 %v5395_v30  ;;  %1279 = vmatprep.mubr.f32.mxu0 %v5395_v30  ;;  %v5410_v43 = vadd.f32 %v3669_v10, %v5273_v57  ;;  %v533_v55 = vpop.f32.mrb[27].mxu0  ;;  %v4030_v48 = vpack.c.bf16 %v1702_v27, %v1701_v13  ;;  %v1706_v13 = vld [vmem:[#allocation5 + $0x3d8] sm:$0xff]  ;;  %v1058_v27 = vld [vmem:[#allocation5 + $0x2d0] sm:$0xff]  ;;  %4529 = vtanh.f32 %v5350_v41 }
 0x195   : > { %v5413_v14 = vadd.f32 %v5273_v57, %v533_v55  ;;  %4025 = vmatpush1.bf16.msra.mxu0 %v4024_v8  ;;  %v5446_v46 = vpop.eup %4517  ;;  %4531 = vtanh.f32 %v5370_v51 }
 0x196   : > { %4026 = vmatprep.subr.bf16.mxu0 %v6473_v0  ;;  %4533 = vtanh.f32 %v5363_v47 }
 0x197   : > { %842 = vmatmul.mubr.f32.gmra.mrb[20].mxu1 %v5164_v17  ;;  %1280 = vmatmul.mubr.f32.gmra.mrb[52].mxu0 %v5164_v17  ;;  %v3672_v18 = vpop.f32.mrb[28].mxu0  ;;  %v1703_v17 = vld [vmem:[#allocation5 + $0x3c0] sm:$0xff]  ;;  %4535 = vtanh.f32 %v5383_v1 }
 0x198   : > { %846 = vmatprep.mubr.f32.mxu1 %v5416_v54  ;;  %1284 = vmatprep.mubr.f32.mxu0 %v5416_v54  ;;  %v5423_v26 = vadd.f32 %v3672_v18, %v5273_v57  ;;  %v543_v59 = vpop.f32.mrb[29].mxu0  ;;  %v5452_v18 = vpop.eup %4519  ;;  %4537 = vtanh.f32 %v5380_v15  ;;  %v1062_v15 = vld [vmem:[#allocation5 + $0x2f0] sm:$0xff] }
 0x199   : > { %v5430_v8 = vadd.f32 %v5273_v57, %v543_v59  ;;  %4028 = vmatpush1.bf16.msra.mxu0 %v4027_v4  ;;  %v4033_v4 = vpack.c.bf16 %v1704_v63, %v1703_v17  ;;  %v1708_v17 = vld [vmem:[#allocation5 + $0x3e8] sm:$0xff]  ;;  %v1709_v63 = vld [vmem:[#allocation5 + $0x3f0] sm:$0xff]  ;;  %4539 = vtanh.f32 %v5400_v36  ;;  %v1063_v36 = vld [vmem:[#allocation5 + $0x2f8] sm:$0xff] }
 0x19a   : > { %4029 = vmatprep.subr.bf16.mxu0 %v6473_v0  ;;  %v4042_v44 = vpack.c.bf16 %v1710_v53, %v1709_v63  ;;  %4541 = vtanh.f32 %v5393_v19  ;;  %v1711_v63 = vld [vmem:[#allocation5 + $0x400] sm:$0xff]  ;;  %v1712_v53 = vld [vmem:[#allocation5 + $0x408] sm:$0xff] }
 0x19b   : > { %847 = vmatmul.mubr.f32.gmra.mrb[22].mxu1 %v5171_v21  ;;  %1285 = vmatmul.mubr.f32.gmra.mrb[54].mxu0 %v5171_v21  ;;  %v3675_v61 = vpop.f32.mrb[30].mxu0  ;;  %v1705_v21 = vld [vmem:[#allocation5 + $0x3d0] sm:$0xff]  ;;  %4543 = vtanh.f32 %v5413_v14  ;;  %v5609_v14 = vld [vmem:[%s5102_s21 + $0x28] sm:$0xff] }
 0x19c   : > { %851 = vmatprep.mubr.f32.mxu1 %v5425_v16  ;;  %1289 = vmatprep.mubr.f32.mxu0 %v5425_v16  ;;  %v5440_v31 = vadd.f32 %v3675_v61, %v5273_v57  ;;  %v553_v10 = vpop.f32.mrb[31].mxu0  ;;  %v4036_v59 = vpack.c.bf16 %v1706_v13, %v1705_v21  ;;  %v5461_v61 = vpop.eup %4521  ;;  %v3992_v13 = vpack.c.bf16 %v1063_v36, %v1062_v15  ;;  %4545 = vtanh.f32 %v5410_v43  ;;  %v5604_v43 = vld [vmem:[%s5102_s21 + $0x20] sm:$0xff]  ;;  %v1716_v15 = vld [vmem:[#allocation5 + $0x428] sm:$0xff] }
 0x19d   : > { %v5443_v55 = vadd.f32 %v5273_v57, %v553_v10  ;;  %4031 = vmatpush1.bf16.msra.mxu0 %v4030_v48  ;;  %v1059_v57 = vld [vmem:[#allocation5 + $0x2d8] sm:$0xff]  ;;  %v1707_v48 = vld [vmem:[#allocation5 + $0x3e0] sm:$0xff]  ;;  %v1061_v10 = vld [vmem:[#allocation5 + $0x2e8] sm:$0xff]  ;;  %4547 = vtanh.f32 %v5430_v8 }
 0x19e   : > { %4032 = vmatprep.subr.bf16.mxu0 %v6473_v0  ;;  %v3984_v34 = vpack.c.bf16 %v1059_v57, %v1058_v27  ;;  %v3988_v41 = vpack.c.bf16 %v1061_v10, %v1060_v24  ;;  %4549 = vtanh.f32 %v5423_v26  ;;  %v5614_v26 = vld [vmem:[%s5102_s21 + $0x30] sm:$0xff]  ;;  %v5619_v8 = vld [vmem:[%s5102_s21 + $0x38] sm:$0xff] }
 0x19f   : > { %852 = vmatmul.mubr.f32.gmra.mrb[24].mxu1 %v5174_v25  ;;  %1290 = vmatmul.mubr.f32.gmra.mrb[56].mxu0 %v5174_v25  ;;  %v4039_v25 = vpack.c.bf16 %v1708_v17, %v1707_v48  ;;  %4551 = vtanh.f32 %v5443_v55  ;;  %v4756_v55 = vld [vmem:[%s5102_s21 + $0x48] sm:$0xff]  ;;  %v4759_v48 = vld [vmem:[%s5102_s21 + $0x60] sm:$0xff] }
 0x1a0   : > { %856 = vmatprep.mubr.f32.mxu1 %v5446_v46  ;;  %1294 = vmatprep.mubr.f32.mxu0 %v5446_v46  ;;  %4553 = vtanh.f32 %v5440_v31  ;;  %v4755_v31 = vld [vmem:[%s5102_s21 + $0x40] sm:$0xff]  ;;  %v4760_v17 = vld [vmem:[%s5102_s21 + $0x68] sm:$0xff] }
 0x1a1   : > { %4034 = vmatpush1.bf16.msra.mxu0 %v4033_v4  ;;  %3985 = vmatprep.subr.bf16.mxu1 %v3984_v34 }
 0x1a2   : > { %4035 = vmatprep.subr.bf16.mxu0 %v6473_v0  ;;  %3987 = vmatpush3.bf16.msra.mxu1 %v3984_v34  ;;  %v4758_v34 = vld [vmem:[%s5102_s21 + $0x58] sm:$0xff] }
 0x1a3   : > { %857 = vmatmul.mubr.f32.gmra.mrb[26].mxu1 %v5181_v29  ;;  %1295 = vmatmul.mubr.f32.gmra.mrb[58].mxu0 %v5181_v29  ;;  %v5468_v29 = vpop.eup %4523 }
 0x1a4   : > { %861 = vmatprep.mubr.f32.mxu1 %v5452_v18  ;;  %1299 = vmatprep.mubr.f32.mxu0 %v5452_v18 }
 0x1a5   : > { %4037 = vmatpush1.bf16.msra.mxu0 %v4036_v59  ;;  %3989 = vmatprep.subr.bf16.mxu1 %v3988_v41  ;;  %v4757_v59 = vld [vmem:[%s5102_s21 + $0x50] sm:$0xff] }
 0x1a6   : > { %4038 = vmatprep.subr.bf16.mxu0 %v6473_v0  ;;  %3991 = vmatpush3.bf16.msra.mxu1 %v3988_v41 }
 0x1a7   : > { %862 = vmatmul.mubr.f32.gmra.mrb[28].mxu1 %v5184_v33  ;;  %1300 = vmatmul.mubr.f32.gmra.mrb[60].mxu0 %v5184_v33  ;;  %v5477_v33 = vpop.eup %4525 }
 0x1a8   : > { %866 = vmatprep.mubr.f32.mxu1 %v5461_v61  ;;  %1304 = vmatprep.mubr.f32.mxu0 %v5461_v61  ;;  %v5484_v4 = vpop.eup %4527 }
 0x1a9   : > { %4040 = vmatpush1.bf16.msra.mxu0 %v4039_v25  ;;  %v5491_v51 = vpop.eup %4529  ;;  %3993 = vmatprep.subr.bf16.mxu1 %v3992_v13  ;;  %v4761_v25 = vld [vmem:[%s5102_s21 + $0x70] sm:$0xff] }
 0x1aa   : > { %4041 = vmatprep.subr.bf16.mxu0 %v6473_v0  ;;  %v5498_v21 = vpop.eup %4531  ;;  %3995 = vmatpush3.bf16.msra.mxu1 %v3992_v13 }
 0x1ab   : > { %867 = vmatmul.mubr.f32.gmra.mrb[30].mxu1 %v5191_v37  ;;  %1305 = vmatmul.mubr.f32.gmra.mrb[62].mxu0 %v5191_v37  ;;  %v5505_v47 = vpop.eup %4533 }
 0x1ac   : > { %871 = vmatprep.mubr.f32.mxu1 %v5468_v29  ;;  %1309 = vmatprep.mubr.f32.mxu0 %v5468_v29  ;;  %v5512_v1 = vpop.eup %4535 }
 0x1ad   : > { %4043 = vmatpush1.bf16.msra.mxu0 %v4042_v44  ;;  %v5519_v27 = vpop.eup %4537  ;;  %4092 = vmatprep.subr.bf16.mxu1 %v6473_v0  ;;  %v4045_v44 = vpack.c.bf16 %v1712_v53, %v1711_v63  ;;  %v2390_v53 = vld [vmem:[#allocation5 + $0x500] sm:$0xff] }
 0x1ae   : > { %4044 = vmatprep.subr.bf16.mxu0 %v6473_v0  ;;  %v5526_v57 = vpop.eup %4539 }
 0x1af   : > { %872 = vmatmul.mubr.f32.gmra.mrb[32].mxu1 %v5194_v39  ;;  %1310 = vmatmul.mubr.f32.gmra.mrb[64].mxu0 %v5194_v39 }
 0x1b0   : > { %876 = vmatprep.mubr.f32.mxu1 %v5477_v33  ;;  %1314 = vmatprep.mubr.f32.mxu0 %v5477_v33 }
 0x1b3   : > { %877 = vmatmul.mubr.f32.gmra.mrb[34].mxu1 %v5201_v42  ;;  %1315 = vmatmul.mubr.f32.gmra.mrb[66].mxu0 %v5201_v42 }
 0x1b4   : > { %881 = vmatprep.mubr.f32.mxu1 %v5484_v4  ;;  %1319 = vmatprep.mubr.f32.mxu0 %v5484_v4 }
 0x1b7   : > { %882 = vmatmul.mubr.f32.gmra.mrb[36].mxu1 %v5204_v45  ;;  %1320 = vmatmul.mubr.f32.gmra.mrb[68].mxu0 %v5204_v45 }
 0x1b8   : > { %886 = vmatprep.mubr.f32.mxu1 %v5491_v51  ;;  %1324 = vmatprep.mubr.f32.mxu0 %v5491_v51 }
 0x1bb   : > { %887 = vmatmul.mubr.f32.gmra.mrb[38].mxu1 %v5211_v49  ;;  %1325 = vmatmul.mubr.f32.gmra.mrb[70].mxu0 %v5211_v49 }
 0x1bc   : > { %891 = vmatprep.mubr.f32.mxu1 %v5498_v21  ;;  %1329 = vmatprep.mubr.f32.mxu0 %v5498_v21 }
 0x1bf   : > { %892 = vmatmul.mubr.f32.gmra.mrb[40].mxu1 %v5214_v52  ;;  %1330 = vmatmul.mubr.f32.gmra.mrb[72].mxu0 %v5214_v52 }
 0x1c0   : > { %896 = vmatprep.mubr.f32.mxu1 %v5505_v47  ;;  %1334 = vmatprep.mubr.f32.mxu0 %v5505_v47 }
 0x1c3   : > { %897 = vmatmul.mubr.f32.gmra.mrb[42].mxu1 %v5220_v56  ;;  %1335 = vmatmul.mubr.f32.gmra.mrb[74].mxu0 %v5220_v56 }
 0x1c4   : > { %901 = vmatprep.mubr.f32.mxu1 %v5512_v1  ;;  %1339 = vmatprep.mubr.f32.mxu0 %v5512_v1 }
 0x1c7   : > { %902 = vmatmul.mubr.f32.gmra.mrb[44].mxu1 %v5223_v58  ;;  %1340 = vmatmul.mubr.f32.gmra.mrb[76].mxu0 %v5223_v58  ;;  %v5534_v58 = vpop.eup %4541 }
 0x1c8   : > { %906 = vmatprep.mubr.f32.mxu1 %v5519_v27  ;;  %1344 = vmatprep.mubr.f32.mxu0 %v5519_v27 }
 0x1cb   : > { %907 = vmatmul.mubr.f32.gmra.mrb[46].mxu1 %v5229_v62  ;;  %1345 = vmatmul.mubr.f32.gmra.mrb[78].mxu0 %v5229_v62  ;;  %v5541_v62 = vpop.eup %4543 }
 0x1cc   : > { %911 = vmatprep.mubr.f32.mxu1 %v5526_v57  ;;  %1349 = vmatprep.mubr.f32.mxu0 %v5526_v57  ;;  %v5548_v19 = vpop.eup %4545 }
 0x1cf   : > { %912 = vmatmul.mubr.f32.gmra.mrb[48].mxu1 %v5232_v2  ;;  %1350 = vmatmul.mubr.f32.gmra.mrb[80].mxu0 %v5232_v2  ;;  %v5555_v2 = vpop.eup %4547 }
 0x1d0   : > { %916 = vmatprep.mubr.f32.mxu1 %v5534_v58  ;;  %1354 = vmatprep.mubr.f32.mxu0 %v5534_v58 }
 0x1d3   : > { %917 = vmatmul.mubr.f32.gmra.mrb[50].mxu1 %v5238_v3  ;;  %1355 = vmatmul.mubr.f32.gmra.mrb[82].mxu0 %v5238_v3  ;;  %v5562_v3 = vpop.eup %4549 }
 0x1d4   : > { %921 = vmatprep.mubr.f32.mxu1 %v5541_v62  ;;  %1359 = vmatprep.mubr.f32.mxu0 %v5541_v62  ;;  %6523 = vst [vmem:[#allocation10_spill] sm:$0xff] %v5562_v3 }
 0x1d7   : > { %922 = vmatmul.mubr.f32.gmra.mrb[52].mxu1 %v5241_v5  ;;  %1360 = vmatmul.mubr.f32.gmra.mrb[84].mxu0 %v5241_v5  ;;  %v5568_v5 = vpop.eup %4551 }
 0x1d8   : > { %926 = vmatprep.mubr.f32.mxu1 %v5548_v19  ;;  %1364 = vmatprep.mubr.f32.mxu0 %v5548_v19  ;;  %6524 = vst [vmem:[#allocation11_spill] sm:$0xff] %v5568_v5 }
 0x1db   : > { %927 = vmatmul.mubr.f32.gmra.mrb[54].mxu1 %v5247_v6  ;;  %1365 = vmatmul.mubr.f32.gmra.mrb[86].mxu0 %v5247_v6  ;;  %v5574_v6 = vpop.eup %4553 }
 0x1dc   : > { %931 = vmatprep.mubr.f32.mxu1 %v5555_v2  ;;  %1369 = vmatprep.mubr.f32.mxu0 %v5555_v2  ;;  %6525 = vst [vmem:[#allocation12_spill] sm:$0xff] %v5574_v6 }
 0x1df   : > { %932 = vmatmul.mubr.f32.gmra.mrb[56].mxu1 %v5250_v7  ;;  %1370 = vmatmul.mubr.f32.gmra.mrb[88].mxu0 %v5250_v7  ;;  %v5584_v7 = vld [vmem:[%s5102_s21] sm:$0xff] }
 0x1e0   : > { %936 = vmatprep.mubr.f32.mxu1 %v5562_v3  ;;  %1374 = vmatprep.mubr.f32.mxu0 %v5562_v3 }
 0x1e3   : > { %937 = vmatmul.mubr.f32.gmra.mrb[58].mxu1 %v5255_v9  ;;  %1375 = vmatmul.mubr.f32.gmra.mrb[90].mxu0 %v5255_v9  ;;  %v5589_v9 = vld [vmem:[%s5102_s21 + $0x8] sm:$0xff] }
 0x1e4   : > { %941 = vmatprep.mubr.f32.mxu1 %v5568_v5  ;;  %1379 = vmatprep.mubr.f32.mxu0 %v5568_v5 }
 0x1e7   : > { %942 = vmatmul.mubr.f32.gmra.mrb[60].mxu1 %v5258_v11  ;;  %1380 = vmatmul.mubr.f32.gmra.mrb[92].mxu0 %v5258_v11  ;;  %v5594_v11 = vld [vmem:[%s5102_s21 + $0x10] sm:$0xff] }
 0x1e8   : > { %946 = vmatprep.mubr.f32.mxu1 %v5574_v6  ;;  %1384 = vmatprep.mubr.f32.mxu0 %v5574_v6 }
 0x1eb   : > { %947 = vmatmul.mubr.f32.gmra.mrb[62].mxu1 %v5263_v12  ;;  %1385 = vmatmul.mubr.f32.gmra.mrb[94].mxu0 %v5263_v12  ;;  %v5599_v12 = vld [vmem:[%s5102_s21 + $0x18] sm:$0xff] }
 0x1ec   : > { %1940 = vmatprep.mubr.f32.mxu0 %v5280_v32 }
 0x1ef   : > { %1941 = vmatmul.mubr.f32.vlgmr.msra.gmra.mrb[96].mxu0 %v5584_v7 }
 0x1f0   : > { %1945 = vmatprep.mubr.f32.mxu0 %v5284_v40  ;;  %4046 = vmatpush1.bf16.msra.mxu0 %v4045_v44  ;;  %v2391_v44 = vld [vmem:[#allocation5 + $0x508] sm:$0xff] }
 0x1f1   : > { %4047 = vmatprep.subr.bf16.mxu0 %v6473_v0 }
 0x1f3   : > { %1946 = vmatmul.mubr.f32.gmra.mrb[98].mxu0 %v5589_v9 }
 0x1f4   : > { %1950 = vmatprep.mubr.f32.mxu0 %v5292_v50 }
 0x1f7   : > { %1951 = vmatmul.mubr.f32.gmra.mrb[100].mxu0 %v5594_v11 }
 0x1f8   : > { %1955 = vmatprep.mubr.f32.mxu0 %v5304_v20 }
 0x1fb   : > { %1956 = vmatmul.mubr.f32.gmra.mrb[102].mxu0 %v5599_v12 }
 0x1fc   : > { %1960 = vmatprep.mubr.f32.mxu0 %v5314_v23 }
 0x1ff   : > { %1961 = vmatmul.mubr.f32.gmra.mrb[104].mxu0 %v5604_v43 }
 0x200   : > { %1965 = vmatprep.mubr.f32.mxu0 %v5328_v38 }
 0x203   : > { %1966 = vmatmul.mubr.f32.gmra.mrb[106].mxu0 %v5609_v14 }
 0x204   : > { %1970 = vmatprep.mubr.f32.mxu0 %v5339_v60 }
 0x207   : > { %1971 = vmatmul.mubr.f32.gmra.mrb[108].mxu0 %v5614_v26 }
 0x208   : > { %1975 = vmatprep.mubr.f32.mxu0 %v5356_v28 }
 0x20b   : > { %1976 = vmatmul.mubr.f32.gmra.mrb[110].mxu0 %v5619_v8 }
 0x20c   : > { %1980 = vmatprep.mubr.f32.mxu0 %v5365_v35 }
 0x20f   : > { %1981 = vmatmul.mubr.f32.gmra.mrb[112].mxu0 %v4755_v31 }
 0x210   : > { %1985 = vmatprep.mubr.f32.mxu0 %v5386_v22 }
 0x213   : > { %1986 = vmatmul.mubr.f32.gmra.mrb[114].mxu0 %v4756_v55  ;;  %v4762_v55 = vld [vmem:[%s5102_s21 + $0xb0] sm:$0xff] }
 0x214   : > { %1990 = vmatprep.mubr.f32.mxu0 %v5395_v30 }
 0x217   : > { %1991 = vmatmul.mubr.f32.gmra.mrb[116].mxu0 %v4757_v59 }
 0x218   : > { %1995 = vmatprep.mubr.f32.mxu0 %v5416_v54 }
 0x21b   : > { %1996 = vmatmul.mubr.f32.gmra.mrb[118].mxu0 %v4758_v34 }
 0x21c   : > { %2000 = vmatprep.mubr.f32.mxu0 %v5425_v16 }
 0x21f   : > { %2001 = vmatmul.mubr.f32.gmra.mrb[120].mxu0 %v4759_v48  ;;  %v4763_v48 = vld [vmem:[%s5102_s21 + $0xb8] sm:$0xff] }
 0x220   : > { %2005 = vmatprep.mubr.f32.mxu0 %v5446_v46 }
 0x223   : > { %2006 = vmatmul.mubr.f32.gmra.mrb[122].mxu0 %v4760_v17  ;;  %v1717_v17 = vld [vmem:[#allocation5 + $0x430] sm:$0xff] }
 0x224   : > { %2010 = vmatprep.mubr.f32.mxu0 %v5452_v18 }
 0x227   : > { %2011 = vmatmul.mubr.f32.gmra.mrb[124].mxu0 %v4761_v25  ;;  %v1718_v25 = vld [vmem:[#allocation5 + $0x438] sm:$0xff] }
 0x228   : > { %2015 = vmatprep.mubr.f32.mxu0 %v5461_v61 }
 0x22b   : > { %2016 = vmatmul.mubr.f32.gmra.mrb[126].mxu0 %v5191_v37  ;;  %v5650_v37 = vld [vmem:[#allocation7 + $0x1] ss:$0 sm:$0xff] }
 0x22c   : > { %2020 = vmatprep.mubr.f32.mxu0 %v5468_v29 }
 0x22f   : > { %2021 = vmatmul.mubr.f32.gmra.mrb[128].mxu0 %v5194_v39  ;;  %v1713_v39 = vld [vmem:[#allocation5 + $0x410] sm:$0xff] }
 0x230   : > { %2025 = vmatprep.mubr.f32.mxu0 %v5477_v33 }
 0x233   : > { %2026 = vmatmul.mubr.f32.gmra.mrb[130].mxu0 %v5201_v42  ;;  %v1714_v42 = vld [vmem:[#allocation5 + $0x418] sm:$0xff] }
 0x234   : > { %2030 = vmatprep.mubr.f32.mxu0 %v5484_v4  ;;  %v4048_v24 = vpack.c.bf16 %v1714_v42, %v1713_v39  ;;  %v4054_v39 = vpack.c.bf16 %v1718_v25, %v1717_v17  ;;  %v2394_v17 = vld [vmem:[#allocation5 + $0x520] sm:$0xff]  ;;  %v2395_v25 = vld [vmem:[#allocation5 + $0x528] sm:$0xff] }
 0x236   : > { %4049 = vmatpush1.bf16.msra.mxu0 %v4048_v24 }
 0x237   : > { %2031 = vmatmul.mubr.f32.gmra.mrb[132].mxu0 %v5204_v45  ;;  %4050 = vmatprep.subr.bf16.mxu0 %v6473_v0 }
 0x238   : > { %2035 = vmatprep.mubr.f32.mxu0 %v5491_v51 }
 0x23b   : > { %2036 = vmatmul.mubr.f32.gmra.mrb[134].mxu0 %v5211_v49  ;;  %v1715_v49 = vld [vmem:[#allocation5 + $0x420] sm:$0xff] }
 0x23c   : > { %2040 = vmatprep.mubr.f32.mxu0 %v5498_v21 }
 0x23f   : > { %2041 = vmatmul.mubr.f32.gmra.mrb[136].mxu0 %v5214_v52  ;;  %v4051_v52 = vpack.c.bf16 %v1716_v15, %v1715_v49  ;;  %v2392_v15 = vld [vmem:[#allocation5 + $0x510] sm:$0xff] }
 0x240   : > { %2045 = vmatprep.mubr.f32.mxu0 %v5505_v47 }
 0x241   : > { %4052 = vmatpush1.bf16.msra.mxu0 %v4051_v52  ;;  %v2393_v52 = vld [vmem:[#allocation5 + $0x518] sm:$0xff] }
 0x242   : > { %v793_v45 = vpop.f32.mrb[0].mxu1  ;;  %4053 = vmatprep.subr.bf16.mxu0 %v6473_v0 }
 0x243   : > { %v794_v10 = vadd.f32 %v5650_v37, %v793_v45  ;;  %v795_v41 = vpop.f32.mrb[1].mxu1  ;;  %2046 = vmatmul.mubr.f32.gmra.mrb[138].mxu0 %v5220_v56 }
 0x244   : > { %2050 = vmatprep.mubr.f32.mxu0 %v5512_v1  ;;  %v4093_v41 = vpack.c.bf16 %v2391_v44, %v2390_v53 }
 0x245   : > { %4555 = vtanh.f32 %v794_v10  ;;  %v4764_v10 = vld [vmem:[%s5102_s21 + $0xc0] sm:$0xff]  ;;  %4055 = vmatpush1.bf16.msra.mxu0 %v4054_v39 }
 0x246   : > { %v798_v36 = vpop.f32.mrb[2].mxu1  ;;  %4056 = vmatprep.subr.bf16.mxu0 %v6473_v0 }
 0x247   : > { %v799_v13 = vadd.f32 %v5650_v37, %v798_v36  ;;  %v800_v31 = vpop.f32.mrb[3].mxu1  ;;  %2051 = vmatmul.mubr.f32.gmra.mrb[140].mxu0 %v4762_v55  ;;  %v4765_v55 = vld [vmem:[%s5102_s21 + $0xc8] sm:$0xff] }
 0x248   : > { %2055 = vmatprep.mubr.f32.mxu0 %v5519_v27 }
 0x249   : > { %4557 = vtanh.f32 %v799_v13 }
 0x24a   : > { %v803_v56 = vpop.f32.mrb[4].mxu1 }
 0x24b   : > { %v804_v59 = vadd.f32 %v5650_v37, %v803_v56  ;;  %v805_v34 = vpop.f32.mrb[5].mxu1  ;;  %2056 = vmatmul.mubr.f32.gmra.mrb[142].mxu0 %v4763_v48  ;;  %v4096_v56 = vpack.c.bf16 %v2393_v52, %v2392_v15 }
 0x24c   : > { %2060 = vmatprep.mubr.f32.mxu0 %v5526_v57  ;;  %v1720_v34 = vld [vmem:[#allocation5 + $0x448] sm:$0xff] }
 0x24d   : > { %4559 = vtanh.f32 %v804_v59  ;;  %v1719_v59 = vld [vmem:[#allocation5 + $0x440] sm:$0xff] }
 0x24e   : > { %v808_v63 = vpop.f32.mrb[6].mxu1 }
 0x24f   : > { %v5663_v42 = vpop.eup %4555  ;;  %v809_v45 = vadd.f32 %v5650_v37, %v808_v63  ;;  %v810_v24 = vpop.f32.mrb[7].mxu1  ;;  %2061 = vmatmul.mubr.f32.gmra.mrb[144].mxu0 %v4764_v10  ;;  %v4057_v63 = vpack.c.bf16 %v1720_v34, %v1719_v59  ;;  %v1722_v59 = vld [vmem:[#allocation5 + $0x458] sm:$0xff] }
 0x250   : > { %3708 = vmatprep.mubr.f32.mxu1 %v5663_v42  ;;  %2065 = vmatprep.mubr.f32.mxu0 %v5534_v58  ;;  %v4099_v24 = vpack.c.bf16 %v2395_v25, %v2394_v17  ;;  %v2399_v17 = vld [vmem:[#allocation5 + $0x548] sm:$0xff] }
 0x251   : > { %4561 = vtanh.f32 %v809_v45  ;;  %v4766_v45 = vld [vmem:[%s5102_s21 + $0xd0] sm:$0xff]  ;;  %4058 = vmatpush1.bf16.msra.mxu0 %v4057_v63 }
 0x252   : > { %v813_v49 = vpop.f32.mrb[8].mxu1  ;;  %4059 = vmatprep.subr.bf16.mxu0 %v6473_v0 }
 0x253   : > { %v5670_v36 = vpop.eup %4557  ;;  %v814_v13 = vadd.f32 %v5650_v37, %v813_v49  ;;  %v815_v31 = vpop.f32.mrb[9].mxu1  ;;  %2066 = vmatmul.mubr.f32.gmra.mrb[146].mxu0 %v4765_v55  ;;  %v2397_v49 = vld [vmem:[#allocation5 + $0x538] sm:$0xff] }
 0x254   : > { %3709 = vmatmul.mubr.f32.vlgmr.msra.gmra.mrb[64].mxu1 %v5670_v36  ;;  %2070 = vmatprep.mubr.f32.mxu0 %v5541_v62  ;;  %v4767_v31 = vld [vmem:[%s5102_s21 + $0xd8] sm:$0xff] }
 0x255   : > { %4563 = vtanh.f32 %v814_v13  ;;  %4094 = vmatpush1.bf16.msra.mxu1 %v4093_v41  ;;  %v2396_v41 = vld [vmem:[#allocation5 + $0x530] sm:$0xff] }
 0x256   : > { %v818_v48 = vpop.f32.mrb[10].mxu1  ;;  %4095 = vmatprep.subr.bf16.mxu1 %v6473_v0  ;;  %v4102_v55 = vpack.c.bf16 %v2397_v49, %v2396_v41  ;;  %v2400_v41 = vld [vmem:[#allocation5 + $0x550] sm:$0xff]  ;;  %v2401_v49 = vld [vmem:[#allocation5 + $0x558] sm:$0xff] }
 0x257   : > { %v5677_v53 = vpop.eup %4559  ;;  %v819_v44 = vadd.f32 %v5650_v37, %v818_v48  ;;  %v820_v39 = vpop.f32.mrb[11].mxu1  ;;  %2071 = vmatmul.mubr.f32.gmra.mrb[148].mxu0 %v4766_v45  ;;  %v2398_v48 = vld [vmem:[#allocation5 + $0x540] sm:$0xff] }
 0x258   : > { %3711 = vmatprep.mubr.f32.mxu1 %v5677_v53  ;;  %2075 = vmatprep.mubr.f32.mxu0 %v5548_v19  ;;  %v5696_v45 = vld [vmem:[%s5102_s21 + $0xe0] sm:$0xff] }
 0x259   : > { %4565 = vtanh.f32 %v819_v44  ;;  %4097 = vmatpush1.bf16.msra.mxu1 %v4096_v56  ;;  %v1721_v56 = vld [vmem:[#allocation5 + $0x450] sm:$0xff]  ;;  %6528 = vst [vmem:[#allocation15_spill] sm:$0xff] %v5696_v45 }
 0x25a   : > { %v823_v10 = vpop.f32.mrb[12].mxu1  ;;  %4098 = vmatprep.subr.bf16.mxu1 %v6473_v0  ;;  %v4060_v25 = vpack.c.bf16 %v1722_v59, %v1721_v56  ;;  %v5707_v56 = vld [vmem:[%s5102_s21 + $0xe8] sm:$0xff]  ;;  %v1723_v59 = vld [vmem:[#allocation5 + $0x460] sm:$0xff] }
 0x25b   : > { %v5685_v15 = vpop.eup %4561  ;;  %v824_v52 = vadd.f32 %v5650_v37, %v823_v10  ;;  %v825_v13 = vpop.f32.mrb[13].mxu1  ;;  %2076 = vmatmul.mubr.f32.gmra.mrb[150].mxu0 %v4767_v31  ;;  %6530 = vst [vmem:[#allocation17_spill] sm:$0xff] %v5707_v56 }
 0x25c   : > { %6526 = vst [vmem:[#allocation13_spill] sm:$0xff] %v5685_v15  ;;  %3712 = vmatmul.mubr.f32.gmra.mrb[66].mxu1 %v5685_v15  ;;  %2080 = vmatprep.mubr.f32.mxu0 %v5555_v2 }
 0x25d   : > { %4567 = vtanh.f32 %v824_v52  ;;  %4100 = vmatpush1.bf16.msra.mxu1 %v4099_v24  ;;  %v4105_v24 = vpack.c.bf16 %v2399_v17, %v2398_v48  ;;  %4061 = vmatpush1.bf16.msra.mxu0 %v4060_v25  ;;  %v2402_v17 = vld [vmem:[#allocation5 + $0x560] sm:$0xff]  ;;  %v2403_v25 = vld [vmem:[#allocation5 + $0x568] sm:$0xff] }
 0x25e   : > { %v828_v34 = vpop.f32.mrb[14].mxu1  ;;  %4101 = vmatprep.subr.bf16.mxu1 %v6473_v0  ;;  %4062 = vmatprep.subr.bf16.mxu0 %v6473_v0 }
 0x25f   : > { %v5692_v63 = vpop.eup %4563  ;;  %v829_v44 = vadd.f32 %v5650_v37, %v828_v34  ;;  %v830_v39 = vpop.f32.mrb[15].mxu1  ;;  %2081 = vmatmul.mubr.f32.gmra.mrb[152].mxu0 %v5696_v45  ;;  %v1724_v34 = vld [vmem:[#allocation5 + $0x468] sm:$0xff] }
 0x260   : > { %6527 = vst [vmem:[#allocation14_spill] sm:$0xff] %v5692_v63  ;;  %3714 = vmatprep.mubr.f32.mxu1 %v5692_v63  ;;  %2085 = vmatprep.mubr.f32.mxu0 %v5562_v3  ;;  %v5717_v63 = vld [vmem:[%s5102_s21 + $0xf0] sm:$0xff] }
 0x261   : > { %4569 = vtanh.f32 %v829_v44  ;;  %4103 = vmatpush1.bf16.msra.mxu1 %v4102_v55  ;;  %v4108_v55 = vpack.c.bf16 %v2401_v49, %v2400_v41  ;;  %v4063_v44 = vpack.c.bf16 %v1724_v34, %v1723_v59  ;;  %6532 = vst [vmem:[#allocation19_spill] sm:$0xff] %v5717_v63  ;;  %v2404_v49 = vld [vmem:[#allocation5 + $0x570] sm:$0xff] }
 0x262   : > { %v833_v10 = vpop.f32.mrb[16].mxu1  ;;  %4104 = vmatprep.subr.bf16.mxu1 %v6473_v0 }
 0x263   : > { %v5703_v52 = vpop.eup %4565  ;;  %v834_v13 = vadd.f32 %v5650_v37, %v833_v10  ;;  %v835_v31 = vpop.f32.mrb[17].mxu1  ;;  %2086 = vmatmul.mubr.f32.gmra.mrb[154].mxu0 %v5707_v56 }
 0x264   : > { %6529 = vst [vmem:[#allocation16_spill] sm:$0xff] %v5703_v52  ;;  %3715 = vmatmul.mubr.f32.gmra.mrb[68].mxu1 %v5703_v52  ;;  %2090 = vmatprep.mubr.f32.mxu0 %v5568_v5 }
 0x265   : > { %4571 = vtanh.f32 %v834_v13  ;;  %4106 = vmatpush1.bf16.msra.mxu1 %v4105_v24  ;;  %v4111_v24 = vpack.c.bf16 %v2403_v25, %v2402_v17  ;;  %4064 = vmatpush1.bf16.msra.mxu0 %v4063_v44  ;;  %v2405_v13 = vld [vmem:[#allocation5 + $0x578] sm:$0xff]  ;;  %v1725_v17 = vld [vmem:[#allocation5 + $0x470] sm:$0xff] }
 0x266   : > { %v838_v48 = vpop.f32.mrb[18].mxu1  ;;  %4107 = vmatprep.subr.bf16.mxu1 %v6473_v0  ;;  %4065 = vmatprep.subr.bf16.mxu0 %v6473_v0  ;;  %v1726_v25 = vld [vmem:[#allocation5 + $0x478] sm:$0xff] }
 0x267   : > { %v5713_v39 = vpop.eup %4567  ;;  %v839_v10 = vadd.f32 %v5650_v37, %v838_v48  ;;  %v840_v31 = vpop.f32.mrb[19].mxu1  ;;  %2091 = vmatmul.mubr.f32.gmra.mrb[156].mxu0 %v5717_v63  ;;  %v4066_v52 = vpack.c.bf16 %v1726_v25, %v1725_v17 }
 0x268   : > { %6531 = vst [vmem:[#allocation18_spill] sm:$0xff] %v5713_v39  ;;  %3717 = vmatprep.mubr.f32.mxu1 %v5713_v39  ;;  %2095 = vmatprep.mubr.f32.mxu0 %v5574_v6  ;;  %v5728_v31 = vld [vmem:[%s5102_s21 + $0xf8] sm:$0xff]  ;;  %v2407_v39 = vld [vmem:[#allocation5 + $0x588] sm:$0xff] }
 0x269   : > { %4573 = vtanh.f32 %v839_v10  ;;  %4109 = vmatpush1.bf16.msra.mxu1 %v4108_v55  ;;  %6534 = vst [vmem:[#allocation21_spill] sm:$0xff] %v5728_v31  ;;  %v4114_v55 = vpack.c.bf16 %v2405_v13, %v2404_v49  ;;  %v2406_v10 = vld [vmem:[#allocation5 + $0x580] sm:$0xff]  ;;  %4067 = vmatpush1.bf16.msra.mxu0 %v4066_v52  ;;  %v2408_v13 = vld [vmem:[#allocation5 + $0x590] sm:$0xff] }
 0x26a   : > { %v843_v41 = vpop.f32.mrb[20].mxu1  ;;  %4110 = vmatprep.subr.bf16.mxu1 %v6473_v0  ;;  %4068 = vmatprep.subr.bf16.mxu0 %v6473_v0 }
 0x26b   : > { %v5724_v59 = vpop.eup %4569  ;;  %v844_v34 = vadd.f32 %v5650_v37, %v843_v41  ;;  %v845_v48 = vpop.f32.mrb[21].mxu1  ;;  %2096 = vmatmul.mubr.f32.gmra.mrb[158].mxu0 %v5728_v31 }
 0x26c   : > { %6533 = vst [vmem:[#allocation20_spill] sm:$0xff] %v5724_v59  ;;  %3718 = vmatmul.mubr.f32.gmra.mrb[70].mxu1 %v5724_v59 }
 0x26d   : > { %4575 = vtanh.f32 %v844_v34  ;;  %4112 = vmatpush1.bf16.msra.mxu1 %v4111_v24  ;;  %v4117_v24 = vpack.c.bf16 %v2407_v39, %v2406_v10  ;;  %v2409_v34 = vld [vmem:[#allocation5 + $0x598] sm:$0xff]  ;;  %v2410_v10 = vld [vmem:[#allocation5 + $0x5a0] sm:$0xff] }
 0x26e   : > { %v848_v44 = vpop.f32.mrb[22].mxu1  ;;  %4113 = vmatprep.subr.bf16.mxu1 %v6473_v0  ;;  %v4120_v52 = vpack.c.bf16 %v2409_v34, %v2408_v13  ;;  %v2412_v13 = vld [vmem:[#allocation5 + $0x5b0] sm:$0xff]  ;;  %v2413_v34 = vld [vmem:[#allocation5 + $0x5b8] sm:$0xff] }
 0x26f   : > { %v5733_v6 = vpop.eup %4571  ;;  %v849_v41 = vadd.f32 %v5650_v37, %v848_v44  ;;  %v850_v48 = vpop.f32.mrb[23].mxu1  ;;  %v1727_v44 = vld [vmem:[#allocation5 + $0x480] sm:$0xff] }
 0x270   : > { %6535 = vst [vmem:[#allocation22_spill] sm:$0xff] %v5733_v6  ;;  %3720 = vmatprep.mubr.f32.mxu1 %v5733_v6 }
 0x271   : > { %4577 = vtanh.f32 %v849_v41  ;;  %4115 = vmatpush1.bf16.msra.mxu1 %v4114_v55  ;;  %v1728_v55 = vld [vmem:[#allocation5 + $0x488] sm:$0xff] }
 0x272   : > { %v853_v49 = vpop.f32.mrb[24].mxu1  ;;  %4116 = vmatprep.subr.bf16.mxu1 %v6473_v0  ;;  %v2411_v41 = vld [vmem:[#allocation5 + $0x5a8] sm:$0xff]  ;;  %v4069_v48 = vpack.c.bf16 %v1728_v55, %v1727_v44 }
 0x273   : > { %v5739_v59 = vpop.eup %4573  ;;  %v854_v17 = vadd.f32 %v5650_v37, %v853_v49  ;;  %v855_v25 = vpop.f32.mrb[25].mxu1 }
 0x274   : > { %6536 = vst [vmem:[#allocation23_spill] sm:$0xff] %v5739_v59  ;;  %3721 = vmatmul.mubr.f32.gmra.mrb[72].mxu1 %v5739_v59  ;;  %4070 = vmatpush1.bf16.msra.mxu0 %v4069_v48 }
 0x275   : > { %4579 = vtanh.f32 %v854_v17  ;;  %4118 = vmatpush1.bf16.msra.mxu1 %v4117_v24  ;;  %v4123_v24 = vpack.c.bf16 %v2411_v41, %v2410_v10  ;;  %4071 = vmatprep.subr.bf16.mxu0 %v6473_v0  ;;  %v2415_v10 = vld [vmem:[#allocation5 + $0x5c8] sm:$0xff] }
 0x276   : > { %v858_v39 = vpop.f32.mrb[26].mxu1  ;;  %4119 = vmatprep.subr.bf16.mxu1 %v6473_v0 }
 0x277   : > { %v5744_v6 = vpop.eup %4575  ;;  %v859_v31 = vadd.f32 %v5650_v37, %v858_v39  ;;  %v860_v63 = vpop.f32.mrb[27].mxu1  ;;  %v2414_v39 = vld [vmem:[#allocation5 + $0x5c0] sm:$0xff] }
 0x278   : > { %6537 = vst [vmem:[#allocation24_spill] sm:$0xff] %v5744_v6  ;;  %3723 = vmatprep.mubr.f32.mxu1 %v5744_v6  ;;  %v4126_v63 = vpack.c.bf16 %v2413_v34, %v2412_v13  ;;  %v2416_v13 = vld [vmem:[#allocation5 + $0x5d0] sm:$0xff]  ;;  %v2417_v34 = vld [vmem:[#allocation5 + $0x5d8] sm:$0xff] }
 0x279   : > { %4581 = vtanh.f32 %v859_v31  ;;  %4121 = vmatpush1.bf16.msra.mxu1 %v4120_v52  ;;  %v1729_v31 = vld [vmem:[#allocation5 + $0x490] sm:$0xff]  ;;  %v1730_v52 = vld [vmem:[#allocation5 + $0x498] sm:$0xff] }
 0x27a   : > { %v863_v49 = vpop.f32.mrb[28].mxu1  ;;  %4122 = vmatprep.subr.bf16.mxu1 %v6473_v0  ;;  %v4072_v41 = vpack.c.bf16 %v1730_v52, %v1729_v31 }
 0x27b   : > { %v5750_v17 = vpop.eup %4577  ;;  %v864_v25 = vadd.f32 %v5650_v37, %v863_v49  ;;  %v865_v44 = vpop.f32.mrb[29].mxu1 }
 0x27c   : > { %6538 = vst [vmem:[#allocation25_spill] sm:$0xff] %v5750_v17  ;;  %3724 = vmatmul.mubr.f32.gmra.mrb[74].mxu1 %v5750_v17  ;;  %4073 = vmatpush1.bf16.msra.mxu0 %v4072_v41 }
 0x27d   : > { %4583 = vtanh.f32 %v864_v25  ;;  %4124 = vmatpush1.bf16.msra.mxu1 %v4123_v24  ;;  %v4129_v24 = vpack.c.bf16 %v2415_v10, %v2414_v39  ;;  %4074 = vmatprep.subr.bf16.mxu0 %v6473_v0  ;;  %v2419_v39 = vld [vmem:[#allocation5 + $0x5e8] sm:$0xff] }
 0x27e   : > { %v868_v55 = vpop.f32.mrb[30].mxu1  ;;  %4125 = vmatprep.subr.bf16.mxu1 %v6473_v0 }
 0x27f   : > { %v5755_v48 = vpop.eup %4579  ;;  %v869_v6 = vadd.f32 %v5650_v37, %v868_v55  ;;  %v870_v59 = vpop.f32.mrb[31].mxu1  ;;  %v2418_v55 = vld [vmem:[#allocation5 + $0x5e0] sm:$0xff] }
 0x280   : > { %6539 = vst [vmem:[#allocation26_spill] sm:$0xff] %v5755_v48  ;;  %3726 = vmatprep.mubr.f32.mxu1 %v5755_v48  ;;  %v4132_v59 = vpack.c.bf16 %v2417_v34, %v2416_v13 }
 0x281   : > { %4585 = vtanh.f32 %v869_v6  ;;  %4127 = vmatpush1.bf16.msra.mxu1 %v4126_v63  ;;  %v1731_v6 = vld [vmem:[#allocation5 + $0x4a0] sm:$0xff]  ;;  %v1732_v63 = vld [vmem:[#allocation5 + $0x4a8] sm:$0xff] }
 0x282   : > { %v873_v49 = vpop.f32.mrb[32].mxu1  ;;  %4128 = vmatprep.subr.bf16.mxu1 %v6473_v0  ;;  %v4075_v10 = vpack.c.bf16 %v1732_v63, %v1731_v6 }
 0x283   : > { %v5761_v25 = vpop.eup %4581  ;;  %v874_v44 = vadd.f32 %v5650_v37, %v873_v49  ;;  %v875_v31 = vpop.f32.mrb[33].mxu1 }
 0x284   : > { %6540 = vst [vmem:[#allocation27_spill] sm:$0xff] %v5761_v25  ;;  %3727 = vmatmul.mubr.f32.gmra.mrb[76].mxu1 %v5761_v25  ;;  %4076 = vmatpush1.bf16.msra.mxu0 %v4075_v10  ;;  %v5770_v49 = vpop.f32.mrb[32].mxu0  ;;  %v2421_v31 = vld [vmem:[#allocation5 + $0x5f8] sm:$0xff] }
 0x285   : > { %4587 = vtanh.f32 %v874_v44  ;;  %4130 = vmatpush1.bf16.msra.mxu1 %v4129_v24  ;;  %v4135_v24 = vpack.c.bf16 %v2419_v39, %v2418_v55  ;;  %v1233_v13 = vpop.f32.mrb[33].mxu0  ;;  %4077 = vmatprep.subr.bf16.mxu0 %v6473_v0  ;;  %v2420_v44 = vld [vmem:[#allocation5 + $0x5f0] sm:$0xff]  ;;  %v1734_v39 = vld [vmem:[#allocation5 + $0x4b8] sm:$0xff] }
 0x286   : > { %v878_v52 = vpop.f32.mrb[34].mxu1  ;;  %4131 = vmatprep.subr.bf16.mxu1 %v6473_v0  ;;  %v1733_v55 = vld [vmem:[#allocation5 + $0x4b0] sm:$0xff] }
 0x287   : > { %v5766_v41 = vpop.eup %4583  ;;  %v879_v48 = vadd.f32 %v5650_v37, %v878_v52  ;;  %v880_v17 = vpop.f32.mrb[35].mxu1  ;;  %v4078_v13 = vpack.c.bf16 %v1734_v39, %v1733_v55 }
 0x288   : > { %6541 = vst [vmem:[#allocation28_spill] sm:$0xff] %v5766_v41  ;;  %3729 = vmatprep.mubr.f32.mxu1 %v5766_v41  ;;  %v5778_v52 = vpop.f32.mrb[34].mxu0 }
 0x289   : > { %4589 = vtanh.f32 %v879_v48  ;;  %4133 = vmatpush1.bf16.msra.mxu1 %v4132_v59  ;;  %v4138_v48 = vpack.c.bf16 %v2421_v31, %v2420_v44  ;;  %v1238_v59 = vpop.f32.mrb[35].mxu0  ;;  %4079 = vmatpush1.bf16.msra.mxu0 %v4078_v13 }
 0x28a   : > { %v883_v34 = vpop.f32.mrb[36].mxu1  ;;  %4134 = vmatprep.subr.bf16.mxu1 %v6473_v0  ;;  %4080 = vmatprep.subr.bf16.mxu0 %v6473_v0 }
 0x28b   : > { %v5774_v6 = vpop.eup %4585  ;;  %v884_v17 = vadd.f32 %v5650_v37, %v883_v34  ;;  %v885_v63 = vpop.f32.mrb[37].mxu1 }
 0x28c   : > { %6542 = vst [vmem:[#allocation29_spill] sm:$0xff] %v5774_v6  ;;  %3730 = vmatmul.mubr.f32.gmra.mrb[78].mxu1 %v5774_v6  ;;  %v5785_v63 = vpop.f32.mrb[36].mxu0 }
 0x28d   : > { %4591 = vtanh.f32 %v884_v17  ;;  %4136 = vmatpush1.bf16.msra.mxu1 %v4135_v24  ;;  %v1243_v24 = vpop.f32.mrb[37].mxu0 }
 0x28e   : > { %v888_v10 = vpop.f32.mrb[38].mxu1  ;;  %4137 = vmatprep.subr.bf16.mxu1 %v6473_v0  ;;  %v5793_v55 = vpop.f32.mrb[38].mxu0 }
 0x28f   : > { %v5781_v41 = vpop.eup %4587  ;;  %v889_v25 = vadd.f32 %v5650_v37, %v888_v10  ;;  %v890_v34 = vpop.f32.mrb[39].mxu1  ;;  %v1735_v10 = vld [vmem:[#allocation5 + $0x4c0] sm:$0xff] }
 0x290   : > { %6543 = vst [vmem:[#allocation30_spill] sm:$0xff] %v5781_v41  ;;  %3732 = vmatprep.mubr.f32.mxu1 %v5781_v41  ;;  %v1248_v39 = vpop.f32.mrb[39].mxu0 }
 0x291   : > { %4593 = vtanh.f32 %v889_v25  ;;  %4139 = vmatpush1.bf16.msra.mxu1 %v4138_v48  ;;  %v1736_v25 = vld [vmem:[#allocation5 + $0x4c8] sm:$0xff] }
 0x292   : > { %v893_v44 = vpop.f32.mrb[40].mxu1  ;;  %4140 = vmatprep.subr.bf16.mxu1 %v6473_v0  ;;  %v4081_v13 = vpack.c.bf16 %v1736_v25, %v1735_v10 }
 0x293   : > { %v5789_v31 = vpop.eup %4589  ;;  %v894_v17 = vadd.f32 %v5650_v37, %v893_v44  ;;  %v895_v59 = vpop.f32.mrb[41].mxu1 }
 0x294   : > { %6544 = vst [vmem:[#allocation31_spill] sm:$0xff] %v5789_v31  ;;  %3733 = vmatmul.mubr.f32.gmra.mrb[80].mxu1 %v5789_v31  ;;  %4082 = vmatpush1.bf16.msra.mxu0 %v4081_v13  ;;  %v5799_v44 = vpop.f32.mrb[40].mxu0  ;;  %v6546_v31 = vmov 0.0|0.0   ;;  %v1738_v13 = vld [vmem:[#allocation5 + $0x4d8] sm:$0xff] }
 0x295   : > { %4595 = vtanh.f32 %v894_v17  ;;  %v1253_v59 = vpop.f32.mrb[41].mxu0  ;;  %4083 = vmatprep.subr.bf16.mxu0 %v6546_v31 }
 0x296   : > { %v898_v48 = vpop.f32.mrb[42].mxu1  ;;  %v5806_v25 = vpop.f32.mrb[42].mxu0 }
 0x297   : > { %v5795_v34 = vpop.eup %4591  ;;  %v899_v24 = vadd.f32 %v5650_v37, %v898_v48  ;;  %v900_v0 = vpop.f32.mrb[43].mxu1  ;;  %v1737_v48 = vld [vmem:[#allocation5 + $0x4d0] sm:$0xff] }
 0x298   : > { %6545 = vst [vmem:[#allocation32_spill] sm:$0xff] %v5795_v34  ;;  %3735 = vmatprep.mubr.f32.mxu1 %v5795_v34  ;;  %v1258_v0 = vpop.f32.mrb[43].mxu0  ;;  %v4084_v6 = vpack.c.bf16 %v1738_v13, %v1737_v48 }
 0x299   : > { %4597 = vtanh.f32 %v899_v24 }
 0x29a   : > { %v903_v17 = vpop.f32.mrb[44].mxu1  ;;  %4085 = vmatpush1.bf16.msra.mxu0 %v4084_v6 }
 0x29b   : > { %v5802_v39 = vpop.eup %4593  ;;  %v904_v41 = vadd.f32 %v5650_v37, %v903_v17  ;;  %v905_v10 = vpop.f32.mrb[45].mxu1  ;;  %4086 = vmatprep.subr.bf16.mxu0 %v6546_v31 }
 0x29c   : > { %6547 = vst [vmem:[#allocation33_spill] sm:$0xff] %v5802_v39  ;;  %3736 = vmatmul.mubr.f32.gmra.mrb[82].mxu1 %v5802_v39  ;;  %v5812_v17 = vpop.f32.mrb[44].mxu0 }
 0x29d   : > { %4599 = vtanh.f32 %v904_v41  ;;  %v1263_v10 = vpop.f32.mrb[45].mxu0 }
 0x29e   : > { %v908_v34 = vpop.f32.mrb[46].mxu1  ;;  %v5819_v13 = vpop.f32.mrb[46].mxu0 }
 0x29f   : > { %v5808_v24 = vpop.eup %4595  ;;  %v909_v59 = vadd.f32 %v5650_v37, %v908_v34  ;;  %v910_v5 = vpop.f32.mrb[47].mxu1 }
 0x2a0   : > { %6548 = vst [vmem:[#allocation34_spill] sm:$0xff] %v5808_v24  ;;  %3738 = vmatprep.mubr.f32.mxu1 %v5808_v24  ;;  %v1268_v5 = vpop.f32.mrb[47].mxu0 }
 0x2a1   : > { %4601 = vtanh.f32 %v909_v59  ;;  %v5825_v24 = vpop.f32.mrb[48].mxu0 }
 0x2a2   : > { %v913_v41 = vpop.f32.mrb[48].mxu1  ;;  %6551 = vst [vmem:[#allocation37_spill] sm:$0xff] %v5825_v24  ;;  %v1273_v15 = vpop.f32.mrb[49].mxu0 }
 0x2a3   : > { %v5815_v0 = vpop.eup %4597  ;;  %v914_v39 = vadd.f32 %v5650_v37, %v913_v41  ;;  %v915_v48 = vpop.f32.mrb[49].mxu1  ;;  %v1739_v41 = vld [vmem:[#allocation5 + $0x4e0] sm:$0xff] }
 0x2a4   : > { %6549 = vst [vmem:[#allocation35_spill] sm:$0xff] %v5815_v0  ;;  %3739 = vmatmul.mubr.f32.gmra.mrb[84].mxu1 %v5815_v0  ;;  %v1740_v48 = vld [vmem:[#allocation5 + $0x4e8] sm:$0xff]  ;;  %v5831_v45 = vpop.f32.mrb[50].mxu0 }
 0x2a5   : > { %4603 = vtanh.f32 %v914_v39  ;;  %v4087_v3 = vpack.c.bf16 %v1740_v48, %v1739_v41  ;;  %6553 = vst [vmem:[#allocation39_spill] sm:$0xff] %v5831_v45  ;;  %v1742_v41 = vld [vmem:[#allocation5 + $0x4f8] sm:$0xff] }
 0x2a6   : > { %v918_v34 = vpop.f32.mrb[50].mxu1 }
 0x2a7   : > { %v5821_v6 = vpop.eup %4599  ;;  %v919_v59 = vadd.f32 %v5650_v37, %v918_v34  ;;  %v920_v10 = vpop.f32.mrb[51].mxu1  ;;  %4088 = vmatpush1.bf16.msra.mxu0 %v4087_v3 }
 0x2a8   : > { %6550 = vst [vmem:[#allocation36_spill] sm:$0xff] %v5821_v6  ;;  %3741 = vmatprep.mubr.f32.mxu1 %v5821_v6  ;;  %v1278_v34 = vpop.f32.mrb[51].mxu0  ;;  %4089 = vmatprep.subr.bf16.mxu0 %v6546_v31 }
 0x2a9   : > { %4605 = vtanh.f32 %v919_v59  ;;  %v5838_v48 = vpop.f32.mrb[52].mxu0 }
 0x2aa   : > { %v923_v56 = vpop.f32.mrb[52].mxu1  ;;  %6555 = vst [vmem:[#allocation41_spill] sm:$0xff] %v5838_v48 }
 0x2ab   : > { %v5827_v0 = vpop.eup %4601  ;;  %v924_v39 = vadd.f32 %v5650_v37, %v923_v56  ;;  %v925_v5 = vpop.f32.mrb[53].mxu1  ;;  %v1741_v56 = vld [vmem:[#allocation5 + $0x4f0] sm:$0xff] }
 0x2ac   : > { %6552 = vst [vmem:[#allocation38_spill] sm:$0xff] %v5827_v0  ;;  %3742 = vmatmul.mubr.f32.gmra.mrb[86].mxu1 %v5827_v0  ;;  %v4090_v0 = vpack.c.bf16 %v1742_v41, %v1741_v56 }
 0x2ad   : > { %4607 = vtanh.f32 %v924_v39  ;;  %v1283_v39 = vpop.f32.mrb[53].mxu0 }
 0x2ae   : > { %v928_v59 = vpop.f32.mrb[54].mxu1  ;;  %4091 = vmatpush1.bf16.msra.mxu0 %v4090_v0 }
 0x2af   : > { %v5834_v10 = vpop.eup %4603  ;;  %v929_v15 = vadd.f32 %v5650_v37, %v928_v59  ;;  %v930_v6 = vpop.f32.mrb[55].mxu1 }
 0x2b0   : > { %6554 = vst [vmem:[#allocation40_spill] sm:$0xff] %v5834_v10  ;;  %3744 = vmatprep.mubr.f32.mxu1 %v5834_v10  ;;  %v5844_v59 = vpop.f32.mrb[54].mxu0 }
 0x2b1   : > { %4609 = vtanh.f32 %v929_v15  ;;  %v1288_v6 = vpop.f32.mrb[55].mxu0 }
 0x2b2   : > { %v933_v5 = vpop.f32.mrb[56].mxu1  ;;  %v5850_v56 = vpop.f32.mrb[56].mxu0 }
 0x2b3   : > { %v5840_v3 = vpop.eup %4605  ;;  %v934_v34 = vadd.f32 %v5650_v37, %v933_v5  ;;  %v935_v24 = vpop.f32.mrb[57].mxu1 }
 0x2b4   : > { %6556 = vst [vmem:[#allocation42_spill] sm:$0xff] %v5840_v3  ;;  %3745 = vmatmul.mubr.f32.gmra.mrb[88].mxu1 %v5840_v3  ;;  %v1293_v24 = vpop.f32.mrb[57].mxu0 }
 0x2b5   : > { %4611 = vtanh.f32 %v934_v34  ;;  %v5856_v34 = vpop.f32.mrb[58].mxu0 }
 0x2b6   : > { %v938_v15 = vpop.f32.mrb[58].mxu1  ;;  %v1298_v6 = vpop.f32.mrb[59].mxu0 }
 0x2b7   : > { %v5846_v10 = vpop.eup %4607  ;;  %v939_v48 = vadd.f32 %v5650_v37, %v938_v15  ;;  %v940_v45 = vpop.f32.mrb[59].mxu1 }
 0x2b8   : > { %6557 = vst [vmem:[#allocation43_spill] sm:$0xff] %v5846_v10  ;;  %3747 = vmatprep.mubr.f32.mxu1 %v5846_v10  ;;  %v5862_v24 = vpop.f32.mrb[60].mxu0 }
 0x2b9   : > { %4613 = vtanh.f32 %v939_v48  ;;  %6560 = vst [vmem:[#allocation46_spill] sm:$0xff] %v5862_v24  ;;  %v1303_v3 = vpop.f32.mrb[61].mxu0  ;;  %v2425_v24 = vld [vmem:[#allocation5 + $0x618] sm:$0xff] }
 0x2ba   : > { %v943_v41 = vpop.f32.mrb[60].mxu1 }
 0x2bb   : > { %v5852_v5 = vpop.eup %4609  ;;  %v944_v0 = vadd.f32 %v5650_v37, %v943_v41  ;;  %v945_v39 = vpop.f32.mrb[61].mxu1 }
 0x2bc   : > { %6558 = vst [vmem:[#allocation44_spill] sm:$0xff] %v5852_v5  ;;  %3748 = vmatmul.mubr.f32.gmra.mrb[90].mxu1 %v5852_v5  ;;  %v5867_v39 = vpop.f32.mrb[62].mxu0 }
 0x2bd   : > { %4615 = vtanh.f32 %v944_v0  ;;  %6562 = vst [vmem:[#allocation48_spill] sm:$0xff] %v5867_v39  ;;  %v1308_v0 = vpop.f32.mrb[63].mxu0 }
 0x2be   : > { %v948_v15 = vpop.f32.mrb[62].mxu1  ;;  %v5872_v5 = vpop.f32.mrb[64].mxu0  ;;  %v2424_v0 = vld [vmem:[#allocation5 + $0x610] sm:$0xff] }
 0x2bf   : > { %v5858_v45 = vpop.eup %4611  ;;  %v949_v48 = vadd.f32 %v5650_v37, %v948_v15  ;;  %v950_v10 = vpop.f32.mrb[63].mxu1  ;;  %6564 = vst [vmem:[#allocation50_spill] sm:$0xff] %v5872_v5  ;;  %v2422_v37 = vld [vmem:[#allocation5 + $0x600] sm:$0xff] }
 0x2c0   : > { %6559 = vst [vmem:[#allocation45_spill] sm:$0xff] %v5858_v45  ;;  %3750 = vmatprep.mubr.f32.mxu1 %v5858_v45  ;;  %v2423_v10 = vld [vmem:[#allocation5 + $0x608] sm:$0xff]  ;;  %v1313_v15 = vpop.f32.mrb[65].mxu0 }
 0x2c1   : > { %4617 = vtanh.f32 %v949_v48  ;;  %v5877_v3 = vpop.f32.mrb[66].mxu0  ;;  %v2426_v15 = vld [vmem:[#allocation5 + $0x620] sm:$0xff] }
 0x2c2   : > { %v1318_v45 = vpop.f32.mrb[67].mxu0 }
 0x2c3   : > { %v5864_v41 = vpop.eup %4613  ;;  %v5882_v5 = vpop.f32.mrb[68].mxu0 }
 0x2c4   : > { %6561 = vst [vmem:[#allocation47_spill] sm:$0xff] %v5864_v41  ;;  %3751 = vmatmul.mubr.f32.gmra.mrb[92].mxu1 %v5864_v41  ;;  %v4141_v41 = vpack.c.bf16 %v2423_v10, %v2422_v37  ;;  %v1323_v39 = vpop.f32.mrb[69].mxu0  ;;  %v2431_v37 = vld [vmem:[#allocation5 + $0x648] sm:$0xff] }
 0x2c7   : > { %v5869_v6 = vpop.eup %4615 }
 0x2c8   : > { %6563 = vst [vmem:[#allocation49_spill] sm:$0xff] %v5869_v6  ;;  %3753 = vmatprep.mubr.f32.mxu1 %v5869_v6  ;;  %v4144_v6 = vpack.c.bf16 %v2425_v24, %v2424_v0  ;;  %v2429_v24 = vld [vmem:[#allocation5 + $0x638] sm:$0xff] }
 0x2cb   : > { %v5874_v48 = vpop.eup %4617 }
 0x2cc   : > { %6565 = vst [vmem:[#allocation51_spill] sm:$0xff] %v5874_v48  ;;  %3754 = vmatmul.mubr.f32.gmra.mrb[94].mxu1 %v5874_v48  ;;  %v2427_v48 = vld [vmem:[#allocation5 + $0x628] sm:$0xff] }
 0x2cd   : > { %2699 = vmatprep.mubr.f32.mxu1 %v5280_v32  ;;  %v5886_v32 = vpop.f32.mrb[70].mxu0  ;;  %v4147_v45 = vpack.c.bf16 %v2427_v48, %v2426_v15  ;;  %v2433_v48 = vld [vmem:[#allocation5 + $0x658] sm:$0xff] }
 0x2d0   : > { %2700 = vmatmul.mubr.f32.vlgmr.msra.gmra.mrb[96].mxu1 %v5584_v7  ;;  %v1328_v7 = vpop.f32.mrb[71].mxu0 }
 0x2d1   : > { %2704 = vmatprep.mubr.f32.mxu1 %v5284_v40  ;;  %4142 = vmatpush1.bf16.msra.mxu1 %v4141_v41  ;;  %v2428_v40 = vld [vmem:[#allocation5 + $0x630] sm:$0xff]  ;;  %v5892_v39 = vpop.f32.mrb[72].mxu0 }
 0x2d2   : > { %4143 = vmatprep.subr.bf16.mxu1 %v6546_v31  ;;  %v4150_v41 = vpack.c.bf16 %v2429_v24, %v2428_v40  ;;  %v2437_v24 = vld [vmem:[#allocation5 + $0x678] sm:$0xff] }
 0x2d4   : > { %2705 = vmatmul.mubr.f32.gmra.mrb[98].mxu1 %v5589_v9  ;;  %v2430_v9 = vld [vmem:[#allocation5 + $0x640] sm:$0xff] }
 0x2d5   : > { %2709 = vmatprep.mubr.f32.mxu1 %v5292_v50  ;;  %4145 = vmatpush1.bf16.msra.mxu1 %v4144_v6  ;;  %v1333_v50 = vpop.f32.mrb[73].mxu0  ;;  %v4153_v10 = vpack.c.bf16 %v2431_v37, %v2430_v9 }
 0x2d6   : > { %4146 = vmatprep.subr.bf16.mxu1 %v6546_v31  ;;  %v5896_v6 = vpop.f32.mrb[74].mxu0 }
 0x2d8   : > { %2710 = vmatmul.mubr.f32.gmra.mrb[100].mxu1 %v5594_v11  ;;  %v1338_v11 = vpop.f32.mrb[75].mxu0 }
 0x2d9   : > { %2714 = vmatprep.mubr.f32.mxu1 %v5304_v20  ;;  %4148 = vmatpush1.bf16.msra.mxu1 %v4147_v45  ;;  %v2432_v20 = vld [vmem:[#allocation5 + $0x650] sm:$0xff]  ;;  %v5902_v15 = vpop.f32.mrb[76].mxu0  ;;  %v2435_v45 = vld [vmem:[#allocation5 + $0x668] sm:$0xff]  ;;  %v2441_v11 = vld [vmem:[#allocation5 + $0x698] sm:$0xff] }
 0x2da   : > { %4149 = vmatprep.subr.bf16.mxu1 %v6546_v31  ;;  %v4156_v0 = vpack.c.bf16 %v2433_v48, %v2432_v20  ;;  %v4772_v20 = vld [vmem:[%s5102_s21 + $0x40] sm:$0xff] }
 0x2dc   : > { %2715 = vmatmul.mubr.f32.gmra.mrb[102].mxu1 %v5599_v12  ;;  %v2434_v12 = vld [vmem:[#allocation5 + $0x660] sm:$0xff] }
 0x2dd   : > { %2719 = vmatprep.mubr.f32.mxu1 %v5314_v23  ;;  %4151 = vmatpush1.bf16.msra.mxu1 %v4150_v41  ;;  %v1343_v23 = vpop.f32.mrb[77].mxu0  ;;  %v4159_v40 = vpack.c.bf16 %v2435_v45, %v2434_v12  ;;  %v4773_v45 = vld [vmem:[%s5102_s21 + $0x48] sm:$0xff] }
 0x2de   : > { %4152 = vmatprep.subr.bf16.mxu1 %v6546_v31  ;;  %v5906_v7 = vpop.f32.mrb[78].mxu0 }
 0x2e0   : > { %2720 = vmatmul.mubr.f32.gmra.mrb[104].mxu1 %v5604_v43  ;;  %v1348_v43 = vpop.f32.mrb[79].mxu0 }
 0x2e1   : > { %2724 = vmatprep.mubr.f32.mxu1 %v5328_v38  ;;  %4154 = vmatpush1.bf16.msra.mxu1 %v4153_v10  ;;  %v2436_v38 = vld [vmem:[#allocation5 + $0x670] sm:$0xff]  ;;  %v5912_v9 = vpop.f32.mrb[80].mxu0 }
 0x2e2   : > { %4155 = vmatprep.subr.bf16.mxu1 %v6546_v31  ;;  %v4162_v41 = vpack.c.bf16 %v2437_v24, %v2436_v38  ;;  %v1353_v37 = vpop.f32.mrb[81].mxu0  ;;  %v2440_v10 = vld [vmem:[#allocation5 + $0x690] sm:$0xff]  ;;  %v2445_v38 = vld [vmem:[#allocation5 + $0x6b8] sm:$0xff] }
 0x2e3   : > { %v5916_v50 = vpop.f32.mrb[82].mxu0  ;;  %v4168_v48 = vpack.c.bf16 %v2441_v11, %v2440_v10  ;;  %v2444_v43 = vld [vmem:[#allocation5 + $0x6b0] sm:$0xff] }
 0x2e4   : > { %2725 = vmatmul.mubr.f32.gmra.mrb[106].mxu1 %v5609_v14  ;;  %v2438_v14 = vld [vmem:[#allocation5 + $0x680] sm:$0xff]  ;;  %v4774_v24 = vld [vmem:[%s5102_s21 + $0x50] sm:$0xff] }
 0x2e5   : > { %2729 = vmatprep.mubr.f32.mxu1 %v5339_v60  ;;  %4157 = vmatpush1.bf16.msra.mxu1 %v4156_v0  ;;  %v2439_v60 = vld [vmem:[#allocation5 + $0x688] sm:$0xff]  ;;  %v2448_v11 = vld [vmem:[#allocation5 + $0x6d0] sm:$0xff] }
 0x2e6   : > { %4158 = vmatprep.subr.bf16.mxu1 %v6546_v31  ;;  %v2443_v0 = vld [vmem:[#allocation5 + $0x6a8] sm:$0xff] }
 0x2e8   : > { %2730 = vmatmul.mubr.f32.gmra.mrb[108].mxu1 %v5614_v26  ;;  %v4165_v26 = vpack.c.bf16 %v2439_v60, %v2438_v14  ;;  %v2447_v60 = vld [vmem:[#allocation5 + $0x6c8] sm:$0xff] }
 0x2e9   : > { %2734 = vmatprep.mubr.f32.mxu1 %v5356_v28  ;;  %4160 = vmatpush1.bf16.msra.mxu1 %v4159_v40  ;;  %v1358_v28 = vpop.f32.mrb[83].mxu0 }
 0x2ea   : > { %4161 = vmatprep.subr.bf16.mxu1 %v6546_v31 }
 0x2ec   : > { %2735 = vmatmul.mubr.f32.gmra.mrb[110].mxu1 %v5619_v8  ;;  %v5922_v8 = vpop.f32.mrb[84].mxu0 }
 0x2ed   : > { %2739 = vmatprep.mubr.f32.mxu1 %v5365_v35  ;;  %4163 = vmatpush1.bf16.msra.mxu1 %v4162_v41  ;;  %v2442_v35 = vld [vmem:[#allocation5 + $0x6a0] sm:$0xff]  ;;  %v1363_v12 = vpop.f32.mrb[85].mxu0  ;;  %v4174_v41 = vpack.c.bf16 %v2445_v38, %v2444_v43  ;;  %v2452_v38 = vld [vmem:[#allocation5 + $0x6f0] sm:$0xff] }
 0x2ee   : > { %4164 = vmatprep.subr.bf16.mxu1 %v6546_v31  ;;  %v5926_v23 = vpop.f32.mrb[86].mxu0  ;;  %v4171_v40 = vpack.c.bf16 %v2443_v0, %v2442_v35  ;;  %v2451_v12 = vld [vmem:[#allocation5 + $0x6e8] sm:$0xff] }
 0x2f0   : > { %2740 = vmatmul.mubr.f32.gmra.mrb[112].mxu1 %v4772_v20  ;;  %v2449_v20 = vld [vmem:[#allocation5 + $0x6d8] sm:$0xff] }
 0x2f1   : > { %2744 = vmatprep.mubr.f32.mxu1 %v5386_v22  ;;  %4166 = vmatpush1.bf16.msra.mxu1 %v4165_v26  ;;  %v1368_v22 = vpop.f32.mrb[87].mxu0  ;;  %v4775_v26 = vld [vmem:[%s5102_s21 + $0x58] sm:$0xff]  ;;  %v4180_v35 = vpack.c.bf16 %v2449_v20, %v2448_v11  ;;  %v4786_v11 = vld [vmem:[%s5102_s21 + $0xb0] sm:$0xff] }
 0x2f2   : > { %4167 = vmatprep.subr.bf16.mxu1 %v6546_v31  ;;  %v5932_v14 = vpop.f32.mrb[88].mxu0 }
 0x2f3   : > { %v1373_v37 = vpop.f32.mrb[89].mxu0 }
 0x2f4   : > { %2745 = vmatmul.mubr.f32.gmra.mrb[114].mxu1 %v4773_v45  ;;  %v5936_v28 = vpop.f32.mrb[90].mxu0  ;;  %v4781_v37 = vld [vmem:[%s5102_s21 + $0x88] sm:$0xff] }
 0x2f5   : > { %2749 = vmatprep.mubr.f32.mxu1 %v5395_v30  ;;  %4169 = vmatpush1.bf16.msra.mxu1 %v4168_v48  ;;  %v2446_v30 = vld [vmem:[#allocation5 + $0x6c0] sm:$0xff] }
 0x2f6   : > { %4170 = vmatprep.subr.bf16.mxu1 %v6546_v31  ;;  %v4177_v10 = vpack.c.bf16 %v2447_v60, %v2446_v30  ;;  %v4776_v48 = vld [vmem:[%s5102_s21 + $0x60] sm:$0xff] }
 0x2f7   : > { %v4780_v60 = vld [vmem:[%s5102_s21 + $0x80] sm:$0xff] }
 0x2f8   : > { %2750 = vmatmul.mubr.f32.gmra.mrb[116].mxu1 %v4774_v24  ;;  %v2453_v24 = vld [vmem:[#allocation5 + $0x6f8] sm:$0xff] }
 0x2f9   : > { %2754 = vmatprep.mubr.f32.mxu1 %v5416_v54  ;;  %4172 = vmatpush1.bf16.msra.mxu1 %v4171_v40  ;;  %v1378_v54 = vpop.f32.mrb[91].mxu0  ;;  %v4777_v40 = vld [vmem:[%s5102_s21 + $0x68] sm:$0xff]  ;;  %v4186_v30 = vpack.c.bf16 %v2453_v24, %v2452_v38 }
 0x2fa   : > { %4173 = vmatprep.subr.bf16.mxu1 %v6546_v31  ;;  %v5942_v0 = vpop.f32.mrb[92].mxu0 }
 0x2fb   : > { %v1383_v45 = vpop.f32.mrb[93].mxu0 }
 0x2fc   : > { %2755 = vmatmul.mubr.f32.gmra.mrb[118].mxu1 %v4775_v26  ;;  %v5946_v22 = vpop.f32.mrb[94].mxu0  ;;  %v5965_v26 = vld [vmem:[#allocation7 + $0x2] ss:$0 sm:$0xff] }
 0x2fd   : > { %2759 = vmatprep.mubr.f32.mxu1 %v5425_v16  ;;  %4175 = vmatpush1.bf16.msra.mxu1 %v4174_v41  ;;  %v2450_v16 = vld [vmem:[#allocation5 + $0x6e0] sm:$0xff]  ;;  %v1388_v43 = vpop.f32.mrb[95].mxu0  ;;  %v4778_v41 = vld [vmem:[%s5102_s21 + $0x70] sm:$0xff] }
 0x2fe   : > { %4176 = vmatprep.subr.bf16.mxu1 %v6546_v31  ;;  %v4790_v43 = vld [vmem:[%s5102_s21 + $0xd0] sm:$0xff] }
 0x300   : > { %2760 = vmatmul.mubr.f32.gmra.mrb[120].mxu1 %v4776_v48 }
 0x301   : > { %2764 = vmatprep.mubr.f32.mxu1 %v5446_v46  ;;  %4178 = vmatpush1.bf16.msra.mxu1 %v4177_v10  ;;  %v4183_v46 = vpack.c.bf16 %v2451_v12, %v2450_v16  ;;  %v4788_v16 = vld [vmem:[%s5102_s21 + $0xc0] sm:$0xff] }
 0x302   : > { %4179 = vmatprep.subr.bf16.mxu1 %v6546_v31 }
 0x304   : > { %2765 = vmatmul.mubr.f32.gmra.mrb[122].mxu1 %v4777_v40 }
 0x305   : > { %2769 = vmatprep.mubr.f32.mxu1 %v5452_v18  ;;  %4181 = vmatpush1.bf16.msra.mxu1 %v4180_v35  ;;  %v4779_v18 = vld [vmem:[%s5102_s21 + $0x78] sm:$0xff] }
 0x306   : > { %4182 = vmatprep.subr.bf16.mxu1 %v6546_v31 }
 0x308   : > { %2770 = vmatmul.mubr.f32.gmra.mrb[124].mxu1 %v4778_v41 }
 0x309   : > { %2774 = vmatprep.mubr.f32.mxu1 %v5461_v61  ;;  %4184 = vmatpush1.bf16.msra.mxu1 %v4183_v46  ;;  %v4782_v61 = vld [vmem:[%s5102_s21 + $0x90] sm:$0xff] }
 0x30a   : > { %4185 = vmatprep.subr.bf16.mxu1 %v6546_v31  ;;  %v4783_v31 = vld [vmem:[%s5102_s21 + $0x98] sm:$0xff] }
 0x30c   : > { %2775 = vmatmul.mubr.f32.gmra.mrb[126].mxu1 %v4779_v18 }
 0x30d   : > { %2779 = vmatprep.mubr.f32.mxu1 %v5468_v29  ;;  %4187 = vmatpush1.bf16.msra.mxu1 %v4186_v30  ;;  %v4784_v29 = vld [vmem:[%s5102_s21 + $0xa0] sm:$0xff] }
 0x310   : > { %2780 = vmatmul.mubr.f32.gmra.mrb[128].mxu1 %v4780_v60  ;;  %v6566_v60 = vld [vmem:[#allocation15_spill] sm:$0xff] }
 0x311   : > { %2784 = vmatprep.mubr.f32.mxu1 %v5477_v33  ;;  %v4785_v33 = vld [vmem:[%s5102_s21 + $0xa8] sm:$0xff] }
 0x314   : > { %2785 = vmatmul.mubr.f32.gmra.mrb[130].mxu1 %v4781_v37  ;;  %v6567_v37 = vld [vmem:[#allocation10_spill] sm:$0xff] }
 0x315   : > { %2789 = vmatprep.mubr.f32.mxu1 %v5484_v4  ;;  %v1237_v4 = vadd.f32 %v5965_v26, %v5778_v52 }
 0x318   : > { %2790 = vmatmul.mubr.f32.gmra.mrb[132].mxu1 %v4782_v61  ;;  %v6569_v61 = vld [vmem:[#allocation17_spill] sm:$0xff] }
 0x319   : > { %2794 = vmatprep.mubr.f32.mxu1 %v5491_v51  ;;  %v1232_v51 = vadd.f32 %v5965_v26, %v5770_v49  ;;  %v1242_v49 = vadd.f32 %v5965_v26, %v5785_v63 }
 0x31c   : > { %2795 = vmatmul.mubr.f32.gmra.mrb[134].mxu1 %v4783_v31 }
 0x31d   : > { %2799 = vmatprep.mubr.f32.mxu1 %v5498_v21 }
 0x320   : > { %2800 = vmatmul.mubr.f32.gmra.mrb[136].mxu1 %v4784_v29  ;;  %v6571_v29 = vld [vmem:[#allocation39_spill] sm:$0xff] }
 0x321   : > { %2804 = vmatprep.mubr.f32.mxu1 %v5505_v47  ;;  %v4787_v47 = vld [vmem:[%s5102_s21 + $0xb8] sm:$0xff] }
 0x324   : > { %2805 = vmatmul.mubr.f32.gmra.mrb[138].mxu1 %v4785_v33  ;;  %v1277_v33 = vadd.f32 %v5965_v26, %v6571_v29  ;;  %v1292_v29 = vadd.f32 %v5965_v26, %v5850_v56 }
 0x325   : > { %2809 = vmatprep.mubr.f32.mxu1 %v5512_v1  ;;  %v1247_v1 = vadd.f32 %v5965_v26, %v5793_v55  ;;  %v1252_v55 = vadd.f32 %v5965_v26, %v5799_v44  ;;  %v1267_v44 = vadd.f32 %v5965_v26, %v5819_v13  ;;  %v6568_v13 = vld [vmem:[#allocation13_spill] sm:$0xff] }
 0x327   : > { %v3710_v10 = vpop.f32.mrb[64].mxu1 }
 0x328   : > { %v1462_v54 = vadd.f32 %v3710_v10, %v1237_v4  ;;  %v1456_v21 = vpop.f32.mrb[65].mxu1  ;;  %2810 = vmatmul.mubr.f32.gmra.mrb[140].mxu1 %v4786_v11 }
 0x329   : > { %v1457_v20 = vadd.f32 %v1456_v21, %v1232_v51  ;;  %2814 = vmatprep.mubr.f32.mxu1 %v5519_v27  ;;  %v4789_v27 = vld [vmem:[%s5102_s21 + $0xc8] sm:$0xff]  ;;  %v6572_v51 = vld [vmem:[#allocation37_spill] sm:$0xff] }
 0x32a   : > { %v1272_v10 = vadd.f32 %v5965_v26, %v6572_v51  ;;  %v6573_v21 = vld [vmem:[#allocation14_spill] sm:$0xff] }
 0x32b   : > { %4619 = vtanh.f32 %v1457_v20 }
 0x32c   : > { %2815 = vmatmul.mubr.f32.gmra.mrb[142].mxu1 %v4787_v47  ;;  %4621 = vtanh.f32 %v1462_v54  ;;  %v6574_v47 = vld [vmem:[#allocation19_spill] sm:$0xff] }
 0x32d   : > { %2819 = vmatprep.mubr.f32.mxu1 %v5526_v57  ;;  %v1257_v57 = vadd.f32 %v5965_v26, %v5806_v25  ;;  %v4791_v25 = vld [vmem:[%s5102_s21 + $0xd8] sm:$0xff] }
 0x32f   : > { %v3713_v52 = vpop.f32.mrb[66].mxu1 }
 0x330   : > { %v1472_v48 = vadd.f32 %v3713_v52, %v1247_v1  ;;  %v1466_v35 = vpop.f32.mrb[67].mxu1  ;;  %2820 = vmatmul.mubr.f32.gmra.mrb[144].mxu1 %v4788_v16  ;;  %v6576_v52 = vld [vmem:[#allocation16_spill] sm:$0xff]  ;;  %v2455_v16 = vld [vmem:[#allocation5 + $0x708] sm:$0xff] }
 0x331   : > { %v1467_v12 = vadd.f32 %v1466_v35, %v1242_v49  ;;  %2824 = vmatprep.mubr.f32.mxu1 %v5534_v58  ;;  %v6575_v49 = vld [vmem:[#allocation12_spill] sm:$0xff]  ;;  %v2454_v35 = vld [vmem:[#allocation5 + $0x700] sm:$0xff] }
 0x333   : > { %4623 = vtanh.f32 %v1467_v12  ;;  %v2456_v12 = vld [vmem:[#allocation5 + $0x710] sm:$0xff] }
 0x334   : > { %2825 = vmatmul.mubr.f32.gmra.mrb[146].mxu1 %v4789_v27  ;;  %4625 = vtanh.f32 %v1472_v48  ;;  %v6577_v48 = vld [vmem:[#allocation21_spill] sm:$0xff] }
 0x335   : > { %v4620_v45 = vpop.eup %4619  ;;  %2829 = vmatprep.mubr.f32.mxu1 %v5541_v62 }
 0x336   : > { %2165 = vmatprep.mubr.f32.mxu0 %v4620_v45  ;;  %v5987_v63 = vpop.eup %4621 }
 0x337   : > { %v3716_v40 = vpop.f32.mrb[68].mxu1  ;;  %2166 = vmatmul.mubr.f32.vlgmr.msra.gmra.mrb[96].mxu0 %v5663_v42 }
 0x338   : > { %v1482_v58 = vadd.f32 %v3716_v40, %v1257_v57  ;;  %v1476_v46 = vpop.f32.mrb[69].mxu1  ;;  %2170 = vmatprep.mubr.f32.mxu0 %v5987_v63  ;;  %2830 = vmatmul.mubr.f32.gmra.mrb[148].mxu1 %v4790_v43  ;;  %v4188_v57 = vpack.c.bf16 %v2455_v16, %v2454_v35  ;;  %v1287_v40 = vadd.f32 %v5965_v26, %v5844_v59  ;;  %v6578_v43 = vld [vmem:[#allocation41_spill] sm:$0xff] }
 0x339   : > { %v1477_v62 = vadd.f32 %v1476_v46, %v1252_v55  ;;  %2834 = vmatprep.mubr.f32.mxu1 %v5548_v19  ;;  %v1262_v19 = vadd.f32 %v5965_v26, %v5812_v17  ;;  %v6570_v17 = vld [vmem:[#allocation11_spill] sm:$0xff]  ;;  %v2457_v55 = vld [vmem:[#allocation5 + $0x718] sm:$0xff]  ;;  %v1317_v16 = vadd.f32 %v5965_v26, %v5877_v3 }
 0x33a   : > { %4189 = vmatprep.subr.bf16.mxu0 %v4188_v57  ;;  %4220 = vmatprep.subr.bf16.mxu1 %v4188_v57  ;;  %v6589_v3 = vld [vmem:[#allocation27_spill] sm:$0xff] }
 0x33b   : > { %4627 = vtanh.f32 %v1477_v62  ;;  %2171 = vmatmul.mubr.f32.gmra.mrb[98].mxu0 %v5670_v36  ;;  %v1282_v62 = vadd.f32 %v5965_v26, %v6578_v43  ;;  %v1327_v43 = vadd.f32 %v5965_v26, %v5886_v32  ;;  %v6591_v32 = vld [vmem:[#allocation29_spill] sm:$0xff] }
 0x33c   : > { %2835 = vmatmul.mubr.f32.gmra.mrb[150].mxu1 %v4791_v25  ;;  %4629 = vtanh.f32 %v1482_v58  ;;  %v4192_v58 = vpack.c.bf16 %v2457_v55, %v2456_v12  ;;  %4191 = vmatpush3.bf16.msra.mxu0 %v4188_v57 }
 0x33d   : > { %v5997_v38 = vpop.eup %4623  ;;  %2839 = vmatprep.mubr.f32.mxu1 %v5555_v2 }
 0x33e   : > { %2175 = vmatprep.mubr.f32.mxu0 %v5997_v38  ;;  %v6003_v24 = vpop.eup %4625  ;;  %4193 = vmatprep.subr.bf16.mxu0 %v4192_v58 }
 0x33f   : > { %v3719_v41 = vpop.f32.mrb[70].mxu1  ;;  %2176 = vmatmul.mubr.f32.gmra.mrb[100].mxu0 %v5677_v53 }
 0x340   : > { %v1492_v30 = vadd.f32 %v3719_v41, %v1267_v44  ;;  %v1486_v18 = vpop.f32.mrb[71].mxu1  ;;  %2180 = vmatprep.mubr.f32.mxu0 %v6003_v24  ;;  %2840 = vmatmul.mubr.f32.gmra.mrb[152].mxu1 %v6566_v60  ;;  %v6579_v44 = vld [vmem:[#allocation18_spill] sm:$0xff]  ;;  %v6580_v60 = vld [vmem:[#allocation20_spill] sm:$0xff] }
 0x341   : > { %v1487_v2 = vadd.f32 %v1486_v18, %v1262_v19  ;;  %2844 = vmatprep.mubr.f32.mxu1 %v6567_v37  ;;  %v2458_v19 = vld [vmem:[#allocation5 + $0x720] sm:$0xff]  ;;  %v2459_v41 = vld [vmem:[#allocation5 + $0x728] sm:$0xff]  ;;  %v2461_v37 = vld [vmem:[#allocation5 + $0x738] sm:$0xff]  ;;  %4195 = vmatpush3.bf16.msra.mxu0 %v4192_v58 }
 0x342   : > { %v4196_v18 = vpack.c.bf16 %v2459_v41, %v2458_v19 }
 0x343   : > { %4631 = vtanh.f32 %v1487_v2  ;;  %2181 = vmatmul.mubr.f32.gmra.mrb[102].mxu0 %v6568_v13  ;;  %v2460_v2 = vld [vmem:[#allocation5 + $0x730] sm:$0xff] }
 0x344   : > { %2845 = vmatmul.mubr.f32.gmra.mrb[154].mxu1 %v6569_v61  ;;  %4633 = vtanh.f32 %v1492_v30  ;;  %4197 = vmatprep.subr.bf16.mxu0 %v4196_v18 }
 0x345   : > { %v6013_v31 = vpop.eup %4627  ;;  %2849 = vmatprep.mubr.f32.mxu1 %v6570_v17  ;;  %4199 = vmatpush3.bf16.msra.mxu0 %v4196_v18 }
 0x346   : > { %2185 = vmatprep.mubr.f32.mxu0 %v6013_v31  ;;  %v6019_v4 = vpop.eup %4629 }
 0x347   : > { %v3722_v54 = vpop.f32.mrb[72].mxu1  ;;  %2186 = vmatmul.mubr.f32.gmra.mrb[104].mxu0 %v6573_v21 }
 0x348   : > { %v1502_v11 = vadd.f32 %v3722_v54, %v1277_v33  ;;  %v1496_v20 = vpop.f32.mrb[73].mxu1  ;;  %2190 = vmatprep.mubr.f32.mxu0 %v6019_v4  ;;  %2850 = vmatmul.mubr.f32.gmra.mrb[156].mxu1 %v6574_v47  ;;  %v6581_v33 = vld [vmem:[#allocation22_spill] sm:$0xff]  ;;  %v6583_v54 = vld [vmem:[#allocation48_spill] sm:$0xff] }
 0x349   : > { %v1497_v1 = vadd.f32 %v1496_v20, %v1272_v10  ;;  %2854 = vmatprep.mubr.f32.mxu1 %v6575_v49 }
 0x34b   : > { %4635 = vtanh.f32 %v1497_v1  ;;  %2191 = vmatmul.mubr.f32.gmra.mrb[106].mxu0 %v6576_v52  ;;  %v6585_v1 = vld [vmem:[#allocation24_spill] sm:$0xff] }
 0x34c   : > { %2855 = vmatmul.mubr.f32.gmra.mrb[158].mxu1 %v6577_v48  ;;  %4637 = vtanh.f32 %v1502_v11  ;;  %v6584_v11 = vld [vmem:[#allocation46_spill] sm:$0xff]  ;;  %v6586_v48 = vld [vmem:[#allocation25_spill] sm:$0xff] }
 0x34d   : > { %v6029_v27 = vpop.eup %4631  ;;  %2924 = vmatprep.mubr.f32.mxu1 %v4620_v45  ;;  %v1302_v20 = vadd.f32 %v5965_v26, %v6584_v11 }
 0x34e   : > { %2195 = vmatprep.mubr.f32.mxu0 %v6029_v27  ;;  %v6034_v46 = vpop.eup %4633 }
 0x34f   : > { %v3725_v25 = vpop.f32.mrb[74].mxu1  ;;  %2196 = vmatmul.mubr.f32.gmra.mrb[108].mxu0 %v6579_v44 }
 0x350   : > { %v1512_v45 = vadd.f32 %v3725_v25, %v1287_v40  ;;  %v1506_v30 = vpop.f32.mrb[75].mxu1  ;;  %2200 = vmatprep.mubr.f32.mxu0 %v6034_v46  ;;  %2925 = vmatmul.mubr.f32.vlgmr.msra.gmra.mrb[96].mxu1 %v5663_v42  ;;  %v1297_v42 = vadd.f32 %v5965_v26, %v5856_v34  ;;  %v1322_v25 = vadd.f32 %v5965_v26, %v5882_v5 }
 0x351   : > { %v1507_v59 = vadd.f32 %v1506_v30, %v1282_v62  ;;  %2929 = vmatprep.mubr.f32.mxu1 %v5987_v63  ;;  %4228 = vmatpush3.bf16.msra.mxu1 %v4188_v57  ;;  %v4200_v63 = vpack.c.bf16 %v2461_v37, %v2460_v2  ;;  %v6587_v57 = vld [vmem:[#allocation50_spill] sm:$0xff]  ;;  %v1337_v5 = vadd.f32 %v5965_v26, %v5896_v6  ;;  %v6593_v6 = vld [vmem:[#allocation31_spill] sm:$0xff] }
 0x352   : > { %4221 = vmatprep.subr.bf16.mxu1 %v4192_v58  ;;  %v6592_v2 = vld [vmem:[#allocation30_spill] sm:$0xff] }
 0x353   : > { %4639 = vtanh.f32 %v1507_v59  ;;  %2201 = vmatmul.mubr.f32.gmra.mrb[110].mxu0 %v6580_v60  ;;  %4201 = vmatprep.subr.bf16.mxu0 %v4200_v63 }
 0x354   : > { %2930 = vmatmul.mubr.f32.gmra.mrb[98].mxu1 %v5670_v36  ;;  %4641 = vtanh.f32 %v1512_v45  ;;  %4203 = vmatpush3.bf16.msra.mxu0 %v4200_v63 }
 0x355   : > { %v6044_v61 = vpop.eup %4635  ;;  %2934 = vmatprep.mubr.f32.mxu1 %v5997_v38  ;;  %4229 = vmatpush3.bf16.msra.mxu1 %v4192_v58  ;;  %v6582_v38 = vld [vmem:[#allocation23_spill] sm:$0xff] }
 0x356   : > { %2205 = vmatprep.mubr.f32.mxu0 %v6044_v61  ;;  %v6050_v17 = vpop.eup %4637  ;;  %4222 = vmatprep.subr.bf16.mxu1 %v4196_v18 }
 0x357   : > { %v3728_v36 = vpop.f32.mrb[76].mxu1  ;;  %2206 = vmatmul.mubr.f32.gmra.mrb[112].mxu0 %v6581_v33 }
 0x358   : > { %v1522_v51 = vadd.f32 %v3728_v36, %v1297_v42  ;;  %v1516_v10 = vpop.f32.mrb[77].mxu1  ;;  %2210 = vmatprep.mubr.f32.mxu0 %v6050_v17  ;;  %2935 = vmatmul.mubr.f32.gmra.mrb[100].mxu1 %v5677_v53  ;;  %v1307_v53 = vadd.f32 %v5965_v26, %v6583_v54  ;;  %v1352_v54 = vadd.f32 %v5965_v26, %v5912_v9 }
 0x359   : > { %v1517_v34 = vadd.f32 %v1516_v10, %v1292_v29  ;;  %2939 = vmatprep.mubr.f32.mxu1 %v6003_v24  ;;  %4230 = vmatpush3.bf16.msra.mxu1 %v4196_v18  ;;  %v1332_v18 = vadd.f32 %v5965_v26, %v5892_v39  ;;  %v1347_v39 = vadd.f32 %v5965_v26, %v5906_v7  ;;  %v6595_v7 = vld [vmem:[#allocation33_spill] sm:$0xff] }
 0x35a   : > { %4223 = vmatprep.subr.bf16.mxu1 %v4200_v63  ;;  %v1342_v29 = vadd.f32 %v5965_v26, %v5902_v15  ;;  %v1357_v15 = vadd.f32 %v5965_v26, %v5916_v50  ;;  %v2462_v50 = vld [vmem:[#allocation5 + $0x740] sm:$0xff] }
 0x35b   : > { %4643 = vtanh.f32 %v1517_v34  ;;  %2211 = vmatmul.mubr.f32.gmra.mrb[114].mxu0 %v6582_v38 }
 0x35c   : > { %2940 = vmatmul.mubr.f32.gmra.mrb[102].mxu1 %v6568_v13  ;;  %4645 = vtanh.f32 %v1522_v51 }
 0x35d   : > { %v4640_v56 = vpop.eup %4639  ;;  %2944 = vmatprep.mubr.f32.mxu1 %v6013_v31  ;;  %4231 = vmatpush3.bf16.msra.mxu1 %v4200_v63 }
 0x35e   : > { %2215 = vmatprep.mubr.f32.mxu0 %v4640_v56  ;;  %v6063_v24 = vpop.eup %4641 }
 0x35f   : > { %v3731_v47 = vpop.f32.mrb[78].mxu1  ;;  %2216 = vmatmul.mubr.f32.gmra.mrb[116].mxu0 %v6585_v1 }
 0x360   : > { %v1532_v13 = vadd.f32 %v3731_v47, %v1307_v53  ;;  %v1526_v49 = vpop.f32.mrb[79].mxu1  ;;  %2220 = vmatprep.mubr.f32.mxu0 %v6063_v24  ;;  %2945 = vmatmul.mubr.f32.gmra.mrb[104].mxu1 %v6573_v21  ;;  %v1312_v21 = vadd.f32 %v5965_v26, %v6587_v57  ;;  %v1362_v57 = vadd.f32 %v5965_v26, %v5922_v8  ;;  %v6599_v8 = vld [vmem:[#allocation38_spill] sm:$0xff] }
 0x361   : > { %v1527_v31 = vadd.f32 %v1526_v49, %v1302_v20  ;;  %2949 = vmatprep.mubr.f32.mxu1 %v6019_v4  ;;  %v6588_v4 = vld [vmem:[#allocation26_spill] sm:$0xff]  ;;  %v6597_v49 = vld [vmem:[#allocation35_spill] sm:$0xff] }
 0x363   : > { %4647 = vtanh.f32 %v1527_v31  ;;  %2221 = vmatmul.mubr.f32.gmra.mrb[118].mxu0 %v6586_v48  ;;  %v2464_v31 = vld [vmem:[#allocation5 + $0x750] sm:$0xff] }
 0x364   : > { %2950 = vmatmul.mubr.f32.gmra.mrb[106].mxu1 %v6576_v52  ;;  %4649 = vtanh.f32 %v1532_v13 }
 0x365   : > { %v4644_v35 = vpop.eup %4643  ;;  %2954 = vmatprep.mubr.f32.mxu1 %v6029_v27 }
 0x366   : > { %2225 = vmatprep.mubr.f32.mxu0 %v4644_v35  ;;  %v6076_v12 = vpop.eup %4645 }
 0x367   : > { %v3734_v55 = vpop.f32.mrb[80].mxu1  ;;  %2226 = vmatmul.mubr.f32.gmra.mrb[120].mxu0 %v6588_v4 }
 0x368   : > { %v1542_v40 = vadd.f32 %v3734_v55, %v1317_v16  ;;  %v1536_v58 = vpop.f32.mrb[81].mxu1  ;;  %2230 = vmatprep.mubr.f32.mxu0 %v6076_v12  ;;  %2955 = vmatmul.mubr.f32.gmra.mrb[108].mxu1 %v6579_v44  ;;  %v6598_v55 = vld [vmem:[#allocation36_spill] sm:$0xff] }
 0x369   : > { %v1537_v52 = vadd.f32 %v1536_v58, %v1312_v21  ;;  %2959 = vmatprep.mubr.f32.mxu1 %v6034_v46  ;;  %v6590_v46 = vld [vmem:[#allocation28_spill] sm:$0xff]  ;;  %v2466_v58 = vld [vmem:[#allocation5 + $0x760] sm:$0xff] }
 0x36b   : > { %4651 = vtanh.f32 %v1537_v52  ;;  %2231 = vmatmul.mubr.f32.gmra.mrb[122].mxu0 %v6589_v3  ;;  %v2467_v52 = vld [vmem:[#allocation5 + $0x768] sm:$0xff] }
 0x36c   : > { %2960 = vmatmul.mubr.f32.gmra.mrb[110].mxu1 %v6580_v60  ;;  %4653 = vtanh.f32 %v1542_v40 }
 0x36d   : > { %v4648_v27 = vpop.eup %4647  ;;  %2964 = vmatprep.mubr.f32.mxu1 %v6044_v61 }
 0x36e   : > { %2235 = vmatprep.mubr.f32.mxu0 %v4648_v27  ;;  %v6089_v62 = vpop.eup %4649 }
 0x36f   : > { %v3737_v44 = vpop.f32.mrb[82].mxu1  ;;  %2236 = vmatmul.mubr.f32.gmra.mrb[124].mxu0 %v6590_v46 }
 0x370   : > { %v1552_v19 = vadd.f32 %v3737_v44, %v1327_v43  ;;  %v1546_v41 = vpop.f32.mrb[83].mxu1  ;;  %2240 = vmatprep.mubr.f32.mxu0 %v6089_v62  ;;  %2965 = vmatmul.mubr.f32.gmra.mrb[112].mxu1 %v6581_v33  ;;  %v6594_v33 = vld [vmem:[#allocation32_spill] sm:$0xff]  ;;  %v2468_v43 = vld [vmem:[#allocation5 + $0x770] sm:$0xff] }
 0x371   : > { %v1547_v45 = vadd.f32 %v1546_v41, %v1322_v25  ;;  %2969 = vmatprep.mubr.f32.mxu1 %v6050_v17  ;;  %v1377_v25 = vadd.f32 %v5965_v26, %v5936_v28  ;;  %v6601_v28 = vld [vmem:[#allocation42_spill] sm:$0xff] }
 0x373   : > { %4655 = vtanh.f32 %v1547_v45  ;;  %2241 = vmatmul.mubr.f32.gmra.mrb[126].mxu0 %v6591_v32  ;;  %v6600_v45 = vld [vmem:[#allocation40_spill] sm:$0xff] }
 0x374   : > { %2970 = vmatmul.mubr.f32.gmra.mrb[114].mxu1 %v6582_v38  ;;  %4657 = vtanh.f32 %v1552_v19  ;;  %v1372_v19 = vadd.f32 %v5965_v26, %v5932_v14 }
 0x375   : > { %v4652_v30 = vpop.eup %4651  ;;  %2974 = vmatprep.mubr.f32.mxu1 %v4640_v56 }
 0x376   : > { %2245 = vmatprep.mubr.f32.mxu0 %v4652_v30  ;;  %v6101_v59 = vpop.eup %4653 }
 0x377   : > { %v3740_v60 = vpop.f32.mrb[84].mxu1  ;;  %2246 = vmatmul.mubr.f32.gmra.mrb[128].mxu0 %v6592_v2 }
 0x378   : > { %v1562_v37 = vadd.f32 %v3740_v60, %v1337_v5  ;;  %v1556_v61 = vpop.f32.mrb[85].mxu1  ;;  %2250 = vmatprep.mubr.f32.mxu0 %v6101_v59  ;;  %2975 = vmatmul.mubr.f32.gmra.mrb[116].mxu1 %v6585_v1  ;;  %v2463_v1 = vld [vmem:[#allocation5 + $0x748] sm:$0xff]  ;;  %v1382_v60 = vadd.f32 %v5965_v26, %v5942_v0 }
 0x379   : > { %v1557_v42 = vadd.f32 %v1556_v61, %v1332_v18  ;;  %2979 = vmatprep.mubr.f32.mxu1 %v6063_v24  ;;  %v6596_v24 = vld [vmem:[#allocation34_spill] sm:$0xff]  ;;  %v4204_v13 = vpack.c.bf16 %v2463_v1, %v2462_v50 }
 0x37b   : > { %4659 = vtanh.f32 %v1557_v42  ;;  %2251 = vmatmul.mubr.f32.gmra.mrb[130].mxu0 %v6593_v6  ;;  %4205 = vmatprep.subr.bf16.mxu0 %v4204_v13 }
 0x37c   : > { %2980 = vmatmul.mubr.f32.gmra.mrb[118].mxu1 %v6586_v48  ;;  %4661 = vtanh.f32 %v1562_v37  ;;  %4207 = vmatpush3.bf16.msra.mxu0 %v4204_v13  ;;  %v2465_v48 = vld [vmem:[#allocation5 + $0x758] sm:$0xff]  ;;  %v6602_v37 = vld [vmem:[#allocation43_spill] sm:$0xff] }
 0x37d   : > { %v6111_v63 = vpop.eup %4655  ;;  %2984 = vmatprep.mubr.f32.mxu1 %v4644_v35  ;;  %v1367_v35 = vadd.f32 %v5965_v26, %v5926_v23  ;;  %v4208_v16 = vpack.c.bf16 %v2465_v48, %v2464_v31  ;;  %4224 = vmatprep.subr.bf16.mxu1 %v4204_v13 }
 0x37e   : > { %2255 = vmatprep.mubr.f32.mxu0 %v6111_v63  ;;  %v6116_v17 = vpop.eup %4657  ;;  %4232 = vmatpush3.bf16.msra.mxu1 %v4204_v13 }
 0x37f   : > { %v3743_v36 = vpop.f32.mrb[86].mxu1  ;;  %2256 = vmatmul.mubr.f32.gmra.mrb[132].mxu0 %v6594_v33  ;;  %4209 = vmatprep.subr.bf16.mxu0 %v4208_v16 }
 0x380   : > { %v1572_v51 = vadd.f32 %v3743_v36, %v1347_v39  ;;  %v1566_v10 = vpop.f32.mrb[87].mxu1  ;;  %2260 = vmatprep.mubr.f32.mxu0 %v6116_v17  ;;  %2985 = vmatmul.mubr.f32.gmra.mrb[120].mxu1 %v6588_v4  ;;  %v6605_v39 = vld [vmem:[#allocation47_spill] sm:$0xff]  ;;  %v6606_v36 = vld [vmem:[#allocation49_spill] sm:$0xff] }
 0x381   : > { %v1567_v34 = vadd.f32 %v1566_v10, %v1342_v29  ;;  %2989 = vmatprep.mubr.f32.mxu1 %v6076_v12  ;;  %4211 = vmatpush3.bf16.msra.mxu0 %v4208_v16 }
 0x382   : > { %4225 = vmatprep.subr.bf16.mxu1 %v4208_v16 }
 0x383   : > { %4663 = vtanh.f32 %v1567_v34  ;;  %2261 = vmatmul.mubr.f32.gmra.mrb[134].mxu0 %v6595_v7  ;;  %4233 = vmatpush3.bf16.msra.mxu1 %v4208_v16 }
 0x384   : > { %2990 = vmatmul.mubr.f32.gmra.mrb[122].mxu1 %v6589_v3  ;;  %4665 = vtanh.f32 %v1572_v51  ;;  %v4212_v3 = vpack.c.bf16 %v2467_v52, %v2466_v58  ;;  %v6192_v51 = vld [vmem:[#allocation7 + $0x3] ss:$0 sm:$0xff] }
 0x385   : > { %v6126_v38 = vpop.eup %4659  ;;  %2994 = vmatprep.mubr.f32.mxu1 %v4648_v27 }
 0x386   : > { %2265 = vmatprep.mubr.f32.mxu0 %v6126_v38  ;;  %v6131_v56 = vpop.eup %4661  ;;  %4213 = vmatprep.subr.bf16.mxu0 %v4212_v3 }
 0x387   : > { %v3746_v53 = vpop.f32.mrb[88].mxu1  ;;  %2266 = vmatmul.mubr.f32.gmra.mrb[136].mxu0 %v6596_v24  ;;  %4226 = vmatprep.subr.bf16.mxu1 %v4212_v3 }
 0x388   : > { %v1582_v11 = vadd.f32 %v3746_v53, %v1357_v15  ;;  %v1576_v20 = vpop.f32.mrb[89].mxu1  ;;  %2270 = vmatprep.mubr.f32.mxu0 %v6131_v56  ;;  %2995 = vmatmul.mubr.f32.gmra.mrb[124].mxu1 %v6590_v46 }
 0x389   : > { %v1577_v47 = vadd.f32 %v1576_v20, %v1352_v54  ;;  %2999 = vmatprep.mubr.f32.mxu1 %v6089_v62  ;;  %v2469_v62 = vld [vmem:[#allocation5 + $0x778] sm:$0xff]  ;;  %4215 = vmatpush3.bf16.msra.mxu0 %v4212_v3 }
 0x38a   : > { %v4216_v44 = vpack.c.bf16 %v2469_v62, %v2468_v43  ;;  %4234 = vmatpush3.bf16.msra.mxu1 %v4212_v3 }
 0x38b   : > { %4667 = vtanh.f32 %v1577_v47  ;;  %2271 = vmatmul.mubr.f32.gmra.mrb[138].mxu0 %v6597_v49 }
 0x38c   : > { %3000 = vmatmul.mubr.f32.gmra.mrb[126].mxu1 %v6591_v32  ;;  %4669 = vtanh.f32 %v1582_v11  ;;  %4217 = vmatprep.subr.bf16.mxu0 %v4216_v44 }
 0x38d   : > { %v6141_v9 = vpop.eup %4663  ;;  %3004 = vmatprep.mubr.f32.mxu1 %v4652_v30  ;;  %4219 = vmatpush3.bf16.msra.mxu0 %v4216_v44 }
 0x38e   : > { %2275 = vmatprep.mubr.f32.mxu0 %v6141_v9  ;;  %v6146_v12 = vpop.eup %4665  ;;  %4227 = vmatprep.subr.bf16.mxu1 %v4216_v44 }
 0x38f   : > { %v3749_v21 = vpop.f32.mrb[90].mxu1  ;;  %2276 = vmatmul.mubr.f32.gmra.mrb[140].mxu0 %v6598_v55  ;;  %4235 = vmatpush3.bf16.msra.mxu1 %v4216_v44 }
 0x390   : > { %v1592_v4 = vadd.f32 %v3749_v21, %v1367_v35  ;;  %v1586_v40 = vpop.f32.mrb[91].mxu1  ;;  %2280 = vmatprep.mubr.f32.mxu0 %v6146_v12  ;;  %3005 = vmatmul.mubr.f32.gmra.mrb[128].mxu1 %v6592_v2 }
 0x391   : > { %v1587_v23 = vadd.f32 %v1586_v40, %v1362_v57  ;;  %3009 = vmatprep.mubr.f32.mxu1 %v6101_v59  ;;  %v1387_v59 = vadd.f32 %v5965_v26, %v5946_v22  ;;  %v6604_v26 = vld [vmem:[#allocation45_spill] sm:$0xff] }
 0x393   : > { %4671 = vtanh.f32 %v1587_v23  ;;  %2281 = vmatmul.mubr.f32.gmra.mrb[142].mxu0 %v6599_v8 }
 0x394   : > { %3010 = vmatmul.mubr.f32.gmra.mrb[130].mxu1 %v6593_v6  ;;  %4673 = vtanh.f32 %v1592_v4 }
 0x395   : > { %v4668_v27 = vpop.eup %4667  ;;  %3014 = vmatprep.mubr.f32.mxu1 %v6111_v63  ;;  %v6603_v63 = vld [vmem:[#allocation44_spill] sm:$0xff] }
 0x396   : > { %2285 = vmatprep.mubr.f32.mxu0 %v4668_v27  ;;  %v4670_v46 = vpop.eup %4669 }
 0x397   : > { %v3752_v41 = vpop.f32.mrb[92].mxu1  ;;  %2286 = vmatmul.mubr.f32.gmra.mrb[144].mxu0 %v6600_v45 }
 0x398   : > { %v1602_v32 = vadd.f32 %v3752_v41, %v1377_v25  ;;  %v1596_v30 = vpop.f32.mrb[93].mxu1  ;;  %2290 = vmatprep.mubr.f32.mxu0 %v4670_v46  ;;  %3015 = vmatmul.mubr.f32.gmra.mrb[132].mxu1 %v6594_v33  ;;  %v6607_v33 = vld [vmem:[#allocation51_spill] sm:$0xff] }
 0x399   : > { %v1597_v5 = vadd.f32 %v1596_v30, %v1372_v19  ;;  %3019 = vmatprep.mubr.f32.mxu1 %v6116_v17 }
 0x39b   : > { %4675 = vtanh.f32 %v1597_v5  ;;  %2291 = vmatmul.mubr.f32.gmra.mrb[146].mxu0 %v6601_v28 }
 0x39c   : > { %3020 = vmatmul.mubr.f32.gmra.mrb[134].mxu1 %v6595_v7  ;;  %4677 = vtanh.f32 %v1602_v32 }
 0x39d   : > { %v4672_v14 = vpop.eup %4671  ;;  %3024 = vmatprep.mubr.f32.mxu1 %v6126_v38 }
 0x39e   : > { %2295 = vmatprep.mubr.f32.mxu0 %v4672_v14  ;;  %v4674_v18 = vpop.eup %4673 }
 0x39f   : > { %v3755_v2 = vpop.f32.mrb[94].mxu1  ;;  %2296 = vmatmul.mubr.f32.gmra.mrb[148].mxu0 %v6602_v37 }
 0x3a0   : > { %v1612_v61 = vadd.f32 %v3755_v2, %v1387_v59  ;;  %v1606_v42 = vpop.f32.mrb[95].mxu1  ;;  %2300 = vmatprep.mubr.f32.mxu0 %v4674_v18  ;;  %3025 = vmatmul.mubr.f32.gmra.mrb[136].mxu1 %v6596_v24 }
 0x3a1   : > { %v1607_v6 = vadd.f32 %v1606_v42, %v1382_v60  ;;  %3029 = vmatprep.mubr.f32.mxu1 %v6131_v56 }
 0x3a3   : > { %4679 = vtanh.f32 %v1607_v6  ;;  %2301 = vmatmul.mubr.f32.gmra.mrb[150].mxu0 %v6603_v63 }
 0x3a4   : > { %3030 = vmatmul.mubr.f32.gmra.mrb[138].mxu1 %v6597_v49  ;;  %4681 = vtanh.f32 %v1612_v61 }
 0x3a5   : > { %v4676_v22 = vpop.eup %4675  ;;  %3034 = vmatprep.mubr.f32.mxu1 %v6141_v9 }
 0x3a6   : > { %2305 = vmatprep.mubr.f32.mxu0 %v4676_v22  ;;  %v4678_v0 = vpop.eup %4677 }
 0x3a7   : > { %2306 = vmatmul.mubr.f32.gmra.mrb[152].mxu0 %v6604_v26 }
 0x3a8   : > { %2310 = vmatprep.mubr.f32.mxu0 %v4678_v0  ;;  %3035 = vmatmul.mubr.f32.gmra.mrb[140].mxu1 %v6598_v55 }
 0x3a9   : > { %3039 = vmatprep.mubr.f32.mxu1 %v6146_v12 }
 0x3ab   : > { %2311 = vmatmul.mubr.f32.gmra.mrb[154].mxu0 %v6605_v39 }
 0x3ac   : > { %3040 = vmatmul.mubr.f32.gmra.mrb[142].mxu1 %v6599_v8 }
 0x3ad   : > { %v4680_v17 = vpop.eup %4679  ;;  %3044 = vmatprep.mubr.f32.mxu1 %v4668_v27 }
 0x3ae   : > { %2315 = vmatprep.mubr.f32.mxu0 %v4680_v17  ;;  %v4682_v29 = vpop.eup %4681 }
 0x3af   : > { %2316 = vmatmul.mubr.f32.gmra.mrb[156].mxu0 %v6606_v36 }
 0x3b0   : > { %2320 = vmatprep.mubr.f32.mxu0 %v4682_v29  ;;  %3045 = vmatmul.mubr.f32.gmra.mrb[144].mxu1 %v6600_v45 }
 0x3b1   : > { %3049 = vmatprep.mubr.f32.mxu1 %v4670_v46 }
 0x3b3   : > { %2321 = vmatmul.mubr.f32.gmra.mrb[158].mxu0 %v6607_v33 }
 0x3b4   : > { %3050 = vmatmul.mubr.f32.gmra.mrb[146].mxu1 %v6601_v28 }
 0x3b5   : > { %3054 = vmatprep.mubr.f32.mxu1 %v4672_v14 }
 0x3b8   : > { %3055 = vmatmul.mubr.f32.gmra.mrb[148].mxu1 %v6602_v37 }
 0x3b9   : > { %3059 = vmatprep.mubr.f32.mxu1 %v4674_v18 }
 0x3bc   : > { %3060 = vmatmul.mubr.f32.gmra.mrb[150].mxu1 %v6603_v63 }
 0x3bd   : > { %3064 = vmatprep.mubr.f32.mxu1 %v4676_v22 }
 0x3c0   : > { %3065 = vmatmul.mubr.f32.gmra.mrb[152].mxu1 %v6604_v26 }
 0x3c1   : > { %3069 = vmatprep.mubr.f32.mxu1 %v4678_v0 }
 0x3c4   : > { %3070 = vmatmul.mubr.f32.gmra.mrb[154].mxu1 %v6605_v39 }
 0x3c5   : > { %3074 = vmatprep.mubr.f32.mxu1 %v4680_v17 }
 0x3c8   : > { %3075 = vmatmul.mubr.f32.gmra.mrb[156].mxu1 %v6606_v36 }
 0x3c9   : > { %3079 = vmatprep.mubr.f32.mxu1 %v4682_v29 }
 0x3cc   : > { %3080 = vmatmul.mubr.f32.gmra.mrb[158].mxu1 %v6607_v33 }
 0x40a   : > { %v2167_v10 = vpop.f32.mrb[96].mxu0 }
 0x40b   : > { %v4236_v34 = vadd.f32 %v6192_v51, %v2167_v10  ;;  %v2169_v7 = vpop.f32.mrb[97].mxu0 }
 0x40d   : > { %4683 = vtanh.f32 %v4236_v34 }
 0x40e   : > { %v2172_v38 = vpop.f32.mrb[98].mxu0 }
 0x40f   : > { %v4237_v15 = vadd.f32 %v6192_v51, %v2172_v38  ;;  %v2174_v56 = vpop.f32.mrb[99].mxu0 }
 0x411   : > { %4685 = vtanh.f32 %v4237_v15 }
 0x412   : > { %v2177_v54 = vpop.f32.mrb[100].mxu0 }
 0x413   : > { %v4238_v53 = vadd.f32 %v6192_v51, %v2177_v54  ;;  %v2179_v24 = vpop.f32.mrb[101].mxu0 }
 0x415   : > { %4687 = vtanh.f32 %v4238_v53 }
 0x416   : > { %v2182_v11 = vpop.f32.mrb[102].mxu0 }
 0x417   : > { %v4684_v20 = vpop.eup %4683  ;;  %v4239_v47 = vadd.f32 %v6192_v51, %v2182_v11  ;;  %v2184_v50 = vpop.f32.mrb[103].mxu0 }
 0x418   : > { %3788 = vmatprep.mubr.f32.mxu0 %v4684_v20 }
 0x419   : > { %4689 = vtanh.f32 %v4239_v47 }
 0x41a   : > { %v2187_v1 = vpop.f32.mrb[104].mxu0 }
 0x41b   : > { %v4686_v13 = vpop.eup %4685  ;;  %v4240_v49 = vadd.f32 %v6192_v51, %v2187_v1  ;;  %v2189_v9 = vpop.f32.mrb[105].mxu0 }
 0x41c   : > { %3789 = vmatmul.mubr.f32.vlgmr.msra.gmra.mrb[160].mxu0 %v4686_v13 }
 0x41d   : > { %4691 = vtanh.f32 %v4240_v49 }
 0x41e   : > { %v2192_v31 = vpop.f32.mrb[106].mxu0 }
 0x41f   : > { %v4688_v48 = vpop.eup %4687  ;;  %v4241_v35 = vadd.f32 %v6192_v51, %v2192_v31  ;;  %v2194_v16 = vpop.f32.mrb[107].mxu0 }
 0x420   : > { %3791 = vmatprep.mubr.f32.mxu0 %v4688_v48 }
 0x421   : > { %4693 = vtanh.f32 %v4241_v35 }
 0x422   : > { %v2197_v12 = vpop.f32.mrb[108].mxu0 }
 0x423   : > { %v4690_v57 = vpop.eup %4689  ;;  %v4242_v21 = vadd.f32 %v6192_v51, %v2197_v12  ;;  %v2199_v55 = vpop.f32.mrb[109].mxu0 }
 0x424   : > { %v6201_v4 = vpop.f32.mrb[96].mxu1  ;;  %3792 = vmatmul.mubr.f32.gmra.mrb[162].mxu0 %v4690_v57 }
 0x425   : > { %v2928_v40 = vpop.f32.mrb[97].mxu1  ;;  %4695 = vtanh.f32 %v4242_v21 }
 0x426   : > { %v2202_v23 = vpop.f32.mrb[110].mxu0 }
 0x427   : > { %v4692_v58 = vpop.eup %4691  ;;  %v4243_v52 = vadd.f32 %v6192_v51, %v2202_v23  ;;  %v2204_v3 = vpop.f32.mrb[111].mxu0 }
 0x428   : > { %v6204_v8 = vpop.f32.mrb[98].mxu1  ;;  %3794 = vmatprep.mubr.f32.mxu0 %v4692_v58 }
 0x429   : > { %v2933_v27 = vpop.f32.mrb[99].mxu1  ;;  %4697 = vtanh.f32 %v4243_v52 }
 0x42a   : > { %v2207_v43 = vpop.f32.mrb[112].mxu0 }
 0x42b   : > { %v4694_v62 = vpop.eup %4693  ;;  %v4244_v25 = vadd.f32 %v6192_v51, %v2207_v43  ;;  %v2209_v44 = vpop.f32.mrb[113].mxu0 }
 0x42c   : > { %v6207_v46 = vpop.f32.mrb[100].mxu1  ;;  %3795 = vmatmul.mubr.f32.gmra.mrb[164].mxu0 %v4694_v62 }
 0x42d   : > { %v2938_v19 = vpop.f32.mrb[101].mxu1  ;;  %4699 = vtanh.f32 %v4244_v25 }
 0x42e   : > { %v2212_v41 = vpop.f32.mrb[114].mxu0 }
 0x42f   : > { %v4696_v45 = vpop.eup %4695  ;;  %v4245_v32 = vadd.f32 %v6192_v51, %v2212_v41  ;;  %v2214_v30 = vpop.f32.mrb[115].mxu0 }
 0x430   : > { %v6210_v5 = vpop.f32.mrb[102].mxu1  ;;  %3797 = vmatprep.mubr.f32.mxu0 %v4696_v45 }
 0x431   : > { %v2943_v28 = vpop.f32.mrb[103].mxu1  ;;  %4701 = vtanh.f32 %v4245_v32 }
 0x432   : > { %v2217_v14 = vpop.f32.mrb[116].mxu0 }
 0x433   : > { %v4698_v59 = vpop.eup %4697  ;;  %v4246_v18 = vadd.f32 %v6192_v51, %v2217_v14  ;;  %v2219_v60 = vpop.f32.mrb[117].mxu0 }
 0x434   : > { %v6213_v2 = vpop.f32.mrb[104].mxu1  ;;  %3798 = vmatmul.mubr.f32.gmra.mrb[166].mxu0 %v4698_v59 }
 0x435   : > { %v2948_v37 = vpop.f32.mrb[105].mxu1  ;;  %4703 = vtanh.f32 %v4246_v18 }
 0x436   : > { %v2222_v61 = vpop.f32.mrb[118].mxu0 }
 0x437   : > { %v4700_v42 = vpop.eup %4699  ;;  %v4247_v6 = vadd.f32 %v6192_v51, %v2222_v61  ;;  %v2224_v63 = vpop.f32.mrb[119].mxu0 }
 0x438   : > { %v6216_v22 = vpop.f32.mrb[106].mxu1  ;;  %3800 = vmatprep.mubr.f32.mxu0 %v4700_v42 }
 0x439   : > { %v2953_v0 = vpop.f32.mrb[107].mxu1  ;;  %4705 = vtanh.f32 %v4247_v6 }
 0x43a   : > { %v2227_v26 = vpop.f32.mrb[120].mxu0 }
 0x43b   : > { %v4702_v39 = vpop.eup %4701  ;;  %v4248_v17 = vadd.f32 %v6192_v51, %v2227_v26  ;;  %v2229_v29 = vpop.f32.mrb[121].mxu0 }
 0x43c   : > { %v6219_v36 = vpop.f32.mrb[108].mxu1  ;;  %3801 = vmatmul.mubr.f32.gmra.mrb[168].mxu0 %v4702_v39 }
 0x43d   : > { %v2958_v33 = vpop.f32.mrb[109].mxu1  ;;  %4707 = vtanh.f32 %v4248_v17 }
 0x43e   : > { %v2232_v10 = vpop.f32.mrb[122].mxu0 }
 0x43f   : > { %v4704_v34 = vpop.eup %4703  ;;  %v4249_v7 = vadd.f32 %v6192_v51, %v2232_v10  ;;  %v2234_v38 = vpop.f32.mrb[123].mxu0 }
 0x440   : > { %v6222_v15 = vpop.f32.mrb[110].mxu1  ;;  %3803 = vmatprep.mubr.f32.mxu0 %v4704_v34 }
 0x441   : > { %v2963_v56 = vpop.f32.mrb[111].mxu1  ;;  %4709 = vtanh.f32 %v4249_v7 }
 0x442   : > { %v2237_v54 = vpop.f32.mrb[124].mxu0 }
 0x443   : > { %v4706_v53 = vpop.eup %4705  ;;  %v4250_v24 = vadd.f32 %v6192_v51, %v2237_v54  ;;  %v2239_v11 = vpop.f32.mrb[125].mxu0 }
 0x444   : > { %v6225_v20 = vpop.f32.mrb[112].mxu1  ;;  %3804 = vmatmul.mubr.f32.gmra.mrb[170].mxu0 %v4706_v53 }
 0x445   : > { %v2968_v47 = vpop.f32.mrb[113].mxu1  ;;  %4711 = vtanh.f32 %v4250_v24 }
 0x446   : > { %v2242_v50 = vpop.f32.mrb[126].mxu0 }
 0x447   : > { %v4708_v1 = vpop.eup %4707  ;;  %v4251_v13 = vadd.f32 %v6192_v51, %v2242_v50  ;;  %v2244_v49 = vpop.f32.mrb[127].mxu0 }
 0x448   : > { %v6228_v9 = vpop.f32.mrb[114].mxu1  ;;  %3806 = vmatprep.mubr.f32.mxu0 %v4708_v1 }
 0x449   : > { %v2973_v31 = vpop.f32.mrb[115].mxu1  ;;  %4713 = vtanh.f32 %v4251_v13 }
 0x44a   : > { %v2247_v48 = vpop.f32.mrb[128].mxu0 }
 0x44b   : > { %v4710_v35 = vpop.eup %4709  ;;  %v4252_v16 = vadd.f32 %v6192_v51, %v2247_v48  ;;  %v2249_v12 = vpop.f32.mrb[129].mxu0 }
 0x44c   : > { %v6231_v57 = vpop.f32.mrb[116].mxu1  ;;  %3807 = vmatmul.mubr.f32.gmra.mrb[172].mxu0 %v4710_v35 }
 0x44d   : > { %v2978_v21 = vpop.f32.mrb[117].mxu1  ;;  %4715 = vtanh.f32 %v4252_v16 }
 0x44e   : > { %v2252_v55 = vpop.f32.mrb[130].mxu0 }
 0x44f   : > { %v4712_v40 = vpop.eup %4711  ;;  %v4253_v23 = vadd.f32 %v6192_v51, %v2252_v55  ;;  %v2254_v58 = vpop.f32.mrb[131].mxu0 }
 0x450   : > { %v6234_v52 = vpop.f32.mrb[118].mxu1  ;;  %3809 = vmatprep.mubr.f32.mxu0 %v4712_v40 }
 0x451   : > { %v2983_v3 = vpop.f32.mrb[119].mxu1  ;;  %4717 = vtanh.f32 %v4253_v23 }
 0x452   : > { %v2257_v27 = vpop.f32.mrb[132].mxu0 }
 0x453   : > { %v4714_v43 = vpop.eup %4713  ;;  %v4254_v62 = vadd.f32 %v6192_v51, %v2257_v27  ;;  %v2259_v25 = vpop.f32.mrb[133].mxu0 }
 0x454   : > { %v6237_v44 = vpop.f32.mrb[120].mxu1  ;;  %3810 = vmatmul.mubr.f32.gmra.mrb[174].mxu0 %v4714_v43 }
 0x455   : > { %v2988_v19 = vpop.f32.mrb[121].mxu1  ;;  %4719 = vtanh.f32 %v4254_v62 }
 0x456   : > { %v2262_v41 = vpop.f32.mrb[134].mxu0 }
 0x457   : > { %v4716_v45 = vpop.eup %4715  ;;  %v4255_v32 = vadd.f32 %v6192_v51, %v2262_v41  ;;  %v2264_v30 = vpop.f32.mrb[135].mxu0 }
 0x458   : > { %v6240_v28 = vpop.f32.mrb[122].mxu1  ;;  %3812 = vmatprep.mubr.f32.mxu0 %v4716_v45 }
 0x459   : > { %v2993_v14 = vpop.f32.mrb[123].mxu1  ;;  %4721 = vtanh.f32 %v4255_v32 }
 0x45a   : > { %v2267_v59 = vpop.f32.mrb[136].mxu0 }
 0x45b   : > { %v4718_v18 = vpop.eup %4717  ;;  %v4256_v60 = vadd.f32 %v6192_v51, %v2267_v59  ;;  %v2269_v37 = vpop.f32.mrb[137].mxu0 }
 0x45c   : > { %v6243_v61 = vpop.f32.mrb[124].mxu1  ;;  %3813 = vmatmul.mubr.f32.gmra.mrb[176].mxu0 %v4718_v18 }
 0x45d   : > { %v2998_v42 = vpop.f32.mrb[125].mxu1  ;;  %4723 = vtanh.f32 %v4256_v60 }
 0x45e   : > { %v2272_v6 = vpop.f32.mrb[138].mxu0 }
 0x45f   : > { %v4720_v63 = vpop.eup %4719  ;;  %v4257_v0 = vadd.f32 %v6192_v51, %v2272_v6  ;;  %v2274_v26 = vpop.f32.mrb[139].mxu0 }
 0x460   : > { %v6246_v39 = vpop.f32.mrb[126].mxu1  ;;  %3815 = vmatprep.mubr.f32.mxu0 %v4720_v63 }
 0x461   : > { %v3003_v17 = vpop.f32.mrb[127].mxu1  ;;  %4725 = vtanh.f32 %v4257_v0 }
 0x462   : > { %v2277_v29 = vpop.f32.mrb[140].mxu0 }
 0x463   : > { %v4722_v33 = vpop.eup %4721  ;;  %v4258_v10 = vadd.f32 %v6192_v51, %v2277_v29  ;;  %v2279_v34 = vpop.f32.mrb[141].mxu0 }
 0x464   : > { %v6249_v7 = vpop.f32.mrb[128].mxu1  ;;  %3816 = vmatmul.mubr.f32.gmra.mrb[178].mxu0 %v4722_v33 }
 0x465   : > { %v3008_v38 = vpop.f32.mrb[129].mxu1  ;;  %4727 = vtanh.f32 %v4258_v10 }
 0x466   : > { %v2282_v56 = vpop.f32.mrb[142].mxu0 }
 0x467   : > { %v4724_v54 = vpop.eup %4723  ;;  %v4259_v53 = vadd.f32 %v6192_v51, %v2282_v56  ;;  %v2284_v24 = vpop.f32.mrb[143].mxu0 }
 0x468   : > { %v6252_v11 = vpop.f32.mrb[130].mxu1  ;;  %3818 = vmatprep.mubr.f32.mxu0 %v4724_v54 }
 0x469   : > { %v3013_v47 = vpop.f32.mrb[131].mxu1  ;;  %4729 = vtanh.f32 %v4259_v53 }
 0x46a   : > { %v2287_v50 = vpop.f32.mrb[144].mxu0 }
 0x46b   : > { %v4726_v1 = vpop.eup %4725  ;;  %v4260_v13 = vadd.f32 %v6192_v51, %v2287_v50  ;;  %v2289_v49 = vpop.f32.mrb[145].mxu0 }
 0x46c   : > { %v6255_v31 = vpop.f32.mrb[132].mxu1  ;;  %3819 = vmatmul.mubr.f32.gmra.mrb[180].mxu0 %v4726_v1 }
 0x46d   : > { %v3018_v48 = vpop.f32.mrb[133].mxu1  ;;  %4731 = vtanh.f32 %v4260_v13 }
 0x46e   : > { %v2292_v35 = vpop.f32.mrb[146].mxu0 }
 0x46f   : > { %v4728_v16 = vpop.eup %4727  ;;  %v4261_v12 = vadd.f32 %v6192_v51, %v2292_v35  ;;  %v2294_v21 = vpop.f32.mrb[147].mxu0 }
 0x470   : > { %v6258_v55 = vpop.f32.mrb[134].mxu1  ;;  %3821 = vmatprep.mubr.f32.mxu0 %v4728_v16 }
 0x471   : > { %v3023_v40 = vpop.f32.mrb[135].mxu1  ;;  %4733 = vtanh.f32 %v4261_v12 }
 0x472   : > { %v2297_v23 = vpop.f32.mrb[148].mxu0 }
 0x473   : > { %v4730_v58 = vpop.eup %4729  ;;  %v4262_v3 = vadd.f32 %v6192_v51, %v2297_v23  ;;  %v2299_v27 = vpop.f32.mrb[149].mxu0 }
 0x474   : > { %v6261_v43 = vpop.f32.mrb[136].mxu1  ;;  %3822 = vmatmul.mubr.f32.gmra.mrb[182].mxu0 %v4730_v58 }
 0x475   : > { %v3028_v62 = vpop.f32.mrb[137].mxu1  ;;  %4735 = vtanh.f32 %v4262_v3 }
 0x476   : > { %v2302_v25 = vpop.f32.mrb[150].mxu0 }
 0x477   : > { %v4732_v19 = vpop.eup %4731  ;;  %v4263_v41 = vadd.f32 %v6192_v51, %v2302_v25  ;;  %v2304_v45 = vpop.f32.mrb[151].mxu0 }
 0x478   : > { %v6264_v32 = vpop.f32.mrb[138].mxu1  ;;  %3824 = vmatprep.mubr.f32.mxu1 %v4732_v19 }
 0x479   : > { %v3033_v30 = vpop.f32.mrb[139].mxu1  ;;  %4737 = vtanh.f32 %v4263_v41  ;;  %v6292_v41 = vld [vmem:[#allocation7 + $0x4] ss:$0 sm:$0xff] }
 0x47a   : > { %v2307_v14 = vpop.f32.mrb[152].mxu0  ;;  %v4269_v45 = vadd.f32 %v6292_v41, %v6204_v8  ;;  %v4268_v30 = vadd.f32 %v6292_v41, %v6201_v4  ;;  %v4271_v4 = vadd.f32 %v6292_v41, %v6210_v5  ;;  %v4270_v8 = vadd.f32 %v6292_v41, %v6207_v46 }
 0x47b   : > { %v4734_v59 = vpop.eup %4733  ;;  %v4264_v18 = vadd.f32 %v6192_v51, %v2307_v14  ;;  %v2309_v60 = vpop.f32.mrb[153].mxu0 }
 0x47c   : > { %v6267_v37 = vpop.f32.mrb[140].mxu1  ;;  %3825 = vmatmul.mubr.f32.vlgmr.msra.gmra.mrb[160].mxu1 %v4734_v59 }
 0x47d   : > { %v3038_v42 = vpop.f32.mrb[141].mxu1  ;;  %4739 = vtanh.f32 %v4264_v18 }
 0x47e   : > { %v2312_v6 = vpop.f32.mrb[154].mxu0 }
 0x47f   : > { %v4736_v63 = vpop.eup %4735  ;;  %v4265_v0 = vadd.f32 %v6192_v51, %v2312_v6  ;;  %v2314_v26 = vpop.f32.mrb[155].mxu0 }
 0x480   : > { %v6270_v17 = vpop.f32.mrb[142].mxu1  ;;  %3827 = vmatprep.mubr.f32.mxu1 %v4736_v63  ;;  %v4273_v26 = vadd.f32 %v6292_v41, %v6216_v22 }
 0x481   : > { %v3043_v29 = vpop.f32.mrb[143].mxu1  ;;  %4741 = vtanh.f32 %v4265_v0 }
 0x482   : > { %v2317_v33 = vpop.f32.mrb[156].mxu0  ;;  %v4272_v29 = vadd.f32 %v6292_v41, %v6213_v2 }
 0x483   : > { %v4738_v10 = vpop.eup %4737  ;;  %v4266_v34 = vadd.f32 %v6192_v51, %v2317_v33  ;;  %v2319_v38 = vpop.f32.mrb[157].mxu0 }
 0x484   : > { %v6273_v56 = vpop.f32.mrb[144].mxu1  ;;  %3828 = vmatmul.mubr.f32.gmra.mrb[162].mxu1 %v4738_v10  ;;  %v4274_v38 = vadd.f32 %v6292_v41, %v6219_v36 }
 0x485   : > { %v3048_v54 = vpop.f32.mrb[145].mxu1  ;;  %4743 = vtanh.f32 %v4266_v34  ;;  %v4275_v34 = vadd.f32 %v6292_v41, %v6222_v15 }
 0x486   : > { %v2322_v53 = vpop.f32.mrb[158].mxu0 }
 0x487   : > { %v4740_v24 = vpop.eup %4739  ;;  %v4267_v47 = vadd.f32 %v6192_v51, %v2322_v53  ;;  %v2324_v50 = vpop.f32.mrb[159].mxu0 }
 0x488   : > { %v6276_v1 = vpop.f32.mrb[146].mxu1  ;;  %3830 = vmatprep.mubr.f32.mxu1 %v4740_v24  ;;  %v4277_v24 = vadd.f32 %v6292_v41, %v6228_v9 }
 0x489   : > { %v3053_v13 = vpop.f32.mrb[147].mxu1  ;;  %4745 = vtanh.f32 %v4267_v47  ;;  %v4276_v47 = vadd.f32 %v6292_v41, %v6225_v20 }
 0x48b   : > { %v4742_v49 = vpop.eup %4741  ;;  %v6278_v48 = vpop.f32.mrb[148].mxu1 }
 0x48c   : > { %v3058_v35 = vpop.f32.mrb[149].mxu1  ;;  %3831 = vmatmul.mubr.f32.gmra.mrb[164].mxu1 %v4742_v49  ;;  %v4279_v49 = vadd.f32 %v6292_v41, %v6234_v52 }
 0x48d   : > { %v4278_v35 = vadd.f32 %v6292_v41, %v6231_v57 }
 0x48f   : > { %v4744_v16 = vpop.eup %4743  ;;  %v6280_v12 = vpop.f32.mrb[150].mxu1 }
 0x490   : > { %v3063_v21 = vpop.f32.mrb[151].mxu1  ;;  %3833 = vmatprep.mubr.f32.mxu1 %v4744_v16 }
 0x493   : > { %v4746_v40 = vpop.eup %4745  ;;  %v6282_v23 = vpop.f32.mrb[152].mxu1 }
 0x494   : > { %v3068_v51 = vpop.f32.mrb[153].mxu1  ;;  %3834 = vmatmul.mubr.f32.gmra.mrb[166].mxu1 %v4746_v40  ;;  %v4281_v40 = vadd.f32 %v6292_v41, %v6240_v28 }
 0x495   : > { %v4280_v51 = vadd.f32 %v6292_v41, %v6237_v44 }
 0x497   : > { %v6284_v58 = vpop.f32.mrb[154].mxu1 }
 0x498   : > { %v3073_v3 = vpop.f32.mrb[155].mxu1 }
 0x49b   : > { %v6286_v27 = vpop.f32.mrb[156].mxu1 }
 0x49c   : > { %v3078_v62 = vpop.f32.mrb[157].mxu1 }
 0x49f   : > { %v6288_v25 = vpop.f32.mrb[158].mxu1 }
 0x4a0   : > { %v3083_v19 = vpop.f32.mrb[159].mxu1 }
 0x4a1   : > { %v4283_v19 = vadd.f32 %v6292_v41, %v6246_v39 }
 0x4ef   : > { %v3790_v14 = vpop.f32.mrb[160].mxu0 }
 0x4f0   : > { %v3157_v59 = vadd.f32 %v4269_v45, %v3790_v14  ;;  %v3151_v18 = vpop.f32.mrb[161].mxu0  ;;  %v4282_v45 = vadd.f32 %v6292_v41, %v6243_v61 }
 0x4f1   : > { %v3152_v60 = vadd.f32 %v4268_v30, %v3151_v18  ;;  %v4284_v18 = vadd.f32 %v6292_v41, %v6249_v7 }
 0x4f2   : > { %3312 = vst.msk [vmem:[%s6301_s7 + $0x8] sm:$0xff] %vm3310_vm0, %v3157_v59  ;;  %v4285_v59 = vadd.f32 %v6292_v41, %v6252_v11 }
 0x4f3   : > { %3311 = vst.msk [vmem:[%s6301_s7] sm:$0xff] %vm3310_vm0, %v3152_v60 }
 0x4f7   : > { %v3793_v42 = vpop.f32.mrb[162].mxu0 }
 0x4f8   : > { %v3167_v6 = vadd.f32 %v4271_v4, %v3793_v42  ;;  %v3161_v63 = vpop.f32.mrb[163].mxu0  ;;  %v4286_v42 = vadd.f32 %v6292_v41, %v6255_v31 }
 0x4f9   : > { %v3162_v0 = vadd.f32 %v4270_v8, %v3161_v63  ;;  %v4287_v8 = vadd.f32 %v6292_v41, %v6258_v55 }
 0x4fa   : > { %3314 = vst.msk [vmem:[%s6301_s7 + $0x18] sm:$0xff] %vm3310_vm0, %v3167_v6 }
 0x4fb   : > { %3313 = vst.msk [vmem:[%s6301_s7 + $0x10] sm:$0xff] %vm3310_vm0, %v3162_v0  ;;  %v4289_v0 = vadd.f32 %v6292_v41, %v6264_v32 }
 0x4ff   : > { %v3796_v5 = vpop.f32.mrb[164].mxu0 }
 0x500   : > { %v3177_v33 = vadd.f32 %v4273_v26, %v3796_v5  ;;  %v3171_v10 = vpop.f32.mrb[165].mxu0  ;;  %v4288_v26 = vadd.f32 %v6292_v41, %v6261_v43 }
 0x501   : > { %v3172_v46 = vadd.f32 %v4272_v29, %v3171_v10  ;;  %v4290_v10 = vadd.f32 %v6292_v41, %v6267_v37 }
 0x502   : > { %3316 = vst.msk [vmem:[%s6301_s7 + $0x28] sm:$0xff] %vm3310_vm0, %v3177_v33  ;;  %v4291_v33 = vadd.f32 %v6292_v41, %v6270_v17 }
 0x503   : > { %3315 = vst.msk [vmem:[%s6301_s7 + $0x20] sm:$0xff] %vm3310_vm0, %v3172_v46 }
 0x507   : > { %v3799_v22 = vpop.f32.mrb[166].mxu0 }
 0x508   : > { %v3187_v54 = vadd.f32 %v4275_v34, %v3799_v22  ;;  %v3181_v53 = vpop.f32.mrb[167].mxu0  ;;  %v4292_v22 = vadd.f32 %v6292_v41, %v6273_v56 }
 0x509   : > { %v3182_v2 = vadd.f32 %v4274_v38, %v3181_v53  ;;  %v4293_v38 = vadd.f32 %v6292_v41, %v6276_v1 }
 0x50a   : > { %3318 = vst.msk [vmem:[%s6301_s7 + $0x38] sm:$0xff] %vm3310_vm0, %v3187_v54 }
 0x50b   : > { %3317 = vst.msk [vmem:[%s6301_s7 + $0x30] sm:$0xff] %vm3310_vm0, %v3182_v2  ;;  %v4295_v2 = vadd.f32 %v6292_v41, %v6280_v12 }
 0x50f   : > { %v3802_v15 = vpop.f32.mrb[168].mxu0 }
 0x510   : > { %v3197_v50 = vadd.f32 %v4277_v24, %v3802_v15  ;;  %v3191_v13 = vpop.f32.mrb[169].mxu0  ;;  %v4294_v24 = vadd.f32 %v6292_v41, %v6278_v48 }
 0x511   : > { %v3192_v36 = vadd.f32 %v4276_v47, %v3191_v13  ;;  %v4296_v13 = vadd.f32 %v6292_v41, %v6282_v23 }
 0x512   : > { %3320 = vst.msk [vmem:[%s6301_s7 + $0x48] sm:$0xff] %vm3310_vm0, %v3197_v50  ;;  %v4297_v50 = vadd.f32 %v6292_v41, %v6284_v58 }
 0x513   : > { %3319 = vst.msk [vmem:[%s6301_s7 + $0x40] sm:$0xff] %vm3310_vm0, %v3192_v36 }
 0x517   : > { %v3805_v9 = vpop.f32.mrb[170].mxu0 }
 0x518   : > { %v3207_v16 = vadd.f32 %v4279_v49, %v3805_v9  ;;  %v3201_v21 = vpop.f32.mrb[171].mxu0  ;;  %v4298_v9 = vadd.f32 %v6292_v41, %v6286_v27 }
 0x519   : > { %v3202_v20 = vadd.f32 %v4278_v35, %v3201_v21  ;;  %v4299_v35 = vadd.f32 %v6292_v41, %v6288_v25 }
 0x51a   : > { %3322 = vst.msk [vmem:[%s6301_s7 + $0x58] sm:$0xff] %vm3310_vm0, %v3207_v16 }
 0x51b   : > { %3321 = vst.msk [vmem:[%s6301_s7 + $0x50] sm:$0xff] %vm3310_vm0, %v3202_v20 }
 0x51f   : > { %v3808_v52 = vpop.f32.mrb[172].mxu0 }
 0x520   : > { %v3217_v3 = vadd.f32 %v4281_v40, %v3808_v52  ;;  %v3211_v62 = vpop.f32.mrb[173].mxu0 }
 0x521   : > { %v3212_v57 = vadd.f32 %v4280_v51, %v3211_v62 }
 0x522   : > { %3324 = vst.msk [vmem:[%s6301_s7 + $0x68] sm:$0xff] %vm3310_vm0, %v3217_v3 }
 0x523   : > { %3323 = vst.msk [vmem:[%s6301_s7 + $0x60] sm:$0xff] %vm3310_vm0, %v3212_v57 }
 0x527   : > { %v3811_v28 = vpop.f32.mrb[174].mxu0 }
 0x528   : > { %v3227_v30 = vadd.f32 %v4283_v19, %v3811_v28  ;;  %v3221_v14 = vpop.f32.mrb[175].mxu0 }
 0x529   : > { %v3222_v44 = vadd.f32 %v4282_v45, %v3221_v14 }
 0x52a   : > { %3326 = vst.msk [vmem:[%s6301_s7 + $0x78] sm:$0xff] %vm3310_vm0, %v3227_v30 }
 0x52b   : > { %3325 = vst.msk [vmem:[%s6301_s7 + $0x70] sm:$0xff] %vm3310_vm0, %v3222_v44 }
 0x52f   : > { %v3814_v39 = vpop.f32.mrb[176].mxu0 }
 0x530   : > { %v3237_v60 = vadd.f32 %v4285_v59, %v3814_v39  ;;  %v3231_v4 = vpop.f32.mrb[177].mxu0 }
 0x531   : > { %v3232_v61 = vadd.f32 %v4284_v18, %v3231_v4 }
 0x532   : > { %3328 = vst.msk [vmem:[%s6301_s7 + $0x88] sm:$0xff] %vm3310_vm0, %v3237_v60 }
 0x533   : > { %3327 = vst.msk [vmem:[%s6301_s7 + $0x80] sm:$0xff] %vm3310_vm0, %v3232_v61 }
 0x537   : > { %v3817_v11 = vpop.f32.mrb[178].mxu0 }
 0x538   : > { %v3247_v6 = vadd.f32 %v4287_v8, %v3817_v11  ;;  %v3241_v63 = vpop.f32.mrb[179].mxu0 }
 0x539   : > { %v3242_v7 = vadd.f32 %v4286_v42, %v3241_v63 }
 0x53a   : > { %3330 = vst.msk [vmem:[%s6301_s7 + $0x98] sm:$0xff] %vm3310_vm0, %v3247_v6 }
 0x53b   : > { %3329 = vst.msk [vmem:[%s6301_s7 + $0x90] sm:$0xff] %vm3310_vm0, %v3242_v7 }
 0x53f   : > { %v3820_v55 = vpop.f32.mrb[180].mxu0 }
 0x540   : > { %v3257_v29 = vadd.f32 %v4289_v0, %v3820_v55  ;;  %v3251_v5 = vpop.f32.mrb[181].mxu0 }
 0x541   : > { %v3252_v31 = vadd.f32 %v4288_v26, %v3251_v5 }
 0x542   : > { %3332 = vst.msk [vmem:[%s6301_s7 + $0xa8] sm:$0xff] %vm3310_vm0, %v3257_v29 }
 0x543   : > { %3331 = vst.msk [vmem:[%s6301_s7 + $0xa0] sm:$0xff] %vm3310_vm0, %v3252_v31 }
 0x547   : > { %v3823_v32 = vpop.f32.mrb[182].mxu0 }
 0x548   : > { %v3267_v46 = vadd.f32 %v4291_v33, %v3823_v32  ;;  %v3261_v34 = vpop.f32.mrb[183].mxu0 }
 0x549   : > { %v3262_v43 = vadd.f32 %v4290_v10, %v3261_v34 }
 0x54a   : > { %3334 = vst.msk [vmem:[%s6301_s7 + $0xb8] sm:$0xff] %vm3310_vm0, %v3267_v46 }
 0x54b   : > { %3333 = vst.msk [vmem:[%s6301_s7 + $0xb0] sm:$0xff] %vm3310_vm0, %v3262_v43 }
 0x54f   : > { %v3826_v17 = vpop.f32.mrb[160].mxu1 }
 0x550   : > { %v3277_v54 = vadd.f32 %v4293_v38, %v3826_v17  ;;  %v3271_v53 = vpop.f32.mrb[161].mxu1 }
 0x551   : > { %v3272_v37 = vadd.f32 %v4292_v22, %v3271_v53 }
 0x552   : > { %3336 = vst.msk [vmem:[%s6301_s7 + $0xc8] sm:$0xff] %vm3310_vm0, %v3277_v54 }
 0x553   : > { %3335 = vst.msk [vmem:[%s6301_s7 + $0xc0] sm:$0xff] %vm3310_vm0, %v3272_v37 }
 0x557   : > { %v3829_v1 = vpop.f32.mrb[162].mxu1 }
 0x558   : > { %v3287_v47 = vadd.f32 %v4295_v2, %v3829_v1  ;;  %v3281_v15 = vpop.f32.mrb[163].mxu1 }
 0x559   : > { %v3282_v56 = vadd.f32 %v4294_v24, %v3281_v15 }
 0x55a   : > { %3338 = vst.msk [vmem:[%s6301_s7 + $0xd8] sm:$0xff] %vm3310_vm0, %v3287_v47 }
 0x55b   : > { %3337 = vst.msk [vmem:[%s6301_s7 + $0xd0] sm:$0xff] %vm3310_vm0, %v3282_v56 }
 0x55f   : > { %v3832_v12 = vpop.f32.mrb[164].mxu1 }
 0x560   : > { %v3297_v36 = vadd.f32 %v4297_v50, %v3832_v12  ;;  %v3291_v49 = vpop.f32.mrb[165].mxu1 }
 0x561   : > { %v3292_v48 = vadd.f32 %v4296_v13, %v3291_v49 }
 0x562   : > { %3340 = vst.msk [vmem:[%s6301_s7 + $0xe8] sm:$0xff] %vm3310_vm0, %v3297_v36 }
 0x563   : > { %3339 = vst.msk [vmem:[%s6301_s7 + $0xe0] sm:$0xff] %vm3310_vm0, %v3292_v48 }
 0x567   : > { %v3835_v16 = vpop.f32.mrb[166].mxu1 }
 0x568   : > { %v3307_v21 = vadd.f32 %v4299_v35, %v3835_v16  ;;  %v3301_v58 = vpop.f32.mrb[167].mxu1 }
 0x569   : > { %v3302_v20 = vadd.f32 %v4298_v9, %v3301_v58 }
 0x56a   : > { %3342 = vst.msk [vmem:[%s6301_s7 + $0xf8] sm:$0xff] %vm3310_vm0, %v3307_v21 }
 0x56b   : > { %3341 = vst.msk [vmem:[%s6301_s7 + $0xf0] sm:$0xff] %vm3310_vm0, %v3302_v20 }
 0x56c PF: > { %p14_p6 = scmp.ge.s32.totalorder %s5043_s29, 4   ;;  %s6608_s12 = smov %s4908_s13 }
 0x56d   : > { %s6609_s13 = smov %s4912_s14  ;;  %s6610_s14 = smov %s5054_s5 }
 0x56e   : > { %s6611_s15 = smov %s5043_s29  ;;  %16 = sbr.rel (!%p14_p6) target bundleno = 4 (0x4), region = 80 }
 0x575   :  { %3365 = vsyncpa [#allocation4], 1 }
 0x576   :  { %3367 = vsyncpa [#allocation4 + $0x1], 1 }
 0x577   :  { %3368 = vsyncpa [#allocation6], 1 }

</bundles_post_ra>
